<compile_context>
chip_gen: v7x
topology: tpu7x:2x2x1
jax: 0.10.0
libtpu: 0.0.40
codegen_flags: <defaults>
</compile_context>

<pallas_src>
import functools

import jax
import jax.numpy as jnp
from jax import lax
from jax.experimental import pallas as pl
from jax.experimental.pallas import tpu as pltpu


def _rup(n, m=128):
    """Round n up to a multiple of m."""
    return ((n + m - 1) // m) * m


def _tpu_hw():
    """Best-effort query of VMEM capacity and TensorCores-per-chip; safe defaults otherwise."""
    vmem_cap = 64 << 20          # conservative default = v7x per-TC VMEM
    num_tc = 1
    try:
        info = pltpu.get_tpu_info()
        vmem_cap = int(getattr(info, "vmem_capacity_bytes", vmem_cap))
        for name in ("num_cores", "tensorcores_per_chip", "num_tensorcores"):
            if hasattr(info, name):
                num_tc = max(num_tc, int(getattr(info, name)))
                break
    except Exception:
        pass
    try:
        kind = jax.devices()[0].device_kind.lower()
        if "v7" in kind:                      # v7x: 2 TensorCores per chip
            num_tc = max(num_tc, 2)
    except Exception:
        pass
    return vmem_cap, num_tc


def _vae_kernel(
    x_ref, eps_ref,
    w1_ref, b1_ref, w2_ref, b2_ref,
    wmulv_ref, bmulv_ref,
    wd1_ref, bd1_ref, wd2_ref, bd2_ref,
    out_ref,
    *, lp, precision,
):
    cdt = w1_ref.dtype  # compute dtype for MXU inputs (f32 or bf16); accumulation is always f32

    x = x_ref[...]

    # encoder: Linear -> ReLU -> Linear -> ReLU   (biases kept in f32, added to f32 accumulators)
    h = jnp.dot(x, w1_ref[...], preferred_element_type=jnp.float32,
                precision=precision) + b1_ref[...]
    h = jnp.maximum(h, 0.0).astype(cdt)
    h = jnp.dot(h, w2_ref[...], preferred_element_type=jnp.float32,
                precision=precision) + b2_ref[...]
    h = jnp.maximum(h, 0.0).astype(cdt)

    # fused latent heads: single (Hp, 2*Lp) matmul -> [mu | logvar] slab
    mulv = jnp.dot(h, wmulv_ref[...], preferred_element_type=jnp.float32,
                   precision=precision) + bmulv_ref[...]
    mu = mulv[:, :lp]
    logvar = mulv[:, lp:]

    # reparameterize: z = mu + eps * exp(0.5 * logvar)  (exp rides the EUP slot)
    z = mu + eps_ref[...].astype(jnp.float32) * jnp.exp(logvar * 0.5)

    # decoder: Linear -> ReLU -> Linear
    d = jnp.dot(z.astype(cdt), wd1_ref[...], preferred_element_type=jnp.float32,
                precision=precision) + bd1_ref[...]
    d = jnp.maximum(d, 0.0).astype(cdt)
    recon = jnp.dot(d, wd2_ref[...], preferred_element_type=jnp.float32,
                    precision=precision) + bd2_ref[...]

    # lane-dense packed output slab: [ z (Lp) | mu (Lp) | logvar (Lp) | recon (Dp) ]
    out_ref[:, 0:lp] = z.astype(out_ref.dtype)
    out_ref[:, lp:3 * lp] = mulv.astype(out_ref.dtype)      # mu|logvar written contiguously
    out_ref[:, 3 * lp:] = recon.astype(out_ref.dtype)


def vae_block_forward(x, eps, params, *, block_b=None, compute_dtype=jnp.float32,
                      out_dtype=None):
    """Fused VAE forward. x: (B, input_dim), eps: (B, latent_dim) ~ N(0,1).

    Returns (z, mu, logvar, recon) in out_dtype (f32 by default; compute_dtype when bf16).
    """
    B, D = x.shape
    L = eps.shape[1]
    H = params["w1"].shape[1]

    # --- pad feature dims to MXU/lane-native multiples of 128 (exactness-preserving) ---
    Dp, Hp, Lp = _rup(D), _rup(H), _rup(L)
    Wout = 3 * Lp + Dp                      # packed output width (multiple of 128)
    cdt = jnp.dtype(compute_dtype)
    if out_dtype is None:
        out_dtype = jnp.float32 if cdt == jnp.dtype(jnp.float32) else cdt
    odt = jnp.dtype(out_dtype)
    cbytes = cdt.itemsize
    obytes = odt.itemsize

    def pad2(a, r, c):
        return jnp.pad(a, ((0, r - a.shape[0]), (0, c - a.shape[1])))

    w1 = pad2(params["w1"], Dp, Hp).astype(cdt)
    b1 = pad2(params["b1"], 1, Hp).astype(jnp.float32)
    w2 = pad2(params["w2"], Hp, Hp).astype(cdt)
    b2 = pad2(params["b2"], 1, Hp).astype(jnp.float32)
    # fuse mu/logvar heads into one weight/bias
    wmulv = jnp.concatenate(
        [pad2(params["wmu"], Hp, Lp), pad2(params["wlv"], Hp, Lp)], axis=1).astype(cdt)
    bmulv = jnp.concatenate(
        [pad2(params["bmu"], 1, Lp), pad2(params["blv"], 1, Lp)], axis=1).astype(jnp.float32)
    wd1 = pad2(params["wd1"], Lp, Hp).astype(cdt)
    bd1 = pad2(params["bd1"], 1, Hp).astype(jnp.float32)
    wd2 = pad2(params["wd2"], Hp, Dp).astype(cdt)
    bd2 = pad2(params["bd2"], 1, Dp).astype(jnp.float32)

    x_p = pad2(x, B, Dp).astype(cdt)
    eps_p = pad2(eps, B, Lp).astype(cdt)    # padded eps lanes are 0 -> padded z lanes stay 0

    vmem_cap, num_tc = _tpu_hw()

    weight_elems = Dp * Hp + Hp * Hp + Hp * 2 * Lp + Lp * Hp + Hp * Dp
    bias_elems = Hp + Hp + 2 * Lp + Hp + Dp
    weight_bytes = weight_elems * cbytes + bias_elems * 4

    def tile_bytes(bb, weight_bufs):
        # weights (xN buffers) + double-buffered i/o tiles + live f32 intermediates
        io = 2 * bb * (Dp + Lp) * cbytes + 2 * bb * Wout * obytes
        live = bb * (2 * Hp + 3 * Lp + Dp + Wout) * 4
        return weight_bufs * weight_bytes + io + live

    fit_budget = int(0.8 * vmem_cap)

    # --- batch tile: generation-aware, gated on the VMEM estimate ---
    if block_b is None:
        cands = [c for c in (1024, 512, 256, 128, 64, 32, 16, 8) if c <= B and B % c == 0]
        if not cands:
            cands = [B]
        chosen = None
        if num_tc >= 2:
            # v7x: keep a multiple-of-num_tc number of "parallel" grid steps so both TCs work
            for c in cands:
                if B // c >= num_tc and (B // c) % num_tc == 0 and tile_bytes(c, 1) <= fit_budget:
                    chosen = c
                    break
        if chosen is None:
            # single-TC (v5e/v6e) or fallback: grid is a serial loop -> largest tile that fits
            for c in cands:
                if tile_bytes(c, 1) <= fit_budget:
                    chosen = c
                    break
        block_b = chosen if chosen is not None else cands[-1]
    assert B % block_b == 0

    # --- advisory cost estimate ---
    flops = 2 * B * weight_elems
    transcendentals = B * Lp
    bytes_accessed = B * (Dp + Lp) * cbytes + weight_bytes + B * Wout * obytes
    cost = pl.CostEstimate(flops=flops, transcendentals=transcendentals,
                           bytes_accessed=bytes_accessed)

    precision = (lax.Precision.HIGHEST if cdt == jnp.dtype(jnp.float32)
                 else lax.Precision.DEFAULT)

    def run(single_buffer_weights):
        weight_bufs = 1 if single_buffer_weights else 2

        def inv_spec(shape):
            # grid-invariant full-extent block (weights/biases): same block for every batch step
            if single_buffer_weights:
                return pl.BlockSpec(shape, lambda i: (0, 0), pipeline_mode=pl.Buffered(1))
            return pl.BlockSpec(shape, lambda i: (0, 0))

        in_specs = [
            pl.BlockSpec((block_b, Dp), lambda i: (i, 0)),   # x
            pl.BlockSpec((block_b, Lp), lambda i: (i, 0)),   # eps
            inv_spec((Dp, Hp)), inv_spec((1, Hp)),           # encoder layer 1
            inv_spec((Hp, Hp)), inv_spec((1, Hp)),           # encoder layer 2
            inv_spec((Hp, 2 * Lp)), inv_spec((1, 2 * Lp)),   # fused fc_mu | fc_logvar
            inv_spec((Lp, Hp)), inv_spec((1, Hp)),           # decoder layer 1
            inv_spec((Hp, Dp)), inv_spec((1, Dp)),           # decoder layer 2
        ]
        out_specs = pl.BlockSpec((block_b, Wout), lambda i: (i, 0))
        out_shape = jax.ShapeDtypeStruct((B, Wout), odt)

        # needed + headroom, capped below physical VMEM (leave room for Mosaic scratch)
        vmem_needed = tile_bytes(block_b, weight_bufs)
        vmem_limit = int(min(vmem_needed + (8 << 20), (vmem_cap * 7) // 8))
        vmem_limit = max(vmem_limit, 16 << 20)

        fn = pl.pallas_call(
            functools.partial(_vae_kernel, lp=Lp, precision=precision),
            grid_spec=pltpu.PrefetchScalarGridSpec(
                num_scalar_prefetch=0,
                grid=(B // block_b,),
                in_specs=in_specs,
                out_specs=out_specs,
            ),
            out_shape=out_shape,
            compiler_params=pltpu.CompilerParams(
                dimension_semantics=("parallel",),
                vmem_limit_bytes=vmem_limit,
            ),
            cost_estimate=cost,
        )
        return fn(x_p, eps_p, w1, b1, w2, b2, wmulv, bmulv, wd1, bd1, wd2, bd2)

    try:
        out = run(single_buffer_weights=True)
    except Exception:
        # Fallback for jax versions that reject single-buffered (Buffered(1)) input specs.
        out = run(single_buffer_weights=False)

    # split the packed slab and drop padded lanes
    z = out[:, 0:L]
    mu = out[:, Lp:Lp + L]
    logvar = out[:, 2 * Lp:2 * Lp + L]
    recon = out[:, 3 * Lp:3 * Lp + D]
    return z, mu, logvar, recon


def init_params(key, input_dim, latent_dim, hidden_dim):
    """Deterministic parameter init. Weights stored as (in, out); biases as (1, out)."""
    keys = jax.random.split(key, 12)

    def linear(kw, kb, fan_in, fan_out):
        # PyTorch default: U(-1/sqrt(fan_in), 1/sqrt(fan_in)) for both weight and bias.
        bound = 1.0 / jnp.sqrt(fan_in)
        w = jax.random.uniform(kw, (fan_in, fan_out), jnp.float32, -bound, bound)
        b = jax.random.uniform(kb, (1, fan_out), jnp.float32, -bound, bound)
        return w, b

    w1, b1 = linear(keys[0], keys[1], input_dim, hidden_dim)
    w2, b2 = linear(keys[2], keys[3], hidden_dim, hidden_dim)
    wmu, bmu = linear(keys[4], keys[5], hidden_dim, latent_dim)
    wlv, blv = linear(keys[6], keys[7], hidden_dim, latent_dim)
    wd1, bd1 = linear(keys[8], keys[9], latent_dim, hidden_dim)
    wd2, bd2 = linear(keys[10], keys[11], hidden_dim, input_dim)
    return dict(w1=w1, b1=b1, w2=w2, b2=b2, wmu=wmu, bmu=bmu,
                wlv=wlv, blv=blv, wd1=wd1, bd1=bd1, wd2=wd2, bd2=bd2)


def vae_block_ref(x, eps, p):
    """Pure-JAX reference of the same forward (true-f32 matmul precision)."""
    hp = lax.Precision.HIGHEST
    h = jnp.maximum(jnp.dot(x, p["w1"], precision=hp) + p["b1"], 0.0)
    h = jnp.maximum(jnp.dot(h, p["w2"], precision=hp) + p["b2"], 0.0)
    mu = jnp.dot(h, p["wmu"], precision=hp) + p["bmu"]
    logvar = jnp.dot(h, p["wlv"], precision=hp) + p["blv"]
    z = mu + eps * jnp.exp(0.5 * logvar)
    d = jnp.maximum(jnp.dot(z, p["wd1"], precision=hp) + p["bd1"], 0.0)
    recon = jnp.dot(d, p["wd2"], precision=hp) + p["bd2"]
    return z, mu, logvar, recon


if __name__ == "__main__":
    # Small shapes consistent with the module: batch=8, input_dim=32, latent_dim=16, hidden=32.
    B, D, L, H = 8, 32, 16, 32

    key = jax.random.PRNGKey(0)
    k_param, k_x, k_eps = jax.random.split(key, 3)

    params = init_params(k_param, input_dim=D, latent_dim=L, hidden_dim=H)
    x = jax.random.normal(k_x, (B, D), jnp.float32)
    # eps ~ randn_like(std): drawn once, deterministically, outside the kernel.
    eps = jax.random.normal(k_eps, (B, L), jnp.float32)

    # f32 compute path (precision=HIGHEST on the MXU): must match the pure-JAX reference tightly.
    z, mu, logvar, recon = vae_block_forward(x, eps, params)
    jax.block_until_ready((z, mu, logvar, recon))

    z_r, mu_r, lv_r, rec_r = vae_block_ref(x, eps, params)
    assert jnp.allclose(z, z_r, atol=1e-4, rtol=1e-4)
    assert jnp.allclose(mu, mu_r, atol=1e-4, rtol=1e-4)
    assert jnp.allclose(logvar, lv_r, atol=1e-4, rtol=1e-4)
    assert jnp.allclose(recon, rec_r, atol=1e-4, rtol=1e-4)

    # bf16 compute path (bf16-native MXU on v5e/v6e/v7x, f32 accumulation, bf16 output slab):
    # loose check -- noise and activations are quantized to bf16 on purpose.
    z16, mu16, lv16, rec16 = vae_block_forward(x, eps, params, compute_dtype=jnp.bfloat16)
    jax.block_until_ready((z16, mu16, lv16, rec16))
    rec16_f32 = rec16.astype(jnp.float32)
    assert bool(jnp.all(jnp.isfinite(rec16_f32)))
    assert jnp.allclose(rec16_f32, rec_r, atol=1e-1, rtol=1e-1)

    print("KERNEL_OK")
</pallas_src>

<mosaic_0001>
module attributes {stable_mosaic.version = 11 : i64} {
  func.func @_vae_kernel(%arg0: i32, %arg1: memref<8x128xf32, #tpu.memory_space<vmem>>, %arg2: memref<8x128xf32, #tpu.memory_space<vmem>>, %arg3: memref<128x128xf32, #tpu.memory_space<vmem>>, %arg4: memref<1x128xf32, #tpu.memory_space<vmem>>, %arg5: memref<128x128xf32, #tpu.memory_space<vmem>>, %arg6: memref<1x128xf32, #tpu.memory_space<vmem>>, %arg7: memref<128x256xf32, #tpu.memory_space<vmem>>, %arg8: memref<1x256xf32, #tpu.memory_space<vmem>>, %arg9: memref<128x128xf32, #tpu.memory_space<vmem>>, %arg10: memref<1x128xf32, #tpu.memory_space<vmem>>, %arg11: memref<128x128xf32, #tpu.memory_space<vmem>>, %arg12: memref<1x128xf32, #tpu.memory_space<vmem>>, %arg13: memref<8x512xf32, #tpu.memory_space<vmem>>) attributes {dimension_semantics = [#tpu.dimension_semantics<parallel>], iteration_bounds = array<i64: 1>, scalar_prefetch = 0 : i64, scratch_operands = 0 : i64, tpu.core_type = #tpu.core_type<tc>, window_params = [{transform_indices = @transform_0, window_bounds = array<i64: 8, 128>}, {transform_indices = @transform_1, window_bounds = array<i64: 8, 128>}, {pipeline_mode = #tpu.pipeline_mode<synchronous>, transform_indices = @transform_2, window_bounds = array<i64: 128, 128>}, {pipeline_mode = #tpu.pipeline_mode<synchronous>, transform_indices = @transform_3, window_bounds = array<i64: 1, 128>}, {pipeline_mode = #tpu.pipeline_mode<synchronous>, transform_indices = @transform_4, window_bounds = array<i64: 128, 128>}, {pipeline_mode = #tpu.pipeline_mode<synchronous>, transform_indices = @transform_5, window_bounds = array<i64: 1, 128>}, {pipeline_mode = #tpu.pipeline_mode<synchronous>, transform_indices = @transform_6, window_bounds = array<i64: 128, 256>}, {pipeline_mode = #tpu.pipeline_mode<synchronous>, transform_indices = @transform_7, window_bounds = array<i64: 1, 256>}, {pipeline_mode = #tpu.pipeline_mode<synchronous>, transform_indices = @transform_8, window_bounds = array<i64: 128, 128>}, {pipeline_mode = #tpu.pipeline_mode<synchronous>, transform_indices = @transform_9, window_bounds = array<i64: 1, 128>}, {pipeline_mode = #tpu.pipeline_mode<synchronous>, transform_indices = @transform_10, window_bounds = array<i64: 128, 128>}, {pipeline_mode = #tpu.pipeline_mode<synchronous>, transform_indices = @transform_11, window_bounds = array<i64: 1, 128>}, {transform_indices = @transform_12, window_bounds = array<i64: 8, 512>}]} {
    %c0 = arith.constant 0 : index
    %c0_0 = arith.constant 0 : index
    %0 = vector.load %arg1[%c0, %c0_0] : memref<8x128xf32, #tpu.memory_space<vmem>>, vector<8x128xf32>
    %c0_1 = arith.constant 0 : index
    %c0_2 = arith.constant 0 : index
    %1 = vector.load %arg3[%c0_1, %c0_2] : memref<128x128xf32, #tpu.memory_space<vmem>>, vector<128x128xf32>
    %cst = arith.constant dense<0.000000e+00> : vector<8x128xf32>
    %2 = tpu.matmul %0, %1, %cst {dimension_numbers = #tpu.dot_dimension_numbers<[1], [0], [0], [1], [0, 0, 1, 1], [], []>, precision = #tpu.contract_precision<fp32>} : vector<8x128xf32>, vector<128x128xf32>, vector<8x128xf32> -> vector<8x128xf32>
    %c0_3 = arith.constant 0 : index
    %c0_4 = arith.constant 0 : index
    %3 = vector.load %arg4[%c0_3, %c0_4] : memref<1x128xf32, #tpu.memory_space<vmem>>, vector<1x128xf32>
    %4 = vector.broadcast %3 : vector<1x128xf32> to vector<8x128xf32>
    %5 = arith.addf %2, %4 : vector<8x128xf32>
    %cst_5 = arith.constant 0.000000e+00 : f32
    %6 = vector.broadcast %cst_5 : f32 to vector<8x128xf32>
    %7 = arith.maximumf %5, %6 : vector<8x128xf32>
    %c0_6 = arith.constant 0 : index
    %c0_7 = arith.constant 0 : index
    %8 = vector.load %arg5[%c0_6, %c0_7] : memref<128x128xf32, #tpu.memory_space<vmem>>, vector<128x128xf32>
    %cst_8 = arith.constant dense<0.000000e+00> : vector<8x128xf32>
    %9 = tpu.matmul %7, %8, %cst_8 {dimension_numbers = #tpu.dot_dimension_numbers<[1], [0], [0], [1], [0, 0, 1, 1], [], []>, precision = #tpu.contract_precision<fp32>} : vector<8x128xf32>, vector<128x128xf32>, vector<8x128xf32> -> vector<8x128xf32>
    %c0_9 = arith.constant 0 : index
    %c0_10 = arith.constant 0 : index
    %10 = vector.load %arg6[%c0_9, %c0_10] : memref<1x128xf32, #tpu.memory_space<vmem>>, vector<1x128xf32>
    %11 = vector.broadcast %10 : vector<1x128xf32> to vector<8x128xf32>
    %12 = arith.addf %9, %11 : vector<8x128xf32>
    %cst_11 = arith.constant 0.000000e+00 : f32
    %13 = vector.broadcast %cst_11 : f32 to vector<8x128xf32>
    %14 = arith.maximumf %12, %13 : vector<8x128xf32>
    %c0_12 = arith.constant 0 : index
    %c0_13 = arith.constant 0 : index
    %15 = vector.load %arg7[%c0_12, %c0_13] : memref<128x256xf32, #tpu.memory_space<vmem>>, vector<128x256xf32>
    %cst_14 = arith.constant dense<0.000000e+00> : vector<8x256xf32>
    %16 = tpu.matmul %14, %15, %cst_14 {dimension_numbers = #tpu.dot_dimension_numbers<[1], [0], [0], [1], [0, 0, 1, 1], [], []>, precision = #tpu.contract_precision<fp32>} : vector<8x128xf32>, vector<128x256xf32>, vector<8x256xf32> -> vector<8x256xf32>
    %c0_15 = arith.constant 0 : index
    %c0_16 = arith.constant 0 : index
    %17 = vector.load %arg8[%c0_15, %c0_16] : memref<1x256xf32, #tpu.memory_space<vmem>>, vector<1x256xf32>
    %18 = vector.broadcast %17 : vector<1x256xf32> to vector<8x256xf32>
    %19 = arith.addf %16, %18 : vector<8x256xf32>
    %20 = vector.extract_strided_slice %19 {offsets = [0, 0], sizes = [8, 128], strides = [1, 1]} : vector<8x256xf32> to vector<8x128xf32>
    %21 = vector.extract_strided_slice %19 {offsets = [0, 128], sizes = [8, 128], strides = [1, 1]} : vector<8x256xf32> to vector<8x128xf32>
    %c0_17 = arith.constant 0 : index
    %c0_18 = arith.constant 0 : index
    %22 = vector.load %arg2[%c0_17, %c0_18] : memref<8x128xf32, #tpu.memory_space<vmem>>, vector<8x128xf32>
    %cst_19 = arith.constant 5.000000e-01 : f32
    %23 = vector.broadcast %cst_19 : f32 to vector<8x128xf32>
    %24 = arith.mulf %21, %23 : vector<8x128xf32>
    %25 = math.exp %24 : vector<8x128xf32>
    %26 = arith.mulf %22, %25 : vector<8x128xf32>
    %27 = arith.addf %20, %26 : vector<8x128xf32>
    %c0_20 = arith.constant 0 : index
    %c0_21 = arith.constant 0 : index
    %28 = vector.load %arg9[%c0_20, %c0_21] : memref<128x128xf32, #tpu.memory_space<vmem>>, vector<128x128xf32>
    %cst_22 = arith.constant dense<0.000000e+00> : vector<8x128xf32>
    %29 = tpu.matmul %27, %28, %cst_22 {dimension_numbers = #tpu.dot_dimension_numbers<[1], [0], [0], [1], [0, 0, 1, 1], [], []>, precision = #tpu.contract_precision<fp32>} : vector<8x128xf32>, vector<128x128xf32>, vector<8x128xf32> -> vector<8x128xf32>
    %c0_23 = arith.constant 0 : index
    %c0_24 = arith.constant 0 : index
    %30 = vector.load %arg10[%c0_23, %c0_24] : memref<1x128xf32, #tpu.memory_space<vmem>>, vector<1x128xf32>
    %31 = vector.broadcast %30 : vector<1x128xf32> to vector<8x128xf32>
    %32 = arith.addf %29, %31 : vector<8x128xf32>
    %cst_25 = arith.constant 0.000000e+00 : f32
    %33 = vector.broadcast %cst_25 : f32 to vector<8x128xf32>
    %34 = arith.maximumf %32, %33 : vector<8x128xf32>
    %c0_26 = arith.constant 0 : index
    %c0_27 = arith.constant 0 : index
    %35 = vector.load %arg11[%c0_26, %c0_27] : memref<128x128xf32, #tpu.memory_space<vmem>>, vector<128x128xf32>
    %cst_28 = arith.constant dense<0.000000e+00> : vector<8x128xf32>
    %36 = tpu.matmul %34, %35, %cst_28 {dimension_numbers = #tpu.dot_dimension_numbers<[1], [0], [0], [1], [0, 0, 1, 1], [], []>, precision = #tpu.contract_precision<fp32>} : vector<8x128xf32>, vector<128x128xf32>, vector<8x128xf32> -> vector<8x128xf32>
    %c0_29 = arith.constant 0 : index
    %c0_30 = arith.constant 0 : index
    %37 = vector.load %arg12[%c0_29, %c0_30] : memref<1x128xf32, #tpu.memory_space<vmem>>, vector<1x128xf32>
    %38 = vector.broadcast %37 : vector<1x128xf32> to vector<8x128xf32>
    %39 = arith.addf %36, %38 : vector<8x128xf32>
    %c0_31 = arith.constant 0 : index
    %c0_32 = arith.constant 0 : index
    %40 = vector.load %arg13[%c0_31, %c0_32] : memref<8x512xf32, #tpu.memory_space<vmem>>, vector<8x128xf32>
    tpu.vector_store %arg13[%c0_31, %c0_32], %27 {strides = array<i32>} : memref<8x512xf32, #tpu.memory_space<vmem>>, vector<8x128xf32>,
    %c0_33 = arith.constant 0 : index
    %c128 = arith.constant 128 : index
    %41 = vector.load %arg13[%c0_33, %c128] : memref<8x512xf32, #tpu.memory_space<vmem>>, vector<8x256xf32>
    tpu.vector_store %arg13[%c0_33, %c128], %19 {strides = array<i32>} : memref<8x512xf32, #tpu.memory_space<vmem>>, vector<8x256xf32>,
    %c0_34 = arith.constant 0 : index
    %c384 = arith.constant 384 : index
    %42 = vector.load %arg13[%c0_34, %c384] : memref<8x512xf32, #tpu.memory_space<vmem>>, vector<8x128xf32>
    tpu.vector_store %arg13[%c0_34, %c384], %39 {strides = array<i32>} : memref<8x512xf32, #tpu.memory_space<vmem>>, vector<8x128xf32>,
    return
  }
  func.func @transform_0(%arg0: i32) -> (i32, i32) {
    %c0_i32 = arith.constant 0 : i32
    %c0_i32_0 = arith.constant 0 : i32
    return %arg0, %c0_i32 : i32, i32
  }
  func.func @transform_1(%arg0: i32) -> (i32, i32) {
    %c0_i32 = arith.constant 0 : i32
    %c0_i32_0 = arith.constant 0 : i32
    return %arg0, %c0_i32 : i32, i32
  }
  func.func @transform_2(%arg0: i32) -> (i32, i32) {
    %c0_i32 = arith.constant 0 : i32
    %c0_i32_0 = arith.constant 0 : i32
    %c0_i32_1 = arith.constant 0 : i32
    return %c0_i32, %c0_i32_0 : i32, i32
  }
  func.func @transform_3(%arg0: i32) -> (i32, i32) {
    %c0_i32 = arith.constant 0 : i32
    %c0_i32_0 = arith.constant 0 : i32
    %c0_i32_1 = arith.constant 0 : i32
    return %c0_i32, %c0_i32_0 : i32, i32
  }
  func.func @transform_4(%arg0: i32) -> (i32, i32) {
    %c0_i32 = arith.constant 0 : i32
    %c0_i32_0 = arith.constant 0 : i32
    %c0_i32_1 = arith.constant 0 : i32
    return %c0_i32, %c0_i32_0 : i32, i32
  }
  func.func @transform_5(%arg0: i32) -> (i32, i32) {
    %c0_i32 = arith.constant 0 : i32
    %c0_i32_0 = arith.constant 0 : i32
    %c0_i32_1 = arith.constant 0 : i32
    return %c0_i32, %c0_i32_0 : i32, i32
  }
  func.func @transform_6(%arg0: i32) -> (i32, i32) {
    %c0_i32 = arith.constant 0 : i32
    %c0_i32_0 = arith.constant 0 : i32
    %c0_i32_1 = arith.constant 0 : i32
    return %c0_i32, %c0_i32_0 : i32, i32
  }
  func.func @transform_7(%arg0: i32) -> (i32, i32) {
    %c0_i32 = arith.constant 0 : i32
    %c0_i32_0 = arith.constant 0 : i32
    %c0_i32_1 = arith.constant 0 : i32
    return %c0_i32, %c0_i32_0 : i32, i32
  }
  func.func @transform_8(%arg0: i32) -> (i32, i32) {
    %c0_i32 = arith.constant 0 : i32
    %c0_i32_0 = arith.constant 0 : i32
    %c0_i32_1 = arith.constant 0 : i32
    return %c0_i32, %c0_i32_0 : i32, i32
  }
  func.func @transform_9(%arg0: i32) -> (i32, i32) {
    %c0_i32 = arith.constant 0 : i32
    %c0_i32_0 = arith.constant 0 : i32
    %c0_i32_1 = arith.constant 0 : i32
    return %c0_i32, %c0_i32_0 : i32, i32
  }
  func.func @transform_10(%arg0: i32) -> (i32, i32) {
    %c0_i32 = arith.constant 0 : i32
    %c0_i32_0 = arith.constant 0 : i32
    %c0_i32_1 = arith.constant 0 : i32
    return %c0_i32, %c0_i32_0 : i32, i32
  }
  func.func @transform_11(%arg0: i32) -> (i32, i32) {
    %c0_i32 = arith.constant 0 : i32
    %c0_i32_0 = arith.constant 0 : i32
    %c0_i32_1 = arith.constant 0 : i32
    return %c0_i32, %c0_i32_0 : i32, i32
  }
  func.func @transform_12(%arg0: i32) -> (i32, i32) {
    %c0_i32 = arith.constant 0 : i32
    %c0_i32_0 = arith.constant 0 : i32
    return %arg0, %c0_i32 : i32, i32
  }
}

module attributes {stable_mosaic.version = 11 : i64} {
  func.func @_vae_kernel(%arg0: i32, %arg1: memref<8x128xf32, #tpu.memory_space<vmem>>, %arg2: memref<8x128xf32, #tpu.memory_space<vmem>>, %arg3: memref<128x128xf32, #tpu.memory_space<vmem>>, %arg4: memref<1x128xf32, #tpu.memory_space<vmem>>, %arg5: memref<128x128xf32, #tpu.memory_space<vmem>>, %arg6: memref<1x128xf32, #tpu.memory_space<vmem>>, %arg7: memref<128x256xf32, #tpu.memory_space<vmem>>, %arg8: memref<1x256xf32, #tpu.memory_space<vmem>>, %arg9: memref<128x128xf32, #tpu.memory_space<vmem>>, %arg10: memref<1x128xf32, #tpu.memory_space<vmem>>, %arg11: memref<128x128xf32, #tpu.memory_space<vmem>>, %arg12: memref<1x128xf32, #tpu.memory_space<vmem>>, %arg13: memref<8x512xf32, #tpu.memory_space<vmem>>) attributes {dimension_semantics = [#tpu.dimension_semantics<parallel>], iteration_bounds = array<i64: 1>, scalar_prefetch = 0 : i64, scratch_operands = 0 : i64, tpu.core_type = #tpu.core_type<tc>, window_params = [{transform_indices = @transform_0, window_bounds = array<i64: 8, 128>}, {transform_indices = @transform_1, window_bounds = array<i64: 8, 128>}, {pipeline_mode = #tpu.pipeline_mode<synchronous>, transform_indices = @transform_2, window_bounds = array<i64: 128, 128>}, {pipeline_mode = #tpu.pipeline_mode<synchronous>, transform_indices = @transform_3, window_bounds = array<i64: 1, 128>}, {pipeline_mode = #tpu.pipeline_mode<synchronous>, transform_indices = @transform_4, window_bounds = array<i64: 128, 128>}, {pipeline_mode = #tpu.pipeline_mode<synchronous>, transform_indices = @transform_5, window_bounds = array<i64: 1, 128>}, {pipeline_mode = #tpu.pipeline_mode<synchronous>, transform_indices = @transform_6, window_bounds = array<i64: 128, 256>}, {pipeline_mode = #tpu.pipeline_mode<synchronous>, transform_indices = @transform_7, window_bounds = array<i64: 1, 256>}, {pipeline_mode = #tpu.pipeline_mode<synchronous>, transform_indices = @transform_8, window_bounds = array<i64: 128, 128>}, {pipeline_mode = #tpu.pipeline_mode<synchronous>, transform_indices = @transform_9, window_bounds = array<i64: 1, 128>}, {pipeline_mode = #tpu.pipeline_mode<synchronous>, transform_indices = @transform_10, window_bounds = array<i64: 128, 128>}, {pipeline_mode = #tpu.pipeline_mode<synchronous>, transform_indices = @transform_11, window_bounds = array<i64: 1, 128>}, {transform_indices = @transform_12, window_bounds = array<i64: 8, 512>}]} {
    %c0 = arith.constant 0 : index
    %c0_0 = arith.constant 0 : index
    %0 = vector.load %arg1[%c0, %c0_0] : memref<8x128xf32, #tpu.memory_space<vmem>>, vector<8x128xf32>
    %c0_1 = arith.constant 0 : index
    %c0_2 = arith.constant 0 : index
    %1 = vector.load %arg3[%c0_1, %c0_2] : memref<128x128xf32, #tpu.memory_space<vmem>>, vector<128x128xf32>
    %cst = arith.constant dense<0.000000e+00> : vector<8x128xf32>
    %2 = tpu.matmul %0, %1, %cst {dimension_numbers = #tpu.dot_dimension_numbers<[1], [0], [0], [1], [0, 0, 1, 1], [], []>, precision = #tpu.contract_precision<fp32>} : vector<8x128xf32>, vector<128x128xf32>, vector<8x128xf32> -> vector<8x128xf32>
    %c0_3 = arith.constant 0 : index
    %c0_4 = arith.constant 0 : index
    %3 = vector.load %arg4[%c0_3, %c0_4] : memref<1x128xf32, #tpu.memory_space<vmem>>, vector<1x128xf32>
    %4 = vector.broadcast %3 : vector<1x128xf32> to vector<8x128xf32>
    %5 = arith.addf %2, %4 : vector<8x128xf32>
    %cst_5 = arith.constant 0.000000e+00 : f32
    %6 = vector.broadcast %cst_5 : f32 to vector<8x128xf32>
    %7 = arith.maximumf %5, %6 : vector<8x128xf32>
    %c0_6 = arith.constant 0 : index
    %c0_7 = arith.constant 0 : index
    %8 = vector.load %arg5[%c0_6, %c0_7] : memref<128x128xf32, #tpu.memory_space<vmem>>, vector<128x128xf32>
    %cst_8 = arith.constant dense<0.000000e+00> : vector<8x128xf32>
    %9 = tpu.matmul %7, %8, %cst_8 {dimension_numbers = #tpu.dot_dimension_numbers<[1], [0], [0], [1], [0, 0, 1, 1], [], []>, precision = #tpu.contract_precision<fp32>} : vector<8x128xf32>, vector<128x128xf32>, vector<8x128xf32> -> vector<8x128xf32>
    %c0_9 = arith.constant 0 : index
    %c0_10 = arith.constant 0 : index
    %10 = vector.load %arg6[%c0_9, %c0_10] : memref<1x128xf32, #tpu.memory_space<vmem>>, vector<1x128xf32>
    %11 = vector.broadcast %10 : vector<1x128xf32> to vector<8x128xf32>
    %12 = arith.addf %9, %11 : vector<8x128xf32>
    %cst_11 = arith.constant 0.000000e+00 : f32
    %13 = vector.broadcast %cst_11 : f32 to vector<8x128xf32>
    %14 = arith.maximumf %12, %13 : vector<8x128xf32>
    %c0_12 = arith.constant 0 : index
    %c0_13 = arith.constant 0 : index
    %15 = vector.load %arg7[%c0_12, %c0_13] : memref<128x256xf32, #tpu.memory_space<vmem>>, vector<128x256xf32>
    %cst_14 = arith.constant dense<0.000000e+00> : vector<8x256xf32>
    %16 = tpu.matmul %14, %15, %cst_14 {dimension_numbers = #tpu.dot_dimension_numbers<[1], [0], [0], [1], [0, 0, 1, 1], [], []>, precision = #tpu.contract_precision<fp32>} : vector<8x128xf32>, vector<128x256xf32>, vector<8x256xf32> -> vector<8x256xf32>
    %c0_15 = arith.constant 0 : index
    %c0_16 = arith.constant 0 : index
    %17 = vector.load %arg8[%c0_15, %c0_16] : memref<1x256xf32, #tpu.memory_space<vmem>>, vector<1x256xf32>
    %18 = vector.broadcast %17 : vector<1x256xf32> to vector<8x256xf32>
    %19 = arith.addf %16, %18 : vector<8x256xf32>
    %20 = vector.extract_strided_slice %19 {offsets = [0, 0], sizes = [8, 128], strides = [1, 1]} : vector<8x256xf32> to vector<8x128xf32>
    %21 = vector.extract_strided_slice %19 {offsets = [0, 128], sizes = [8, 128], strides = [1, 1]} : vector<8x256xf32> to vector<8x128xf32>
    %c0_17 = arith.constant 0 : index
    %c0_18 = arith.constant 0 : index
    %22 = vector.load %arg2[%c0_17, %c0_18] : memref<8x128xf32, #tpu.memory_space<vmem>>, vector<8x128xf32>
    %cst_19 = arith.constant 5.000000e-01 : f32
    %23 = vector.broadcast %cst_19 : f32 to vector<8x128xf32>
    %24 = arith.mulf %21, %23 : vector<8x128xf32>
    %25 = math.exp %24 : vector<8x128xf32>
    %26 = arith.mulf %22, %25 : vector<8x128xf32>
    %27 = arith.addf %20, %26 : vector<8x128xf32>
    %c0_20 = arith.constant 0 : index
    %c0_21 = arith.constant 0 : index
    %28 = vector.load %arg9[%c0_20, %c0_21] : memref<128x128xf32, #tpu.memory_space<vmem>>, vector<128x128xf32>
    %cst_22 = arith.constant dense<0.000000e+00> : vector<8x128xf32>
    %29 = tpu.matmul %27, %28, %cst_22 {dimension_numbers = #tpu.dot_dimension_numbers<[1], [0], [0], [1], [0, 0, 1, 1], [], []>, precision = #tpu.contract_precision<fp32>} : vector<8x128xf32>, vector<128x128xf32>, vector<8x128xf32> -> vector<8x128xf32>
    %c0_23 = arith.constant 0 : index
    %c0_24 = arith.constant 0 : index
    %30 = vector.load %arg10[%c0_23, %c0_24] : memref<1x128xf32, #tpu.memory_space<vmem>>, vector<1x128xf32>
    %31 = vector.broadcast %30 : vector<1x128xf32> to vector<8x128xf32>
    %32 = arith.addf %29, %31 : vector<8x128xf32>
    %cst_25 = arith.constant 0.000000e+00 : f32
    %33 = vector.broadcast %cst_25 : f32 to vector<8x128xf32>
    %34 = arith.maximumf %32, %33 : vector<8x128xf32>
    %c0_26 = arith.constant 0 : index
    %c0_27 = arith.constant 0 : index
    %35 = vector.load %arg11[%c0_26, %c0_27] : memref<128x128xf32, #tpu.memory_space<vmem>>, vector<128x128xf32>
    %cst_28 = arith.constant dense<0.000000e+00> : vector<8x128xf32>
    %36 = tpu.matmul %34, %35, %cst_28 {dimension_numbers = #tpu.dot_dimension_numbers<[1], [0], [0], [1], [0, 0, 1, 1], [], []>, precision = #tpu.contract_precision<fp32>} : vector<8x128xf32>, vector<128x128xf32>, vector<8x128xf32> -> vector<8x128xf32>
    %c0_29 = arith.constant 0 : index
    %c0_30 = arith.constant 0 : index
    %37 = vector.load %arg12[%c0_29, %c0_30] : memref<1x128xf32, #tpu.memory_space<vmem>>, vector<1x128xf32>
    %38 = vector.broadcast %37 : vector<1x128xf32> to vector<8x128xf32>
    %39 = arith.addf %36, %38 : vector<8x128xf32>
    %c0_31 = arith.constant 0 : index
    %c0_32 = arith.constant 0 : index
    %40 = vector.load %arg13[%c0_31, %c0_32] : memref<8x512xf32, #tpu.memory_space<vmem>>, vector<8x128xf32>
    tpu.vector_store %arg13[%c0_31, %c0_32], %27 {strides = array<i32>} : memref<8x512xf32, #tpu.memory_space<vmem>>, vector<8x128xf32>,
    %c0_33 = arith.constant 0 : index
    %c128 = arith.constant 128 : index
    %41 = vector.load %arg13[%c0_33, %c128] : memref<8x512xf32, #tpu.memory_space<vmem>>, vector<8x256xf32>
    tpu.vector_store %arg13[%c0_33, %c128], %19 {strides = array<i32>} : memref<8x512xf32, #tpu.memory_space<vmem>>, vector<8x256xf32>,
    %c0_34 = arith.constant 0 : index
    %c384 = arith.constant 384 : index
    %42 = vector.load %arg13[%c0_34, %c384] : memref<8x512xf32, #tpu.memory_space<vmem>>, vector<8x128xf32>
    tpu.vector_store %arg13[%c0_34, %c384], %39 {strides = array<i32>} : memref<8x512xf32, #tpu.memory_space<vmem>>, vector<8x128xf32>,
    return
  }
  func.func @transform_0(%arg0: i32) -> (i32, i32) {
    %c0_i32 = arith.constant 0 : i32
    %c0_i32_0 = arith.constant 0 : i32
    return %arg0, %c0_i32 : i32, i32
  }
  func.func @transform_1(%arg0: i32) -> (i32, i32) {
    %c0_i32 = arith.constant 0 : i32
    %c0_i32_0 = arith.constant 0 : i32
    return %arg0, %c0_i32 : i32, i32
  }
  func.func @transform_2(%arg0: i32) -> (i32, i32) {
    %c0_i32 = arith.constant 0 : i32
    %c0_i32_0 = arith.constant 0 : i32
    %c0_i32_1 = arith.constant 0 : i32
    return %c0_i32, %c0_i32_0 : i32, i32
  }
  func.func @transform_3(%arg0: i32) -> (i32, i32) {
    %c0_i32 = arith.constant 0 : i32
    %c0_i32_0 = arith.constant 0 : i32
    %c0_i32_1 = arith.constant 0 : i32
    return %c0_i32, %c0_i32_0 : i32, i32
  }
  func.func @transform_4(%arg0: i32) -> (i32, i32) {
    %c0_i32 = arith.constant 0 : i32
    %c0_i32_0 = arith.constant 0 : i32
    %c0_i32_1 = arith.constant 0 : i32
    return %c0_i32, %c0_i32_0 : i32, i32
  }
  func.func @transform_5(%arg0: i32) -> (i32, i32) {
    %c0_i32 = arith.constant 0 : i32
    %c0_i32_0 = arith.constant 0 : i32
    %c0_i32_1 = arith.constant 0 : i32
    return %c0_i32, %c0_i32_0 : i32, i32
  }
  func.func @transform_6(%arg0: i32) -> (i32, i32) {
    %c0_i32 = arith.constant 0 : i32
    %c0_i32_0 = arith.constant 0 : i32
    %c0_i32_1 = arith.constant 0 : i32
    return %c0_i32, %c0_i32_0 : i32, i32
  }
  func.func @transform_7(%arg0: i32) -> (i32, i32) {
    %c0_i32 = arith.constant 0 : i32
    %c0_i32_0 = arith.constant 0 : i32
    %c0_i32_1 = arith.constant 0 : i32
    return %c0_i32, %c0_i32_0 : i32, i32
  }
  func.func @transform_8(%arg0: i32) -> (i32, i32) {
    %c0_i32 = arith.constant 0 : i32
    %c0_i32_0 = arith.constant 0 : i32
    %c0_i32_1 = arith.constant 0 : i32
    return %c0_i32, %c0_i32_0 : i32, i32
  }
  func.func @transform_9(%arg0: i32) -> (i32, i32) {
    %c0_i32 = arith.constant 0 : i32
    %c0_i32_0 = arith.constant 0 : i32
    %c0_i32_1 = arith.constant 0 : i32
    return %c0_i32, %c0_i32_0 : i32, i32
  }
  func.func @transform_10(%arg0: i32) -> (i32, i32) {
    %c0_i32 = arith.constant 0 : i32
    %c0_i32_0 = arith.constant 0 : i32
    %c0_i32_1 = arith.constant 0 : i32
    return %c0_i32, %c0_i32_0 : i32, i32
  }
  func.func @transform_11(%arg0: i32) -> (i32, i32) {
    %c0_i32 = arith.constant 0 : i32
    %c0_i32_0 = arith.constant 0 : i32
    %c0_i32_1 = arith.constant 0 : i32
    return %c0_i32, %c0_i32_0 : i32, i32
  }
  func.func @transform_12(%arg0: i32) -> (i32, i32) {
    %c0_i32 = arith.constant 0 : i32
    %c0_i32_0 = arith.constant 0 : i32
    return %arg0, %c0_i32 : i32, i32
  }
}

</mosaic_0001>

<bundles_post_ra>
// kernel: tpu_custom_call.1
= control target key start
LH: loop header
LB: loop body
LE: loop exit
PB: predicated region body
PF: predicated region fallthrough
CT: control target
= control target key end

     0   :  { %17 = vsyncpa [#allocation3], 0  ;;  %s7776_s0 = inlined_call_operand.hbm [shape: f32[8,128], index: 0, kind: input, shape index: {}]   ;;  %s7777_s1 = inlined_call_operand.hbm [shape: f32[8,128], index: 1, kind: input, shape index: {}]   ;;  %s7778_s2 = inlined_call_operand.hbm [shape: f32[128,128], index: 2, kind: input, shape index: {}]   ;;  %s7779_s3 = inlined_call_operand.vmem [shape: f32[1,128], index: 3, kind: input, shape index: {}]   ;;  %s7780_s4 = inlined_call_operand.hbm [shape: f32[128,128], index: 4, kind: input, shape index: {}]   ;;  %s7781_s5 = inlined_call_operand.vmem [shape: f32[1,128], index: 5, kind: input, shape index: {}]   ;;  %s7782_s6 = inlined_call_operand.hbm [shape: f32[128,256], index: 6, kind: input, shape index: {}]   ;;  %s7783_s7 = inlined_call_operand.vmem [shape: f32[1,256], index: 7, kind: input, shape index: {}]   ;;  %s7784_s8 = inlined_call_operand.hbm [shape: f32[128,128], index: 8, kind: input, shape index: {}]   ;;  %s7785_s9 = inlined_call_operand.vmem [shape: f32[1,128], index: 9, kind: input, shape index: {}]   ;;  %s7786_s10 = inlined_call_operand.hbm [shape: f32[128,128], index: 10, kind: input, shape index: {}]   ;;  %s7787_s11 = inlined_call_operand.vmem [shape: f32[1,128], index: 11, kind: input, shape index: {}]   ;;  %s7788_s12 = inlined_call_operand.hbm [shape: f32[8,512], index: 12, kind: output, shape index: {}]  }
   0x1   :  { %18 = vsyncpa [#allocation6], 0 }
   0x2   :  { %19 = vsyncpa [#allocation9], 0 }
   0x3   :  { %20 = vsyncpa [#allocation12], 0 }
   0x4   :  { %21 = vsyncpa [#allocation4], 0  ;;  %s5998_s21 = smov [#allocation5]   ;;  %s5812_s25 = scalar_lea.hbm %s7777_s1, 128 }
   0x5   :  { %s38_s22 = sshll.u32 %s5998_s21, 4  ;;  %p5813_p0 = scmp.ne.s32.totalorder %s7777_s1, %s5812_s25  ;;  %s39_s22 = int_to_ptr.vmem [resolvable:$true] %s38_s22 }
   0x6   :  { %p5816_p1 = scmp.lt.u32.totalorder %s5812_s25, %s7777_s1 }
   0x8   :  { %p5818_p2 = pnand %p5816_p1, %p5813_p0 }
   0xa   :  { %5821 = shalt.err (!%p5818_p2)
}
   0xb   :  { %s5822_s30 = scalar_lea.vmem %s39_s22, 128  ;;  %p5827_p4 = scmp.lt.s32.totalorder %s39_s22, %s39_s22 }
   0xc   :  { %p5823_p3 = scmp.ne.s32.totalorder %s39_s22, %s5822_s30  ;;  %p5828_p5 = scmp.lt.s32.totalorder %s5822_s30, %s5822_s30 }
   0xe   :  { %p5829_p6 = por %p5828_p5, %p5827_p4 }
  0x10   :  { %p5830_p7 = pnand %p5829_p6, %p5823_p3 }
  0x12   :  { %5833 = shalt.err (!%p5830_p7)
}
  0x13   :  { %41 = dma.hbm_to_vmem [thread:$0]  %s7777_s1, 128, %s39_s22, [#allocation6]  }
  0x14   :  { %s5999_s15 = smov [#allocation8]   ;;  %s6000_s17 = smov [#allocation11]  }
  0x15   :  { %s61_s16 = sshll.u32 %s5999_s15, 4  ;;  %s89_s18 = sshll.u32 %s6000_s17, 4  ;;  %s62_s16 = int_to_ptr.vmem [resolvable:$true] %s61_s16  ;;  %s90_s18 = int_to_ptr.vmem [resolvable:$true] %s89_s18 }
  0x16   :  { %s5834_s21 = scalar_lea.hbm %s7780_s4, 2048 }
  0x17   :  { %p5835_p8 = scmp.ne.s32.totalorder %s7780_s4, %s5834_s21  ;;  %p5838_p9 = scmp.lt.u32.totalorder %s5834_s21, %s7780_s4 }
  0x19   :  { %p5840_p10 = pnand %p5838_p9, %p5835_p8 }
  0x1b   :  { %5843 = shalt.err (!%p5840_p10)
}
  0x1c   :  { %s5844_s1 = scalar_lea.vmem %s62_s16, 2048  ;;  %p5849_p12 = scmp.lt.s32.totalorder %s62_s16, %s62_s16 }
  0x1d   :  { %p5845_p11 = scmp.ne.s32.totalorder %s62_s16, %s5844_s1  ;;  %p5850_p13 = scmp.lt.s32.totalorder %s5844_s1, %s5844_s1 }
  0x1f   :  { %p5851_p0 = por %p5850_p13, %p5849_p12 }
  0x21   :  { %p5852_p1 = pnand %p5851_p0, %p5845_p11 }
  0x23   :  { %5855 = shalt.err (!%p5852_p1)
}
  0x24   :  { %s6001_s22 = smov 128   ;;  %s6002_s27 = smov 8  }
  0x25   :  { %67 = dma.hbm_to_vmem [thread:$0]  %s7780_s4, 2048, %s62_s16, [#allocation9], %s6001_s22, %s6001_s22, %s6002_s27  }
  0x26   :  { %s5856_s14 = scalar_lea.hbm %s7784_s8, 2048 }
  0x27   :  { %p5857_p2 = scmp.ne.s32.totalorder %s7784_s8, %s5856_s14  ;;  %p5860_p3 = scmp.lt.u32.totalorder %s5856_s14, %s7784_s8 }
  0x29   :  { %p5862_p4 = pnand %p5860_p3, %p5857_p2 }
  0x2b   :  { %5865 = shalt.err (!%p5862_p4)
}
  0x2c   :  { %s5866_s21 = scalar_lea.vmem %s90_s18, 2048  ;;  %p5871_p6 = scmp.lt.s32.totalorder %s90_s18, %s90_s18 }
  0x2d   :  { %p5867_p5 = scmp.ne.s32.totalorder %s90_s18, %s5866_s21  ;;  %p5872_p7 = scmp.lt.s32.totalorder %s5866_s21, %s5866_s21 }
  0x2f   :  { %p5873_p8 = por %p5872_p7, %p5871_p6 }
  0x31   :  { %p5874_p9 = pnand %p5873_p8, %p5867_p5 }
  0x33   :  { %5877 = shalt.err (!%p5874_p9)
}
  0x34   :  { %95 = dma.hbm_to_vmem [thread:$0]  %s7784_s8, 2048, %s90_s18, [#allocation12], %s6001_s22, %s6001_s22, %s6002_s27  }
  0x35   :  { %s6003_s23 = smov [#allocation2]   ;;  %s6004_s25 = smov [#allocation7]  }
  0x36   :  { %s28_s24 = sshll.u32 %s6003_s23, 4  ;;  %s47_s26 = sshll.u32 %s6004_s25, 4  ;;  %s29_s24 = int_to_ptr.vmem [resolvable:$true] %s28_s24  ;;  %s48_s26 = int_to_ptr.vmem [resolvable:$true] %s47_s26 }
  0x37   :  { %s5878_s29 = scalar_lea.hbm %s7776_s0, 128 }
  0x38   :  { %p5879_p10 = scmp.ne.s32.totalorder %s7776_s0, %s5878_s29  ;;  %p5882_p11 = scmp.lt.u32.totalorder %s5878_s29, %s7776_s0 }
  0x3a   :  { %p5884_p12 = pnand %p5882_p11, %p5879_p10 }
  0x3c   :  { %5887 = shalt.err (!%p5884_p12)
}
  0x3d   :  { %s5888_s8 = scalar_lea.vmem %s29_s24, 128  ;;  %p5893_p0 = scmp.lt.s32.totalorder %s29_s24, %s29_s24 }
  0x3e   :  { %p5889_p13 = scmp.ne.s32.totalorder %s29_s24, %s5888_s8  ;;  %p5894_p1 = scmp.lt.s32.totalorder %s5888_s8, %s5888_s8 }
  0x40   :  { %p5895_p2 = por %p5894_p1, %p5893_p0 }
  0x42   :  { %p5896_p3 = pnand %p5895_p2, %p5889_p13 }
  0x44   :  { %5899 = shalt.err (!%p5896_p3)
}
  0x45   :  { %31 = dma.hbm_to_vmem [thread:$0]  %s7776_s0, 128, %s29_s24, [#allocation3]  }
  0x46   :  { %s5900_s21 = scalar_lea.hbm %s7778_s2, 2048 }
  0x47   :  { %p5901_p4 = scmp.ne.s32.totalorder %s7778_s2, %s5900_s21  ;;  %p5904_p5 = scmp.lt.u32.totalorder %s5900_s21, %s7778_s2 }
  0x49   :  { %p5906_p6 = pnand %p5904_p5, %p5901_p4 }
  0x4b   :  { %5909 = shalt.err (!%p5906_p6)
}
  0x4c   :  { %s5910_s1 = scalar_lea.vmem %s48_s26, 2048  ;;  %p5915_p8 = scmp.lt.s32.totalorder %s48_s26, %s48_s26 }
  0x4d   :  { %p5911_p7 = scmp.ne.s32.totalorder %s48_s26, %s5910_s1  ;;  %p5916_p9 = scmp.lt.s32.totalorder %s5910_s1, %s5910_s1 }
  0x4f   :  { %p5917_p10 = por %p5916_p9, %p5915_p8 }
  0x51   :  { %p5918_p11 = pnand %p5917_p10, %p5911_p7 }
  0x53   :  { %5921 = shalt.err (!%p5918_p11)
}
  0x54   :  { %53 = dma.hbm_to_vmem [thread:$0]  %s7778_s2, 2048, %s48_s26, [#allocation6], %s6001_s22, %s6001_s22, %s6002_s27  }
  0x55   :  { %s6005_s28 = smov [#allocation10]   ;;  %s5922_s14 = scalar_lea.hbm %s7782_s6, 4096 }
  0x56   :  { %s75_s29 = sshll.u32 %s6005_s28, 4  ;;  %p5923_p12 = scmp.ne.s32.totalorder %s7782_s6, %s5922_s14  ;;  %s76_s29 = int_to_ptr.vmem [resolvable:$true] %s75_s29 }
  0x57   :  { %p5926_p13 = scmp.lt.u32.totalorder %s5922_s14, %s7782_s6 }
  0x59   :  { %p5928_p0 = pnand %p5926_p13, %p5923_p12 }
  0x5b   :  { %5931 = shalt.err (!%p5928_p0)
}
  0x5c   :  { %s5932_s19 = scalar_lea.vmem %s76_s29, 4096  ;;  %p5937_p2 = scmp.lt.s32.totalorder %s76_s29, %s76_s29 }
  0x5d   :  { %p5933_p1 = scmp.ne.s32.totalorder %s76_s29, %s5932_s19  ;;  %p5938_p3 = scmp.lt.s32.totalorder %s5932_s19, %s5932_s19 }
  0x5f   :  { %p5939_p4 = por %p5938_p3, %p5937_p2 }
  0x61   :  { %p5940_p5 = pnand %p5939_p4, %p5933_p1 }
  0x63   :  { %5943 = shalt.err (!%p5940_p5)
}
  0x64   :  { %s6006_s2 = smov 256   ;;  %s6007_s26 = smov 16  }
  0x65   :  { %81 = dma.hbm_to_vmem [thread:$0]  %s7782_s6, 4096, %s76_s29, [#allocation9], %s6006_s2, %s6006_s2, %s6007_s26  }
  0x66   :  { %s6008_s4 = smov [#allocation13]   ;;  %s5944_s1 = scalar_lea.hbm %s7786_s10, 2048 }
  0x67   :  { %s103_s16 = sshll.u32 %s6008_s4, 4  ;;  %p5945_p6 = scmp.ne.s32.totalorder %s7786_s10, %s5944_s1  ;;  %s104_s16 = int_to_ptr.vmem [resolvable:$true] %s103_s16 }
  0x68   :  { %p5948_p7 = scmp.lt.u32.totalorder %s5944_s1, %s7786_s10 }
  0x6a   :  { %p5950_p8 = pnand %p5948_p7, %p5945_p6 }
  0x6c   :  { %5953 = shalt.err (!%p5950_p8)
}
  0x6d   :  { %s5954_s13 = scalar_lea.vmem %s104_s16, 2048  ;;  %p5959_p10 = scmp.lt.s32.totalorder %s104_s16, %s104_s16 }
  0x6e   :  { %p5955_p9 = scmp.ne.s32.totalorder %s104_s16, %s5954_s13  ;;  %p5960_p11 = scmp.lt.s32.totalorder %s5954_s13, %s5954_s13 }
  0x70   :  { %p5961_p12 = por %p5960_p11, %p5959_p10 }
  0x72   :  { %p5962_p13 = pnand %p5961_p12, %p5955_p9 }
  0x74   :  { %5965 = shalt.err (!%p5962_p13)
}
  0x75   :  { %109 = dma.hbm_to_vmem [thread:$0]  %s7786_s10, 2048, %s104_s16, [#allocation12], %s6001_s22, %s6001_s22, %s6002_s27  }
  0x76   :  { %5988 = dma.done.wait [#allocation3], 128  }
  0x77   :  { %5989 = vsyncadd [#allocation3], 4294967168 }
  0x78   :  { %5990 = dma.done.wait [#allocation6], 2176  }
  0x79   :  { %5991 = vsyncadd [#allocation6], 4294965120 }
  0x7a   :  { %5992 = dma.done.wait [#allocation9], 6144  }
  0x7b   :  { %5993 = vsyncadd [#allocation9], 4294961152 }
  0x7c   :  { %5994 = dma.done.wait [#allocation12], 4096  }
  0x7d   :  { %5995 = vsyncadd [#allocation12], 4294963200  ;;  %v7805_v0 = vmov 0.0|0.0   ;;  %vm6010_vm0 = vmmov 0   ;;  %v7799_v1 = vmov 0.0   ;;  %v134_v2 = vld [vmem:[#allocation7] sm:$0xff] }
  0x7e   :  { %4972 = vmatprep.subr.bf16.mxu1 %v7805_v0  ;;  %5044 = vmatprep.subr.bf16.mxu0 %v7805_v0  ;;  %v135_v3 = vld [vmem:[#allocation7 + $0x8] sm:$0xff]  ;;  %v136_v4 = vld [vmem:[#allocation7 + $0x10] sm:$0xff]  ;;  %v158_v5 = vand.u32 4294901760, %v134_v2  ;;  %v137_v7 = vld [vmem:[#allocation7 + $0x18] sm:$0xff]  ;;  %s6012_s18 = smov [#allocation14]  }
  0x7f   :  { %4164 = vmatprep.mubr.msk.f32.mxu1 %vm6010_vm0, %v7799_v1  ;;  %4269 = vmatprep.mubr.msk.f32.mxu0 %vm6010_vm0, %v7799_v1  ;;  %v161_v6 = vand.u32 4294901760, %v135_v3  ;;  %v164_v8 = vand.u32 4294901760, %v136_v4  ;;  %v167_v9 = vand.u32 4294901760, %v137_v7  ;;  %v138_v10 = vld [vmem:[#allocation7 + $0x20] sm:$0xff]  ;;  %v139_v11 = vld [vmem:[#allocation7 + $0x28] sm:$0xff]  ;;  %v6188_v16 = vld [vmem:[#allocation7 + $0x30] sm:$0xff] }
  0x80   :  { %v170_v14 = vand.u32 4294901760, %v138_v10  ;;  %v173_v15 = vand.u32 4294901760, %v139_v11  ;;  %v6190_v17 = vld [vmem:[#allocation7 + $0x38] sm:$0xff]  ;;  %v176_v19 = vand.u32 4294901760, %v6188_v16  ;;  %v142_v21 = vld [vmem:[#allocation7 + $0x40] sm:$0xff]  ;;  %v143_v22 = vld [vmem:[#allocation7 + $0x48] sm:$0xff]  ;;  %v6208_v27 = vsub.f32 %v134_v2, %v158_v5 }
  0x81   :  { %v6180_v12 = vpack.c.bf16 %v161_v6, %v158_v5  ;;  %v6184_v13 = vpack.c.bf16 %v167_v9, %v164_v8  ;;  %v179_v20 = vand.u32 4294901760, %v6190_v17  ;;  %v182_v24 = vand.u32 4294901760, %v142_v21  ;;  %v133_v26 = vld [vmem:[#allocation2] sm:$0xff]  ;;  %v6216_v30 = vld [vmem:[#allocation7 + $0x58] sm:$0xff]  ;;  %v6232_v37 = vld [vmem:[#allocation7 + $0x60] sm:$0xff]  ;;  %s3708_s17 = sshll.u32 %s6012_s18, 4  ;;  %s3709_s17 = int_to_ptr.vmem [resolvable:$true] %s3708_s17 }
  0x82   :  { %v6194_v18 = vpack.c.bf16 %v173_v15, %v170_v14  ;;  %v185_v25 = vand.u32 4294901760, %v143_v22  ;;  %v6210_v28 = vsub.f32 %v135_v3, %v161_v6  ;;  %v6214_v29 = vld [vmem:[#allocation7 + $0x50] sm:$0xff]  ;;  %v6218_v31 = vand.u32 4294901760, %v133_v26  ;;  %v6234_v38 = vld [vmem:[#allocation7 + $0x68] sm:$0xff]  ;;  %v6255_v47 = vld [vmem:[#allocation7 + $0x78] sm:$0xff]  ;;  %s5966_s19 = scalar_lea.vmem %s3709_s17, 512  ;;  %p5971_p1 = scmp.lt.s32.totalorder %s3709_s17, %s3709_s17 }
  0x83   :  { %4974 = vmatpush3.bf16.msra.mxu1 %v6180_v12  ;;  %5046 = vmatpush3.bf16.msra.mxu0 %v6180_v12  ;;  %v6206_v23 = vpack.c.bf16 %v179_v20, %v176_v19  ;;  %v6220_v32 = vsub.f32 %v136_v4, %v164_v8  ;;  %v188_v34 = vand.u32 4294901760, %v6214_v29  ;;  %v191_v35 = vand.u32 4294901760, %v6216_v30  ;;  %v6253_v46 = vld [vmem:[#allocation7 + $0x70] sm:$0xff]  ;;  %v6286_v63 = vld [vmem:[#allocation8] sm:$0xff]  ;;  %v6298_v4 = vld [vmem:[#allocation8 + $0x8] sm:$0xff]  ;;  %p5967_p0 = scmp.ne.s32.totalorder %s3709_s17, %s5966_s19  ;;  %p5972_p2 = scmp.lt.s32.totalorder %s5966_s19, %s5966_s19 }
  0x84   :  { %4975 = vmatprep.subr.bf16.mxu1 %v7805_v0  ;;  %5047 = vmatprep.subr.bf16.mxu0 %v7805_v0  ;;  %v6224_v33 = vpack.c.bf16 %v185_v25, %v182_v24  ;;  %v6228_v36 = vsub.f32 %v137_v7, %v167_v9  ;;  %v251_v39 = vand.u32 4294901760, %v6208_v27  ;;  %v258_v40 = vand.u32 4294901760, %v6210_v28  ;;  %v6311_v9 = vld [vmem:[#allocation8 + $0x10] sm:$0xff] }
  0x85   :  { %v6238_v41 = vsub.f32 %v138_v10, %v170_v14  ;;  %v6241_v42 = vsub.f32 %v133_v26, %v6218_v31  ;;  %v6249_v43 = vpack.c.bf16 %v191_v35, %v188_v34  ;;  %v194_v44 = vand.u32 4294901760, %v6232_v37  ;;  %v6313_v10 = vld [vmem:[#allocation8 + $0x18] sm:$0xff]  ;;  %p5973_p3 = por %p5972_p2, %p5971_p1 }
  0x86   :  { %v7801_v45 = vand.u32 4294901760, %v6234_v38  ;;  %v265_v48 = vand.u32 4294901760, %v6220_v32  ;;  %v6258_v49 = vsub.f32 %v139_v11, %v173_v15  ;;  %v252_v50 = vsub.f32 %v6208_v27, %v251_v39 }
  0x87   :  { %4977 = vmatpush3.bf16.msra.mxu1 %v6184_v13  ;;  %5049 = vmatpush3.bf16.msra.mxu0 %v6184_v13  ;;  %v259_v51 = vsub.f32 %v6210_v28, %v258_v40  ;;  %v272_v52 = vand.u32 4294901760, %v6228_v36  ;;  %v7792_v53 = vand.u32 4294901760, %v6253_v46  ;;  %v7790_v54 = vand.u32 4294901760, %v6255_v47  ;;  %p5974_p4 = pnand %p5973_p3, %p5967_p0 }
  0x88   :  { %4978 = vmatprep.subr.bf16.mxu1 %v7805_v0  ;;  %5050 = vmatprep.subr.bf16.mxu0 %v7805_v0  ;;  %v240_v55 = vand.u32 4294901760, %v6241_v42  ;;  %v6274_v56 = vpack.c.bf16 %v7801_v45, %v194_v44  ;;  %v6279_v57 = vsub.f32 %v6220_v32, %v265_v48  ;;  %v7796_v58 = vand.u32 4294901760, %v6238_v41 }
  0x89   :  { %v253_v59 = vand.u32 4294901760, %v252_v50  ;;  %v260_v60 = vand.u32 4294901760, %v259_v51  ;;  %v273_v61 = vsub.f32 %v6228_v36, %v272_v52  ;;  %v7794_v62 = vand.u32 4294901760, %v6258_v49  ;;  %v6342_v51 = vld [vmem:[#allocation8 + $0x38] sm:$0xff] }
  0x8a   :  { %v6291_v2 = vsub.f32 %v6188_v16, %v176_v19  ;;  %v6296_v3 = vsub.f32 %v6190_v17, %v179_v20  ;;  %v6300_v5 = vsub.f32 %v142_v21, %v182_v24  ;;  %v6302_v6 = vsub.f32 %v143_v22, %v185_v25  ;;  %v6322_v17 = vld [vmem:[#allocation8 + $0x20] sm:$0xff]  ;;  %v6324_v19 = vld [vmem:[#allocation8 + $0x28] sm:$0xff]  ;;  %v6332_v25 = vld [vmem:[#allocation8 + $0x30] sm:$0xff] }
  0x8b   :  { %4980 = vmatpush3.bf16.msra.mxu1 %v6194_v18  ;;  %5052 = vmatpush3.bf16.msra.mxu0 %v6194_v18  ;;  %v6308_v7 = vpack.c.bf16 %v7790_v54, %v7792_v53  ;;  %v241_v8 = vsub.f32 %v6241_v42, %v240_v55  ;;  %v5069_v11 = vpack.c.bf16 %v258_v40, %v251_v39  ;;  %v267_v14 = vand.u32 4294901760, %v6279_v57 }
  0x8c   :  { %4981 = vmatprep.subr.bf16.mxu1 %v7805_v0  ;;  %5053 = vmatprep.subr.bf16.mxu0 %v7805_v0  ;;  %v280_v15 = vsub.f32 %v6238_v41, %v7796_v58  ;;  %v7789_v16 = vand.u32 4294901760, %v6286_v63  ;;  %v4997_v20 = vpack.c.bf16 %v260_v60, %v253_v59  ;;  %v274_v21 = vand.u32 4294901760, %v273_v61 }
  0x8d   :  { %v287_v22 = vsub.f32 %v6258_v49, %v7794_v62  ;;  %v7791_v24 = vand.u32 4294901760, %v6298_v4  ;;  %v293_v26 = vand.u32 4294901760, %v6291_v2  ;;  %v7793_v40 = vand.u32 4294901760, %v6311_v9 }
  0x8e   :  { %v6338_v39 = vsub.f32 %v6286_v63, %v7789_v16  ;;  %v7795_v50 = vand.u32 4294901760, %v6313_v10  ;;  %v242_v57 = vand.u32 4294901760, %v241_v8  ;;  %v7797_v60 = vand.u32 4294901760, %v6322_v17 }
  0x8f   :  { %4983 = vmatpush3.bf16.msra.mxu1 %v6206_v23  ;;  %5055 = vmatpush3.bf16.msra.mxu0 %v6206_v23  ;;  %v6347_v59 = vsub.f32 %v6298_v4, %v7791_v24  ;;  %v7798_v61 = vand.u32 4294901760, %v6324_v19  ;;  %v300_v16 = vand.u32 4294901760, %v6296_v3  ;;  %v6357_v54 = vsub.f32 %v6311_v9, %v7793_v40 }
  0x90   :  { %4984 = vmatprep.subr.bf16.mxu1 %v7805_v0  ;;  %5056 = vmatprep.subr.bf16.mxu0 %v7805_v0  ;;  %v6362_v8 = vsub.f32 %v6313_v10, %v7795_v50  ;;  %v7803_v24 = vand.u32 4294901760, %v6332_v25  ;;  %v6370_v53 = vsub.f32 %v6322_v17, %v7797_v60  ;;  %v7802_v62 = vand.u32 4294901760, %v6342_v51 }
  0x91   :  { %v6375_v40 = vsub.f32 %v6324_v19, %v7798_v61  ;;  %v6381_v50 = vsub.f32 %v6214_v29, %v188_v34  ;;  %v6386_v58 = vsub.f32 %v6216_v30, %v191_v35  ;;  %v5072_v60 = vpack.c.bf16 %v272_v52, %v265_v48 }
  0x92   :  { %v6393_v61 = vsub.f32 %v6332_v25, %v7803_v24  ;;  %v281_v1 = vand.u32 4294901760, %v280_v15  ;;  %v288_v45 = vand.u32 4294901760, %v287_v22  ;;  %v307_v29 = vand.u32 4294901760, %v6300_v5 }
  0x93   :  { %4986 = vmatpush3.bf16.msra.mxu1 %v6224_v33  ;;  %5058 = vmatpush3.bf16.msra.mxu0 %v6224_v33  ;;  %v6399_v34 = vsub.f32 %v6342_v51, %v7802_v62  ;;  %v5000_v30 = vpack.c.bf16 %v274_v21, %v267_v14  ;;  %v294_v35 = vsub.f32 %v6291_v2, %v293_v26  ;;  %v314_v52 = vand.u32 4294901760, %v6302_v6 }
  0x94   :  { %4987 = vmatprep.subr.bf16.mxu1 %v7805_v0  ;;  %5059 = vmatprep.subr.bf16.mxu0 %v7805_v0  ;;  %7917 = vst [vmem:[#allocation20_spill] sm:$0xff] %v6393_v61  ;;  %v301_v48 = vsub.f32 %v6296_v3, %v300_v16  ;;  %v7919_v15 = vand.u32 4294901760, %v6234_v38  ;;  %v7920_v14 = vmov 0.0   ;;  %v7921_v21 = vand.u32 4294901760, %v6238_v41 }
  0x95   :  { %7918 = vst [vmem:[#allocation21_spill] sm:$0xff] %v6399_v34  ;;  %v7922_v22 = vand.u32 4294901760, %v6258_v49  ;;  %v315_v62 = vsub.f32 %v6302_v6, %v314_v52  ;;  %v328_v24 = vand.u32 4294901760, %v6386_v58 }
  0x97   :  { %4989 = vmatpush3.bf16.msra.mxu1 %v6249_v43  ;;  %5061 = vmatpush3.bf16.msra.mxu0 %v6249_v43  ;;  %v329_v61 = vsub.f32 %v6386_v58, %v328_v24 }
  0x98   :  { %4990 = vmatprep.subr.bf16.mxu1 %v7805_v0  ;;  %5062 = vmatprep.subr.bf16.mxu0 %v7805_v0 }
  0x9b   :  { %4992 = vmatpush3.bf16.msra.mxu1 %v6274_v56  ;;  %5064 = vmatpush3.bf16.msra.mxu0 %v6274_v56 }
  0x9c   :  { %4993 = vmatprep.subr.bf16.mxu1 %v7805_v0  ;;  %5065 = vmatprep.subr.bf16.mxu0 %v7805_v0 }
  0x9f   :  { %4995 = vmatpush3.bf16.msra.mxu1 %v6308_v7  ;;  %5067 = vmatpush3.bf16.msra.mxu0 %v6308_v7 }
  0xa0   :  { %4996 = vmatprep.subr.bf16.mxu1 %v7805_v0  ;;  %5068 = vmatprep.subr.bf16.mxu0 %v7805_v0 }
  0xa2   :  { %4165 = vmatmul.mubr.f32.vlgmr.msra.gmra.mrb[0].mxu1 %v242_v57  ;;  %4270 = vmatmul.mubr.f32.vlgmr.msra.gmra.mrb[0].mxu0 %v240_v55  ;;  %v6409_v55 = vsub.f32 %v6232_v37, %v194_v44  ;;  %v5075_v57 = vpack.c.bf16 %v7922_v22, %v7921_v21  ;;  %v308_v37 = vsub.f32 %v6300_v5, %v307_v29  ;;  %v321_v44 = vand.u32 4294901760, %v6381_v50 }
  0xa3   :  { %4998 = vmatpush3.bf16.msra.mxu1 %v4997_v20  ;;  %5070 = vmatpush3.bf16.msra.mxu0 %v5069_v11  ;;  %v6414_v11 = vsub.f32 %v6234_v38, %v7919_v15  ;;  %v5003_v20 = vpack.c.bf16 %v288_v45, %v281_v1  ;;  %v295_v38 = vand.u32 4294901760, %v294_v35  ;;  %v302_v15 = vand.u32 4294901760, %v301_v48 }
  0xa4   :  { %4999 = vmatprep.subr.bf16.mxu1 %v7805_v0  ;;  %5071 = vmatprep.subr.bf16.mxu0 %v7805_v0  ;;  %v7923_v1 = vand.u32 4294901760, %v6253_v46  ;;  %v7924_v21 = vand.u32 4294901760, %v6255_v47  ;;  %v309_v35 = vand.u32 4294901760, %v308_v37  ;;  %v322_v48 = vsub.f32 %v6381_v50, %v321_v44 }
  0xa5   :  { %4199 = vmatprep.mubr.msk.f32.mxu1 %vm6010_vm0, %v7920_v14  ;;  %4304 = vmatprep.mubr.msk.f32.mxu0 %vm6010_vm0, %v7920_v14  ;;  %v335_v22 = vand.u32 4294901760, %v6409_v55  ;;  %v5006_v34 = vpack.c.bf16 %v302_v15, %v295_v38  ;;  %v5084_v38 = vpack.c.bf16 %v328_v24, %v321_v44 }
  0xa6   :  { %v6433_v45 = vsub.f32 %v6253_v46, %v7923_v1  ;;  %v342_v46 = vand.u32 4294901760, %v6414_v11  ;;  %v7925_v1 = vmov 0.0|0.0  }
  0xa7   :  { %5001 = vmatpush3.bf16.msra.mxu1 %v5000_v30  ;;  %5073 = vmatpush3.bf16.msra.mxu0 %v5072_v60  ;;  %v6438_v30 = vsub.f32 %v6255_v47, %v7924_v21  ;;  %v5078_v60 = vpack.c.bf16 %v300_v16, %v293_v26  ;;  %v5081_v47 = vpack.c.bf16 %v314_v52, %v307_v29  ;;  %v323_v21 = vand.u32 4294901760, %v322_v48 }
  0xa8   :  { %5002 = vmatprep.subr.bf16.mxu1 %v7805_v0  ;;  %5074 = vmatprep.subr.bf16.mxu0 %v7805_v0  ;;  %v316_v0 = vand.u32 4294901760, %v315_v62  ;;  %v336_v16 = vsub.f32 %v6409_v55, %v335_v22  ;;  %v349_v26 = vand.u32 4294901760, %v6433_v45  ;;  %v343_v62 = vsub.f32 %v6414_v11, %v342_v46 }
  0xa9   :  { %v356_v37 = vand.u32 4294901760, %v6438_v30 }
  0xaa   :  { %v337_v15 = vand.u32 4294901760, %v336_v16  ;;  %v344_v52 = vand.u32 4294901760, %v343_v62  ;;  %v350_v48 = vsub.f32 %v6433_v45, %v349_v26 }
  0xab   :  { %5004 = vmatpush3.bf16.msra.mxu1 %v5003_v20  ;;  %5076 = vmatpush3.bf16.msra.mxu0 %v5075_v57  ;;  %v5009_v20 = vpack.c.bf16 %v316_v0, %v309_v35  ;;  %v330_v57 = vand.u32 4294901760, %v329_v61  ;;  %v5087_v61 = vpack.c.bf16 %v342_v46, %v335_v22  ;;  %v5090_v44 = vpack.c.bf16 %v356_v37, %v349_v26  ;;  %v814_v46 = vld [vmem:[#allocation8 + $0x78] sm:$0xff] }
  0xac   :  { %5005 = vmatprep.subr.bf16.mxu1 %v7925_v1  ;;  %5077 = vmatprep.subr.bf16.mxu0 %v7925_v1  ;;  %v5015_v0 = vpack.c.bf16 %v344_v52, %v337_v15  ;;  %v5024_v22 = vpack.c.bf16 %v6228_v36, %v6220_v32  ;;  %v7926_v32 = vand.u32 4294901760, %v6286_v63  ;;  %v7933_v63 = vand.u32 4294901760, %v6342_v51  ;;  %v812_v51 = vld [vmem:[#allocation8 + $0x68] sm:$0xff] }
  0xad   :  { %v5012_v29 = vpack.c.bf16 %v330_v57, %v323_v21  ;;  %v868_v16 = vand.u32 4294901760, %v814_v46  ;;  %v7824_v26 = vand.u32 4294901760, %v6338_v39 }
  0xaf   :  { %5007 = vmatpush3.bf16.msra.mxu1 %v5006_v34  ;;  %5079 = vmatpush3.bf16.msra.mxu0 %v5078_v60  ;;  %v357_v34 = vsub.f32 %v6438_v30, %v356_v37  ;;  %v351_v60 = vand.u32 4294901760, %v350_v48  ;;  %v917_v62 = vsub.f32 %v6338_v39, %v7824_v26 }
  0xb0   :  { %5008 = vmatprep.subr.bf16.mxu1 %v7925_v1  ;;  %5080 = vmatprep.subr.bf16.mxu0 %v7925_v1 }
  0xb1   :  { %v358_v35 = vand.u32 4294901760, %v357_v34 }
  0xb3   :  { %5010 = vmatpush3.bf16.msra.mxu1 %v5009_v20  ;;  %5082 = vmatpush3.bf16.msra.mxu0 %v5081_v47  ;;  %v5018_v24 = vpack.c.bf16 %v358_v35, %v351_v60  ;;  %v5021_v47 = vpack.c.bf16 %v6210_v28, %v6208_v27  ;;  %v5027_v27 = vpack.c.bf16 %v6258_v49, %v6238_v41  ;;  %v7928_v41 = vand.u32 4294901760, %v6311_v9  ;;  %v809_v9 = vld [vmem:[#allocation8 + $0x50] sm:$0xff] }
  0xb4   :  { %5011 = vmatprep.subr.bf16.mxu1 %v7925_v1  ;;  %5083 = vmatprep.subr.bf16.mxu0 %v7925_v1  ;;  %v5042_v28 = vpack.c.bf16 %v6438_v30, %v6433_v45  ;;  %v813_v30 = vld [vmem:[#allocation8 + $0x70] sm:$0xff]  ;;  %v7823_v20 = vand.u32 4294901760, %v6347_v59  ;;  %v918_v60 = vand.u32 4294901760, %v917_v62 }
  0xb5   :  { %v865_v21 = vand.u32 4294901760, %v813_v30 }
  0xb6   :  { %v924_v37 = vsub.f32 %v6347_v59, %v7823_v20  ;;  %v1478_v20 = vld [vmem:[#allocation10 + $0x70] sm:$0xff] }
  0xb7   :  { %5013 = vmatpush3.bf16.msra.mxu1 %v5012_v29  ;;  %5085 = vmatpush3.bf16.msra.mxu0 %v5084_v38  ;;  %v6558_v57 = vpack.c.bf16 %v868_v16, %v865_v21 }
  0xb8   :  { %5014 = vmatprep.subr.bf16.mxu1 %v7925_v1  ;;  %5086 = vmatprep.subr.bf16.mxu0 %v7925_v1  ;;  %v925_v35 = vand.u32 4294901760, %v924_v37 }
  0xbb   :  { %5016 = vmatpush3.bf16.msra.mxu1 %v5015_v0  ;;  %5088 = vmatpush3.bf16.msra.mxu0 %v5087_v61  ;;  %v6579_v0 = vsub.f32 %v813_v30, %v865_v21  ;;  %v6581_v61 = vsub.f32 %v814_v46, %v868_v16 }
  0xbc   :  { %5017 = vmatprep.subr.bf16.mxu1 %v7925_v1  ;;  %5089 = vmatprep.subr.bf16.mxu0 %v7925_v1 }
  0xbf   :  { %5019 = vmatpush3.bf16.msra.mxu1 %v5018_v24  ;;  %5091 = vmatpush3.bf16.msra.mxu0 %v5090_v44  ;;  %v7821_v24 = vand.u32 4294901760, %v6357_v54  ;;  %v7820_v44 = vand.u32 4294901760, %v6362_v8 }
  0xc0   :  { %5020 = vmatprep.subr.bf16.mxu1 %v7925_v1  ;;  %5092 = vmatprep.subr.bf16.mxu0 %v7925_v1 }
  0xc2   :  { %4200 = vmatmul.mubr.f32.vlgmr.msra.gmra.mrb[0].mxu1 %v6218_v31  ;;  %4305 = vmatmul.mubr.f32.vlgmr.msra.gmra.mrb[0].mxu0 %v6218_v31 }
  0xc3   :  { %5022 = vmatpush3.bf16.msra.mxu1 %v5021_v47  ;;  %5094 = vmatpush3.bf16.msra.mxu0 %v6180_v12  ;;  %v5030_v12 = vpack.c.bf16 %v6296_v3, %v6291_v2  ;;  %v807_v3 = vld [vmem:[#allocation8 + $0x40] sm:$0xff]  ;;  %v6586_v47 = vpack.c.bf16 %v925_v35, %v918_v60 }
  0xc4   :  { %5023 = vmatprep.subr.bf16.mxu1 %v7925_v1  ;;  %5095 = vmatprep.subr.bf16.mxu0 %v7925_v1 }
  0xc5   :  { %4234 = vmatprep.mubr.msk.f32.mxu1 %vm6010_vm0, %v7920_v14  ;;  %4339 = vmatprep.mubr.msk.f32.mxu0 %vm6010_vm0, %v7920_v14 }
  0xc7   :  { %5025 = vmatpush3.bf16.msra.mxu1 %v5024_v22  ;;  %5097 = vmatpush3.bf16.msra.mxu0 %v6184_v13  ;;  %v5033_v13 = vpack.c.bf16 %v6302_v6, %v6300_v5  ;;  %v847_v5 = vand.u32 4294901760, %v807_v3  ;;  %v931_v22 = vsub.f32 %v6357_v54, %v7821_v24 }
  0xc8   :  { %5026 = vmatprep.subr.bf16.mxu1 %v7925_v1  ;;  %5098 = vmatprep.subr.bf16.mxu0 %v7925_v1 }
  0xc9   :  { %v6566_v38 = vsub.f32 %v807_v3, %v847_v5 }
  0xcb   :  { %5028 = vmatpush3.bf16.msra.mxu1 %v5027_v27  ;;  %5100 = vmatpush3.bf16.msra.mxu0 %v6194_v18  ;;  %v5036_v18 = vpack.c.bf16 %v6386_v58, %v6381_v50  ;;  %v7932_v58 = vand.u32 4294901760, %v6332_v25  ;;  %v811_v50 = vld [vmem:[#allocation8 + $0x60] sm:$0xff]  ;;  %v938_v27 = vsub.f32 %v6362_v8, %v7820_v44 }
  0xcc   :  { %5029 = vmatprep.subr.bf16.mxu1 %v7925_v1  ;;  %5101 = vmatprep.subr.bf16.mxu0 %v7925_v1 }
  0xcd   :  { %v6539_v2 = vpack.c.bf16 %v7933_v63, %v7932_v58  ;;  %v7935_v58 = vld [vmem:[#allocation21_spill] sm:$0xff] }
  0xce   :  { %v7816_v63 = vand.u32 4294901760, %v7935_v58 }
  0xcf   :  { %5031 = vmatpush3.bf16.msra.mxu1 %v5030_v12  ;;  %5103 = vmatpush3.bf16.msra.mxu0 %v6206_v23  ;;  %v5039_v23 = vpack.c.bf16 %v6414_v11, %v6409_v55  ;;  %v859_v55 = vand.u32 4294901760, %v811_v50  ;;  %v862_v11 = vand.u32 4294901760, %v812_v51  ;;  %v7819_v12 = vand.u32 4294901760, %v6370_v53 }
  0xd0   :  { %5032 = vmatprep.subr.bf16.mxu1 %v7925_v1  ;;  %5104 = vmatprep.subr.bf16.mxu0 %v7925_v1 }
  0xd1   :  { %v6552_v45 = vpack.c.bf16 %v862_v11, %v859_v55  ;;  %v6575_v48 = vsub.f32 %v811_v50, %v859_v55  ;;  %v6577_v34 = vsub.f32 %v812_v51, %v862_v11 }
  0xd3   :  { %5034 = vmatpush3.bf16.msra.mxu1 %v5033_v13  ;;  %5106 = vmatpush3.bf16.msra.mxu0 %v6224_v33  ;;  %v7927_v33 = vand.u32 4294901760, %v6298_v4  ;;  %v808_v4 = vld [vmem:[#allocation8 + $0x48] sm:$0xff]  ;;  %v7818_v13 = vand.u32 4294901760, %v6375_v40  ;;  %v7811_v35 = vand.u32 4294901760, %v6575_v48 }
  0xd4   :  { %5035 = vmatprep.subr.bf16.mxu1 %v7925_v1  ;;  %5107 = vmatprep.subr.bf16.mxu0 %v7925_v1  ;;  %v850_v6 = vand.u32 4294901760, %v808_v4 }
  0xd5   :  { %v6510_v36 = vpack.c.bf16 %v7927_v33, %v7926_v32  ;;  %v952_v32 = vsub.f32 %v6375_v40, %v7818_v13 }
  0xd6   :  { %v6568_v15 = vsub.f32 %v808_v4, %v850_v6 }
  0xd7   :  { %5037 = vmatpush3.bf16.msra.mxu1 %v5036_v18  ;;  %5109 = vmatpush3.bf16.msra.mxu0 %v6249_v43  ;;  %v7929_v43 = vand.u32 4294901760, %v6313_v10  ;;  %v810_v10 = vld [vmem:[#allocation8 + $0x58] sm:$0xff]  ;;  %v932_v18 = vand.u32 4294901760, %v931_v22  ;;  %v7810_v22 = vand.u32 4294901760, %v6577_v34 }
  0xd8   :  { %5038 = vmatprep.subr.bf16.mxu1 %v7925_v1  ;;  %5110 = vmatprep.subr.bf16.mxu0 %v7925_v1 }
  0xd9   :  { %v6520_v49 = vpack.c.bf16 %v7929_v43, %v7928_v41  ;;  %v953_v43 = vand.u32 4294901760, %v952_v32 }
  0xdb   :  { %5040 = vmatpush3.bf16.msra.mxu1 %v5039_v23  ;;  %5112 = vmatpush3.bf16.msra.mxu0 %v6274_v56  ;;  %v939_v23 = vand.u32 4294901760, %v938_v27 }
  0xdc   :  { %5041 = vmatprep.subr.bf16.mxu1 %v7925_v1  ;;  %5113 = vmatprep.subr.bf16.mxu0 %v7925_v1 }
  0xdd   :  { %v6602_v33 = vpack.c.bf16 %v939_v23, %v932_v18  ;;  %v1001_v18 = vsub.f32 %v6575_v48, %v7811_v35  ;;  %v1008_v23 = vsub.f32 %v6577_v34, %v7810_v22 }
  0xdf   :  { %5043 = vmatpush3.bf16.msra.mxu1 %v5042_v28  ;;  %5115 = vmatpush3.bf16.msra.mxu0 %v6308_v7  ;;  %v6544_v7 = vpack.c.bf16 %v850_v6, %v847_v5  ;;  %v945_v28 = vsub.f32 %v6370_v53, %v7819_v12  ;;  %v966_v5 = vsub.f32 %v7935_v58, %v7816_v63  ;;  %v1009_v32 = vand.u32 4294901760, %v1008_v23  ;;  %v1472_v63 = vld [vmem:[#allocation10 + $0x40] sm:$0xff]  ;;  %v1481_v23 = vld [vmem:[#allocation10 + $0x88] sm:$0xff] }
  0xe0   :  { %5116 = vmatprep.subr.bf16.mxu1 %v7925_v1 }
  0xe1   :  { %v946_v41 = vand.u32 4294901760, %v945_v28  ;;  %v1002_v28 = vand.u32 4294901760, %v1001_v18  ;;  %v1483_v18 = vld [vmem:[#allocation10 + $0x98] sm:$0xff] }
  0xe2   :  { %4235 = vmatmul.mubr.f32.vlgmr.msra.gmra.mrb[0].mxu1 %v6241_v42  ;;  %4340 = vmatmul.mubr.f32.vlgmr.msra.gmra.mrb[0].mxu0 %v6218_v31  ;;  %v7930_v42 = vand.u32 4294901760, %v6322_v17  ;;  %v7931_v31 = vand.u32 4294901760, %v6324_v19  ;;  %v853_v17 = vand.u32 4294901760, %v809_v9  ;;  %v856_v19 = vand.u32 4294901760, %v810_v10 }
  0xe3   :  { %5118 = vmatpush3.bf16.msra.mxu1 %v6510_v36  ;;  %4374 = vmatprep.mubr.msk.f32.mxu1 %vm6010_vm0, %v7920_v14  ;;  %v5147_v3 = vpack.c.bf16 %v953_v43, %v946_v41  ;;  %v7809_v41 = vand.u32 4294901760, %v6579_v0  ;;  %v7808_v43 = vand.u32 4294901760, %v6581_v61 }
  0xe4   :  { %5119 = vmatprep.subr.bf16.mxu1 %v7925_v1  ;;  %1604 = vmatprep.mubr.f32.mxu0 %v7920_v14  ;;  %v6531_v56 = vpack.c.bf16 %v7931_v31, %v7930_v42  ;;  %v6548_v25 = vpack.c.bf16 %v856_v19, %v853_v17  ;;  %v6570_v29 = vsub.f32 %v809_v9, %v853_v17  ;;  %v7934_v42 = vld [vmem:[#allocation20_spill] sm:$0xff]  ;;  %v967_v9 = vand.u32 4294901760, %v966_v5 }
  0xe5   :  { %v6572_v52 = vsub.f32 %v810_v10, %v856_v19  ;;  %v7817_v31 = vand.u32 4294901760, %v7934_v42  ;;  %v7815_v10 = vand.u32 4294901760, %v6566_v38  ;;  %v7814_v17 = vand.u32 4294901760, %v6568_v15 }
  0xe6   :  { %v7813_v30 = vand.u32 4294901760, %v6570_v29  ;;  %v1015_v5 = vsub.f32 %v6579_v0, %v7809_v41 }
  0xe7   :  { %5121 = vmatpush3.bf16.msra.mxu1 %v6520_v49  ;;  %v959_v4 = vsub.f32 %v7934_v42, %v7817_v31  ;;  %v973_v50 = vsub.f32 %v6566_v38, %v7815_v10  ;;  %v980_v51 = vsub.f32 %v6568_v15, %v7814_v17  ;;  %v7812_v46 = vand.u32 4294901760, %v6572_v52  ;;  %v1475_v10 = vld [vmem:[#allocation10 + $0x58] sm:$0xff]  ;;  %v1474_v31 = vld [vmem:[#allocation10 + $0x50] sm:$0xff] }
  0xe8   :  { %5122 = vmatprep.subr.bf16.mxu1 %v7925_v1  ;;  %v987_v16 = vsub.f32 %v6570_v29, %v7813_v30 }
  0xe9   :  { %v960_v6 = vand.u32 4294901760, %v959_v4  ;;  %v974_v55 = vand.u32 4294901760, %v973_v50  ;;  %v981_v11 = vand.u32 4294901760, %v980_v51  ;;  %v994_v62 = vsub.f32 %v6572_v52, %v7812_v46 }
  0xea   :  { %v988_v37 = vand.u32 4294901760, %v987_v16  ;;  %v5159_v4 = vpack.c.bf16 %v1009_v32, %v1002_v28  ;;  %v3720_v28 = vld [vmem:[%s7779_s3] ss:$0 sm:$0xff] }
  0xeb   :  { %5124 = vmatpush3.bf16.msra.mxu1 %v6531_v56  ;;  %v5150_v19 = vpack.c.bf16 %v967_v9, %v960_v6  ;;  %v5153_v21 = vpack.c.bf16 %v981_v11, %v974_v55  ;;  %v995_v60 = vand.u32 4294901760, %v994_v62  ;;  %v1022_v6 = vsub.f32 %v6581_v61, %v7808_v43 }
  0xec   :  { %5125 = vmatprep.subr.bf16.mxu1 %v7925_v1  ;;  %v1016_v9 = vand.u32 4294901760, %v1015_v5  ;;  %v5165_v55 = vpack.c.bf16 %v6347_v59, %v6338_v39  ;;  %v5168_v11 = vpack.c.bf16 %v6362_v8, %v6357_v54 }
  0xed   :  { %v5156_v27 = vpack.c.bf16 %v995_v60, %v988_v37  ;;  %v1023_v50 = vand.u32 4294901760, %v1022_v6  ;;  %v1480_v60 = vld [vmem:[#allocation10 + $0x80] sm:$0xff] }
  0xef   :  { %5127 = vmatpush3.bf16.msra.mxu1 %v6539_v2  ;;  %v5162_v51 = vpack.c.bf16 %v1023_v50, %v1016_v9 }
  0xf0   :  { %5128 = vmatprep.subr.bf16.mxu1 %v7925_v1 }
  0xf3   :  { %5130 = vmatpush3.bf16.msra.mxu1 %v6544_v7 }
  0xf4   :  { %5131 = vmatprep.subr.bf16.mxu1 %v7925_v1 }
  0xf7   :  { %5133 = vmatpush3.bf16.msra.mxu1 %v6548_v25 }
  0xf8   :  { %5134 = vmatprep.subr.bf16.mxu1 %v7925_v1 }
  0xfb   :  { %5136 = vmatpush3.bf16.msra.mxu1 %v6552_v45 }
  0xfc   :  { %5137 = vmatprep.subr.bf16.mxu1 %v7925_v1 }
  0xff   :  { %5139 = vmatpush3.bf16.msra.mxu1 %v6558_v57 }
 0x100   :  { %5140 = vmatprep.subr.bf16.mxu1 %v7925_v1 }
 0x1b5   :  { %v499_v32 = vpop.f32.mrb[0].mxu1  ;;  %v794_v5 = vpop.f32.mrb[0].mxu0 }
 0x1b6   :  { %v5740_v6 = vadd.f32 %v3720_v28, %v499_v32  ;;  %v4236_v9 = vpop.f32.mrb[1].mxu1  ;;  %v4341_v50 = vpop.f32.mrb[1].mxu0  ;;  %v1468_v28 = vld [vmem:[#allocation10 + $0x20] sm:$0xff]  ;;  %v1470_v32 = vld [vmem:[#allocation10 + $0x30] sm:$0xff] }
 0x1b8   :  { %v5741_v43 = vadd.f32 %v5740_v6, %v794_v5  ;;  %v1473_v5 = vld [vmem:[#allocation10 + $0x48] sm:$0xff] }
 0x1ba   :  { %v798_v41 = vmax.f32 %v5741_v43, 0.0 }
 0x1bc   :  { %v6663_v22 = vand.u32 4294901760, %v798_v41 }
 0x1be   :  { %v6666_v35 = vsub.f32 %v798_v41, %v6663_v22  ;;  %v1471_v41 = vld [vmem:[#allocation10 + $0x38] sm:$0xff] }
 0x1c0   :  { %v7822_v46 = vand.u32 4294901760, %v6666_v35 }
 0x1c2   :  { %v906_v30 = vsub.f32 %v6666_v35, %v7822_v46  ;;  %v1477_v46 = vld [vmem:[#allocation10 + $0x68] sm:$0xff] }
 0x1c4   :  { %v907_v17 = vand.u32 4294901760, %v906_v30  ;;  %v1466_v30 = vld [vmem:[#allocation10 + $0x10] sm:$0xff] }
 0x1c5   :  { %v1514_v43 = vand.u32 4294901760, %v1466_v30 }
 0x1c6   :  { %4375 = vmatmul.mubr.f32.vlgmr.msra.gmra.mrb[2].mxu1 %v907_v17 }
 0x1c7   :  { %5142 = vmatpush3.bf16.msra.mxu1 %v6586_v47  ;;  %4409 = vmatprep.mubr.msk.f32.mxu1 %vm6010_vm0, %v7920_v14  ;;  %v1465_v47 = vld [vmem:[#allocation10 + $0x8] sm:$0xff]  ;;  %v6698_v12 = vsub.f32 %v1466_v30, %v1514_v43  ;;  %v1528_v30 = vand.u32 4294901760, %v1475_v10 }
 0x1c8   :  { %5143 = vmatprep.subr.bf16.mxu1 %v7925_v1  ;;  %v1508_v17 = vand.u32 4294901760, %v1465_v47 }
 0x1c9   :  { %v6723_v62 = vsub.f32 %v1475_v10, %v1528_v30  ;;  %v1538_v10 = vand.u32 4294901760, %v1478_v20 }
 0x1cb   :  { %5145 = vmatpush3.bf16.msra.mxu1 %v6602_v33  ;;  %v1467_v33 = vld [vmem:[#allocation10 + $0x18] sm:$0xff] }
 0x1cc   :  { %5146 = vmatprep.subr.bf16.mxu1 %v7925_v1 }
 0x1cf   :  { %5148 = vmatpush3.bf16.msra.mxu1 %v5147_v3  ;;  %v1464_v3 = vld [vmem:[#allocation10] sm:$0xff] }
 0x1d0   :  { %5149 = vmatprep.subr.bf16.mxu1 %v7925_v1 }
 0x1d3   :  { %5151 = vmatpush3.bf16.msra.mxu1 %v5150_v19  ;;  %v1512_v19 = vand.u32 4294901760, %v1467_v33 }
 0x1d4   :  { %5152 = vmatprep.subr.bf16.mxu1 %v7925_v1 }
 0x1d5   :  { %v6688_v6 = vpack.c.bf16 %v1512_v19, %v1508_v17  ;;  %v6692_v9 = vsub.f32 %v1467_v33, %v1512_v19  ;;  %v1518_v33 = vand.u32 4294901760, %v1468_v28  ;;  %v1479_v19 = vld [vmem:[#allocation10 + $0x78] sm:$0xff] }
 0x1d7   :  { %5154 = vmatpush3.bf16.msra.mxu1 %v5153_v21  ;;  %v1510_v21 = vand.u32 4294901760, %v1464_v3  ;;  %7936 = vst [vmem:[#allocation20_spill] sm:$0xff] %v6688_v6  ;;  %5261 = vmatprep.subr.bf16.mxu0 %v6688_v6 }
 0x1d8   :  { %5155 = vmatprep.subr.bf16.mxu1 %v7925_v1 }
 0x1d9   :  { %v6694_v50 = vsub.f32 %v1464_v3, %v1510_v21  ;;  %v6696_v13 = vpack.c.bf16 %v1514_v43, %v1510_v21  ;;  %v1522_v3 = vand.u32 4294901760, %v1470_v32  ;;  %v1526_v21 = vand.u32 4294901760, %v1472_v63 }
 0x1da   :  { %v1532_v43 = vand.u32 4294901760, %v1477_v46 }
 0x1db   :  { %5157 = vmatpush3.bf16.msra.mxu1 %v5156_v27  ;;  %v1469_v27 = vld [vmem:[#allocation10 + $0x28] sm:$0xff]  ;;  %7937 = vst [vmem:[#allocation21_spill] sm:$0xff] %v6696_v13  ;;  %5263 = vmatpush1.bf16.msra.mxu0 %v6696_v13  ;;  %v6727_v13 = vsub.f32 %v1472_v63, %v1526_v21  ;;  %v1542_v63 = vand.u32 4294901760, %v1480_v60 }
 0x1dc   :  { %5158 = vmatprep.subr.bf16.mxu1 %v7925_v1 }
 0x1df   :  { %5160 = vmatpush3.bf16.msra.mxu1 %v5159_v4  ;;  %v1516_v4 = vand.u32 4294901760, %v1469_v27 }
 0x1e0   :  { %5161 = vmatprep.subr.bf16.mxu1 %v7925_v1 }
 0x1e1   :  { %v6702_v24 = vsub.f32 %v1469_v27, %v1516_v4  ;;  %v1530_v27 = vand.u32 4294901760, %v1474_v31 }
 0x1e3   :  { %5163 = vmatpush3.bf16.msra.mxu1 %v5162_v51  ;;  %v1520_v51 = vand.u32 4294901760, %v1471_v41  ;;  %v6725_v16 = vpack.c.bf16 %v1530_v27, %v1526_v21 }
 0x1e4   :  { %5164 = vmatprep.subr.bf16.mxu1 %v7925_v1 }
 0x1e5   :  { %v6700_v44 = vpack.c.bf16 %v1520_v51, %v1516_v4  ;;  %v1476_v4 = vld [vmem:[#allocation10 + $0x60] sm:$0xff] }
 0x1e6   :  { %4410 = vmatmul.mubr.f32.vlgmr.msra.gmra.mrb[2].mxu1 %v6663_v22 }
 0x1e7   :  { %5166 = vmatpush3.bf16.msra.mxu1 %v5165_v55  ;;  %4444 = vmatprep.mubr.msk.f32.mxu1 %vm6010_vm0, %v7920_v14  ;;  %v6690_v55 = vsub.f32 %v1465_v47, %v1508_v17  ;;  %7938 = vst [vmem:[#allocation22_spill] sm:$0xff] %v6700_v44  ;;  %v6708_v47 = vsub.f32 %v1471_v41, %v1520_v51  ;;  %v1524_v17 = vand.u32 4294901760, %v1473_v5 }
 0x1e8   :  { %5167 = vmatprep.subr.bf16.mxu1 %v7925_v1  ;;  %5265 = vmatprep.subr.bf16.mxu0 %v6700_v44  ;;  %v6715_v41 = vsub.f32 %v1468_v28, %v1518_v33  ;;  %v6717_v51 = vsub.f32 %v1470_v32, %v1522_v3  ;;  %v1482_v44 = vld [vmem:[#allocation10 + $0x90] sm:$0xff]  ;;  %v7941_v28 = vpack.c.bf16 %v6375_v40, %v6370_v53 }
 0x1e9   :  { %v6719_v26 = vsub.f32 %v1473_v5, %v1524_v17  ;;  %v6721_v37 = vpack.c.bf16 %v1528_v30, %v1524_v17  ;;  %v6732_v32 = vsub.f32 %v1474_v31, %v1530_v27  ;;  %v1536_v5 = vand.u32 4294901760, %v1479_v19 }
 0x1ea   :  { %v1540_v17 = vand.u32 4294901760, %v1481_v23  ;;  %v1544_v30 = vand.u32 4294901760, %v1483_v18  ;;  %v1546_v27 = vand.u32 4294901760, %v1482_v44 }
 0x1eb   :  { %5169 = vmatpush3.bf16.msra.mxu1 %v5168_v11  ;;  %v6713_v11 = vpack.c.bf16 %v1522_v3, %v1518_v33  ;;  %7940 = vst [vmem:[#allocation24_spill] sm:$0xff] %v6721_v37  ;;  %7942 = vst [vmem:[#allocation25_spill] sm:$0xff] %v6732_v32  ;;  %v6734_v33 = vsub.f32 %v1477_v46, %v1532_v43  ;;  %v1534_v3 = vand.u32 4294901760, %v1476_v4 }
 0x1ec   :  { %5170 = vmatprep.subr.bf16.mxu1 %v7925_v1  ;;  %v6739_v21 = vpack.c.bf16 %v1536_v5, %v1532_v43  ;;  %v6741_v6 = vsub.f32 %v1479_v19, %v1536_v5  ;;  %v6745_v46 = vsub.f32 %v1478_v20, %v1538_v10  ;;  %v6754_v32 = vsub.f32 %v1480_v60, %v1542_v63 }
 0x1ed   :  { %7939 = vst [vmem:[#allocation23_spill] sm:$0xff] %v6713_v11  ;;  %7943 = vst [vmem:[#allocation26_spill] sm:$0xff] %v6734_v33  ;;  %5267 = vmatpush1.bf16.msra.mxu0 %v6713_v11  ;;  %v6743_v31 = vsub.f32 %v1476_v4, %v1534_v3  ;;  %v7945_v11 = vpack.c.bf16 %v7935_v58, %v7934_v42  ;;  %v6752_v33 = vsub.f32 %v1483_v18, %v1544_v30 }
 0x1ee   :  { %5269 = vmatprep.subr.bf16.mxu0 %v6721_v37  ;;  %7944 = vst [vmem:[#allocation27_spill] sm:$0xff] %v6739_v21  ;;  %7947 = vst [vmem:[#allocation29_spill] sm:$0xff] %v6754_v32  ;;  %v6756_v37 = vsub.f32 %v1482_v44, %v1546_v27  ;;  %v6760_v19 = vpack.c.bf16 %v1538_v10, %v1534_v3  ;;  %v6763_v20 = vpack.c.bf16 %v1544_v30, %v1540_v17 }
 0x1ef   :  { %5172 = vmatpush3.bf16.msra.mxu1 %v7941_v28  ;;  %v6747_v28 = vsub.f32 %v1481_v23, %v1540_v17  ;;  %7946 = vst [vmem:[#allocation28_spill] sm:$0xff] %v6752_v33  ;;  %v7951_v23 = vpack.c.bf16 %v6568_v15, %v6566_v38  ;;  %v6770_v44 = vpack.c.bf16 %v1546_v27, %v1542_v63  ;;  %v7956_v4 = vand.u32 4294901760, %v6338_v39 }
 0x1f0   :  { %5173 = vmatprep.subr.bf16.mxu1 %v7925_v1  ;;  %7948 = vst [vmem:[#allocation30_spill] sm:$0xff] %v6756_v37  ;;  %7949 = vst [vmem:[#allocation31_spill] sm:$0xff] %v6760_v19  ;;  %v7953_v60 = vpack.c.bf16 %v6572_v52, %v6570_v29  ;;  %v7954_v18 = vpack.c.bf16 %v6577_v34, %v6575_v48  ;;  %v7955_v43 = vpack.c.bf16 %v6581_v61, %v6579_v0 }
 0x1f1   :  { %5271 = vmatpush1.bf16.msra.mxu0 %v6725_v16  ;;  %7950 = vst [vmem:[#allocation32_spill] sm:$0xff] %v6763_v20  ;;  %7952 = vst [vmem:[#allocation33_spill] sm:$0xff] %v6770_v44  ;;  %v7958_v3 = vand.u32 4294901760, %v6666_v35  ;;  %v7959_v10 = vand.u32 4294901760, %v6357_v54  ;;  %v7960_v17 = vand.u32 4294901760, %v6362_v8  ;;  %v7961_v39 = vand.u32 4294901760, %v6370_v53 }
 0x1f2   :  { %5273 = vmatprep.subr.bf16.mxu0 %v6739_v21  ;;  %v7964_v54 = vand.u32 4294901760, %v7935_v58  ;;  %v7965_v27 = vand.u32 4294901760, %v6566_v38  ;;  %v7967_v53 = vand.u32 4294901760, %v6570_v29  ;;  %v7970_v58 = vand.u32 4294901760, %v6577_v34  ;;  %v1491_v34 = vld [vmem:[#allocation10 + $0xd8] sm:$0xff] }
 0x1f3   :  { %5175 = vmatpush3.bf16.msra.mxu1 %v7945_v11  ;;  %v7957_v11 = vand.u32 4294901760, %v6347_v59  ;;  %v5216_v30 = vpack.c.bf16 %v7960_v17, %v7959_v10  ;;  %v7962_v59 = vand.u32 4294901760, %v6375_v40  ;;  %v7968_v40 = vand.u32 4294901760, %v6572_v52 }
 0x1f4   :  { %5176 = vmatprep.subr.bf16.mxu1 %v7925_v1  ;;  %v7971_v38 = vand.u32 4294901760, %v6579_v0 }
 0x1f5   :  { %5275 = vmatpush1.bf16.msra.mxu0 %v6760_v19  ;;  %v5213_v5 = vpack.c.bf16 %v7957_v11, %v7956_v4  ;;  %v5219_v63 = vpack.c.bf16 %v7962_v59, %v7961_v39  ;;  %v1490_v11 = vld [vmem:[#allocation10 + $0xd0] sm:$0xff]  ;;  %v1495_v39 = vld [vmem:[#allocation10 + $0xf8] sm:$0xff] }
 0x1f6   :  { %5277 = vmatprep.subr.bf16.mxu0 %v6763_v20 }
 0x1f7   :  { %5178 = vmatpush3.bf16.msra.mxu1 %v7951_v23  ;;  %v7966_v23 = vand.u32 4294901760, %v6568_v15  ;;  %v7972_v15 = vand.u32 4294901760, %v6581_v61  ;;  %v1560_v61 = vand.u32 4294901760, %v1491_v34 }
 0x1f8   :  { %5179 = vmatprep.subr.bf16.mxu1 %v7925_v1 }
 0x1f9   :  { %5279 = vmatpush1.bf16.msra.mxu0 %v6770_v44  ;;  %v5234_v4 = vpack.c.bf16 %v7972_v15, %v7971_v38 }
 0x1fb   :  { %5181 = vmatpush3.bf16.msra.mxu1 %v7953_v60  ;;  %v5225_v60 = vpack.c.bf16 %v7966_v23, %v7965_v27  ;;  %v7843_v27 = vand.u32 4294901760, %v6692_v9 }
 0x1fc   :  { %5182 = vmatprep.subr.bf16.mxu1 %v7925_v1 }
 0x1ff   :  { %5184 = vmatpush3.bf16.msra.mxu1 %v7954_v18  ;;  %v5228_v18 = vpack.c.bf16 %v7968_v40, %v7967_v53  ;;  %v7846_v53 = vand.u32 4294901760, %v6694_v50  ;;  %v7866_v40 = vand.u32 4294901760, %v6698_v12 }
 0x200   :  { %5185 = vmatprep.subr.bf16.mxu1 %v7925_v1 }
 0x203   :  { %5187 = vmatpush3.bf16.msra.mxu1 %v7955_v43 }
 0x204   :  { %5188 = vmatprep.subr.bf16.mxu1 %v7925_v1 }
 0x206   :  { %4445 = vmatmul.mubr.f32.vlgmr.msra.gmra.mrb[2].mxu1 %v6666_v35  ;;  %v7963_v35 = vand.u32 4294901760, %v7934_v42  ;;  %v7969_v42 = vand.u32 4294901760, %v6575_v48 }
 0x207   :  { %5190 = vmatpush3.bf16.msra.mxu1 %v6510_v36  ;;  %4479 = vmatprep.mubr.msk.f32.mxu1 %vm6010_vm0, %v7920_v14 }
 0x208   :  { %5191 = vmatprep.subr.bf16.mxu1 %v7925_v1  ;;  %v5222_v8 = vpack.c.bf16 %v7964_v54, %v7963_v35  ;;  %v5231_v43 = vpack.c.bf16 %v7970_v58, %v7969_v42  ;;  %v1492_v35 = vld [vmem:[#allocation10 + $0xe0] sm:$0xff]  ;;  %v1494_v54 = vld [vmem:[#allocation10 + $0xf0] sm:$0xff]  ;;  %v1631_v58 = vsub.f32 %v6692_v9, %v7843_v27 }
 0x209   :  { %v1566_v23 = vand.u32 4294901760, %v1492_v35 }
 0x20a   :  { %v1632_v15 = vand.u32 4294901760, %v1631_v58  ;;  %v6915_v58 = vsub.f32 %v1491_v34, %v1560_v61  ;;  %v7850_v34 = vand.u32 4294901760, %v6717_v51 }
 0x20b   :  { %5193 = vmatpush3.bf16.msra.mxu1 %v6520_v49 }
 0x20c   :  { %5194 = vmatprep.subr.bf16.mxu1 %v7925_v1  ;;  %7984 = vst [vmem:[#allocation45_spill] sm:$0xff] %v6915_v58 }
 0x20f   :  { %5196 = vmatpush3.bf16.msra.mxu1 %v6531_v56 }
 0x210   :  { %5197 = vmatprep.subr.bf16.mxu1 %v7925_v1 }
 0x213   :  { %5199 = vmatpush3.bf16.msra.mxu1 %v6539_v2 }
 0x214   :  { %5200 = vmatprep.subr.bf16.mxu1 %v7925_v1 }
 0x217   :  { %5202 = vmatpush3.bf16.msra.mxu1 %v6544_v7 }
 0x218   :  { %5203 = vmatprep.subr.bf16.mxu1 %v7925_v1 }
 0x21b   :  { %5205 = vmatpush3.bf16.msra.mxu1 %v6548_v25 }
 0x21c   :  { %5206 = vmatprep.subr.bf16.mxu1 %v7925_v1 }
 0x21f   :  { %5208 = vmatpush3.bf16.msra.mxu1 %v6552_v45 }
 0x220   :  { %5209 = vmatprep.subr.bf16.mxu1 %v7925_v1 }
 0x223   :  { %5211 = vmatpush3.bf16.msra.mxu1 %v6558_v57 }
 0x224   :  { %5212 = vmatprep.subr.bf16.mxu1 %v7925_v1 }
 0x226   :  { %4480 = vmatmul.mubr.f32.vlgmr.msra.gmra.mrb[2].mxu1 %v7958_v3  ;;  %v1562_v3 = vand.u32 4294901760, %v1490_v11 }
 0x227   :  { %5214 = vmatpush3.bf16.msra.mxu1 %v5213_v5  ;;  %4514 = vmatprep.mubr.msk.f32.mxu1 %vm6010_vm0, %v7920_v14 }
 0x228   :  { %5215 = vmatprep.subr.bf16.mxu1 %v7925_v1 }
 0x22b   :  { %5217 = vmatpush3.bf16.msra.mxu1 %v5216_v30  ;;  %v1493_v30 = vld [vmem:[#allocation10 + $0xe8] sm:$0xff] }
 0x22c   :  { %5218 = vmatprep.subr.bf16.mxu1 %v7925_v1  ;;  %v1564_v59 = vand.u32 4294901760, %v1493_v30 }
 0x22f   :  { %5220 = vmatpush3.bf16.msra.mxu1 %v5219_v63  ;;  %v1568_v63 = vand.u32 4294901760, %v1495_v39 }
 0x230   :  { %5221 = vmatprep.subr.bf16.mxu1 %v7925_v1 }
 0x233   :  { %5223 = vmatpush3.bf16.msra.mxu1 %v5222_v8  ;;  %v7840_v8 = vand.u32 4294901760, %v6690_v55 }
 0x234   :  { %5224 = vmatprep.subr.bf16.mxu1 %v7925_v1 }
 0x235   :  { %v1619_v42 = vsub.f32 %v6690_v55, %v7840_v8 }
 0x237   :  { %5226 = vmatpush3.bf16.msra.mxu1 %v5225_v60  ;;  %v1570_v60 = vand.u32 4294901760, %v1494_v54  ;;  %v1620_v38 = vand.u32 4294901760, %v1619_v42 }
 0x238   :  { %5227 = vmatprep.subr.bf16.mxu1 %v7925_v1 }
 0x23b   :  { %5229 = vmatpush3.bf16.msra.mxu1 %v5228_v18  ;;  %v6887_v18 = vpack.c.bf16 %v1568_v63, %v1564_v59 }
 0x23c   :  { %5230 = vmatprep.subr.bf16.mxu1 %v7925_v1 }
 0x23d   :  { %7977 = vst [vmem:[#allocation38_spill] sm:$0xff] %v6887_v18 }
 0x23f   :  { %5232 = vmatpush3.bf16.msra.mxu1 %v5231_v43  ;;  %v6895_v43 = vpack.c.bf16 %v1570_v60, %v1566_v23 }
 0x240   :  { %5233 = vmatprep.subr.bf16.mxu1 %v7925_v1 }
 0x241   :  { %7978 = vst [vmem:[#allocation39_spill] sm:$0xff] %v6895_v43 }
 0x243   :  { %5235 = vmatpush3.bf16.msra.mxu1 %v5234_v4  ;;  %v1625_v4 = vsub.f32 %v6694_v50, %v7846_v53  ;;  %v6919_v53 = vsub.f32 %v1490_v11, %v1562_v3  ;;  %v7851_v11 = vand.u32 4294901760, %v6723_v62 }
 0x244   :  { %5236 = vmatprep.subr.bf16.mxu1 %v7925_v1 }
 0x245   :  { %7986 = vst [vmem:[#allocation47_spill] sm:$0xff] %v6919_v53 }
 0x246   :  { %4515 = vmatmul.mubr.f32.vlgmr.msra.gmra.mrb[2].mxu1 %v6663_v22 }
 0x247   :  { %5238 = vmatpush3.bf16.msra.mxu1 %v6510_v36  ;;  %4549 = vmatprep.mubr.msk.f32.mxu1 %vm6010_vm0, %v7920_v14  ;;  %v1485_v36 = vld [vmem:[#allocation10 + $0xa8] sm:$0xff] }
 0x248   :  { %5239 = vmatprep.subr.bf16.mxu1 %v7925_v1 }
 0x24b   :  { %5241 = vmatpush3.bf16.msra.mxu1 %v6520_v49  ;;  %v1487_v49 = vld [vmem:[#allocation10 + $0xb8] sm:$0xff] }
 0x24c   :  { %5242 = vmatprep.subr.bf16.mxu1 %v7925_v1 }
 0x24f   :  { %5244 = vmatpush3.bf16.msra.mxu1 %v6531_v56  ;;  %v1548_v56 = vand.u32 4294901760, %v1485_v36 }
 0x250   :  { %5245 = vmatprep.subr.bf16.mxu1 %v7925_v1 }
 0x253   :  { %5247 = vmatpush3.bf16.msra.mxu1 %v6539_v2  ;;  %v1552_v2 = vand.u32 4294901760, %v1487_v49 }
 0x254   :  { %5248 = vmatprep.subr.bf16.mxu1 %v7925_v1 }
 0x255   :  { %v6906_v8 = vsub.f32 %v1487_v49, %v1552_v2  ;;  %v6925_v49 = vsub.f32 %v1492_v35, %v1566_v23 }
 0x257   :  { %5250 = vmatpush3.bf16.msra.mxu1 %v6544_v7  ;;  %v1484_v7 = vld [vmem:[#allocation10 + $0xa0] sm:$0xff]  ;;  %7980 = vst [vmem:[#allocation41_spill] sm:$0xff] %v6906_v8 }
 0x258   :  { %5251 = vmatprep.subr.bf16.mxu1 %v7925_v1  ;;  %v1550_v29 = vand.u32 4294901760, %v1484_v7 }
 0x25b   :  { %5253 = vmatpush3.bf16.msra.mxu1 %v6548_v25  ;;  %v1486_v25 = vld [vmem:[#allocation10 + $0xb0] sm:$0xff] }
 0x25c   :  { %5254 = vmatprep.subr.bf16.mxu1 %v7925_v1  ;;  %v1554_v52 = vand.u32 4294901760, %v1486_v25 }
 0x25e   :  { %v6873_v48 = vpack.c.bf16 %v1554_v52, %v1550_v29  ;;  %v6910_v27 = vsub.f32 %v1486_v25, %v1554_v52  ;;  %v7859_v52 = vand.u32 4294901760, %v6708_v47 }
 0x25f   :  { %5256 = vmatpush3.bf16.msra.mxu1 %v6552_v45  ;;  %v6871_v45 = vpack.c.bf16 %v1552_v2, %v1548_v56  ;;  %v5292_v2 = vpack.c.bf16 %v1632_v15, %v1620_v38 }
 0x260   :  { %5257 = vmatprep.subr.bf16.mxu1 %v7925_v1  ;;  %7974 = vst [vmem:[#allocation35_spill] sm:$0xff] %v6873_v48  ;;  %7982 = vst [vmem:[#allocation43_spill] sm:$0xff] %v6910_v27 }
 0x261   :  { %7973 = vst [vmem:[#allocation34_spill] sm:$0xff] %v6871_v45  ;;  %5281 = vmatprep.subr.bf16.mxu0 %v6871_v45 }
 0x262   :  { %5283 = vmatpush1.bf16.msra.mxu0 %v6873_v48  ;;  %v6921_v48 = vsub.f32 %v1493_v30, %v1564_v59  ;;  %v1661_v30 = vsub.f32 %v6717_v51, %v7850_v34 }
 0x263   :  { %5259 = vmatpush3.bf16.msra.mxu1 %v6558_v57  ;;  %v1489_v57 = vld [vmem:[#allocation10 + $0xc8] sm:$0xff] }
 0x264   :  { %5452 = vmatprep.subr.bf16.mxu1 %v7925_v1  ;;  %v1556_v0 = vand.u32 4294901760, %v1489_v57  ;;  %v1637_v1 = vsub.f32 %v6698_v12, %v7866_v40  ;;  %v1662_v15 = vand.u32 4294901760, %v1661_v30 }
 0x266   :  { %4550 = vmatmul.mubr.f32.vlgmr.msra.gmra.mrb[2].mxu1 %v6663_v22  ;;  %v1488_v22 = vld [vmem:[#allocation10 + $0xc0] sm:$0xff]  ;;  %v6877_v10 = vpack.c.bf16 %v1560_v61, %v1556_v0  ;;  %v6913_v42 = vsub.f32 %v1489_v57, %v1556_v0  ;;  %v1638_v25 = vand.u32 4294901760, %v1637_v1  ;;  %v7853_v57 = vand.u32 4294901760, %v6715_v41 }
 0x267   :  { %4584 = vmatprep.mubr.msk.f32.mxu1 %vm6010_vm0, %v7920_v14  ;;  %v1558_v5 = vand.u32 4294901760, %v1488_v22  ;;  %v7849_v0 = vand.u32 4294901760, %v6719_v26  ;;  %v7852_v1 = vand.u32 4294901760, %v6727_v13 }
 0x268   :  { %7975 = vst [vmem:[#allocation36_spill] sm:$0xff] %v6877_v10  ;;  %5285 = vmatprep.subr.bf16.mxu0 %v6877_v10  ;;  %v6908_v10 = vsub.f32 %v1484_v7, %v1550_v29  ;;  %7983 = vst [vmem:[#allocation44_spill] sm:$0xff] %v6913_v42  ;;  %v1626_v7 = vand.u32 4294901760, %v1625_v4  ;;  %v7862_v29 = vand.u32 4294901760, %v6702_v24 }
 0x269   :  { %v6879_v17 = vpack.c.bf16 %v1562_v3, %v1558_v5  ;;  %v1649_v3 = vsub.f32 %v6715_v41, %v7853_v57  ;;  %v1673_v35 = vsub.f32 %v6727_v13, %v7852_v1  ;;  %v7855_v1 = vand.u32 4294901760, %v6741_v6 }
 0x26a   :  { %7981 = vst [vmem:[#allocation42_spill] sm:$0xff] %v6908_v10  ;;  %v6934_v61 = vpack.c.bf16 %v1638_v25, %v1626_v7  ;;  %v7856_v57 = vand.u32 4294901760, %v6743_v31 }
 0x26b   :  { %7976 = vst [vmem:[#allocation37_spill] sm:$0xff] %v6879_v17  ;;  %5287 = vmatpush1.bf16.msra.mxu0 %v6879_v17  ;;  %v6904_v17 = vsub.f32 %v1485_v36, %v1548_v56  ;;  %v6923_v36 = vsub.f32 %v1495_v39, %v1568_v63  ;;  %v6927_v56 = vsub.f32 %v1494_v54, %v1570_v60  ;;  %v7987_v54 = vld [vmem:[#allocation25_spill] sm:$0xff]  ;;  %v1650_v38 = vand.u32 4294901760, %v1649_v3 }
 0x26c   :  { %5289 = vmatprep.subr.bf16.mxu0 %v6887_v18  ;;  %v6917_v18 = vsub.f32 %v1488_v22, %v1558_v5  ;;  %v1643_v22 = vsub.f32 %v6702_v24, %v7862_v29  ;;  %v1655_v5 = vsub.f32 %v6708_v47, %v7859_v52  ;;  %v1667_v39 = vsub.f32 %v6719_v26, %v7849_v0 }
 0x26d   :  { %7979 = vst [vmem:[#allocation40_spill] sm:$0xff] %v6904_v17  ;;  %v1679_v63 = vsub.f32 %v6723_v62, %v7851_v11  ;;  %v7857_v23 = vand.u32 4294901760, %v7987_v54  ;;  %v1674_v7 = vand.u32 4294901760, %v1673_v35  ;;  %v6966_v11 = vpack.c.bf16 %v1662_v15, %v1650_v38 }
 0x26e   :  { %7985 = vst [vmem:[#allocation46_spill] sm:$0xff] %v6917_v18  ;;  %v1644_v59 = vand.u32 4294901760, %v1643_v22  ;;  %v1656_v60 = vand.u32 4294901760, %v1655_v5  ;;  %v1668_v4 = vand.u32 4294901760, %v1667_v39  ;;  %v7988_v22 = vld [vmem:[#allocation26_spill] sm:$0xff]  ;;  %v7858_v39 = vand.u32 4294901760, %v6745_v46 }
 0x26f   :  { %5291 = vmatpush1.bf16.msra.mxu0 %v6895_v43  ;;  %v1685_v25 = vsub.f32 %v7987_v54, %v7857_v23  ;;  %v7854_v0 = vand.u32 4294901760, %v7988_v22  ;;  %v7860_v35 = vand.u32 4294901760, %v6747_v28 }
 0x270   :  { %5293 = vmatprep.subr.bf16.mxu0 %v5292_v2  ;;  %v1680_v2 = vand.u32 4294901760, %v1679_v63  ;;  %v6964_v34 = vpack.c.bf16 %v1656_v60, %v1644_v59  ;;  %v1703_v59 = vsub.f32 %v6741_v6, %v7855_v1  ;;  %v1697_v63 = vsub.f32 %v6743_v31, %v7856_v57 }
 0x271   :  { %v1686_v3 = vand.u32 4294901760, %v1685_v25  ;;  %v1691_v30 = vsub.f32 %v7988_v22, %v7854_v0  ;;  %v7861_v60 = vand.u32 4294901760, %v6752_v33  ;;  %v1715_v1 = vsub.f32 %v6747_v28, %v7860_v35 }
 0x272   :  { %v6970_v5 = vpack.c.bf16 %v1680_v2, %v1668_v4  ;;  %v1709_v4 = vsub.f32 %v6745_v46, %v7858_v39  ;;  %v7865_v2 = vand.u32 4294901760, %v6754_v32  ;;  %v1704_v25 = vand.u32 4294901760, %v1703_v59 }
 0x273   :  { %v6984_v38 = vpack.c.bf16 %v1686_v3, %v1674_v7  ;;  %v1692_v15 = vand.u32 4294901760, %v1691_v30  ;;  %v1698_v0 = vand.u32 4294901760, %v1697_v63  ;;  %v1727_v57 = vsub.f32 %v6752_v33, %v7861_v60 }
 0x274   :  { %v1710_v23 = vand.u32 4294901760, %v1709_v4  ;;  %v1721_v7 = vsub.f32 %v6754_v32, %v7865_v2  ;;  %v7864_v3 = vand.u32 4294901760, %v6756_v37  ;;  %v1716_v39 = vand.u32 4294901760, %v1715_v1 }
 0x275   :  { %v7000_v30 = vpack.c.bf16 %v1704_v25, %v1692_v15  ;;  %v1728_v59 = vand.u32 4294901760, %v1727_v57  ;;  %v7863_v63 = vand.u32 4294901760, %v6904_v17  ;;  %v7867_v4 = vand.u32 4294901760, %v6906_v8 }
 0x276   :  { %v7003_v52 = vpack.c.bf16 %v1710_v23, %v1698_v0  ;;  %v1722_v35 = vand.u32 4294901760, %v1721_v7  ;;  %v1733_v60 = vsub.f32 %v6756_v37, %v7864_v3  ;;  %v7868_v1 = vand.u32 4294901760, %v6908_v10 }
 0x277   :  { %v7009_v29 = vpack.c.bf16 %v1728_v59, %v1716_v39  ;;  %v1739_v15 = vsub.f32 %v6904_v17, %v7863_v63  ;;  %v7871_v57 = vand.u32 4294901760, %v6910_v27  ;;  %v1751_v0 = vsub.f32 %v6906_v8, %v7867_v4 }
 0x278   :  { %v1734_v25 = vand.u32 4294901760, %v1733_v60  ;;  %v1745_v7 = vsub.f32 %v6908_v10, %v7868_v1  ;;  %v7872_v59 = vand.u32 4294901760, %v6913_v42  ;;  %v7877_v60 = vand.u32 4294901760, %v6915_v58 }
 0x279   :  { %v1740_v23 = vand.u32 4294901760, %v1739_v15  ;;  %v1757_v39 = vsub.f32 %v6910_v27, %v7871_v57  ;;  %v1752_v3 = vand.u32 4294901760, %v1751_v0  ;;  %v7879_v2 = vand.u32 4294901760, %v6917_v18 }
 0x27a   :  { %v7026_v63 = vpack.c.bf16 %v1734_v25, %v1722_v35  ;;  %v1746_v40 = vand.u32 4294901760, %v1745_v7  ;;  %v1763_v15 = vsub.f32 %v6913_v42, %v7872_v59  ;;  %v7878_v1 = vand.u32 4294901760, %v6919_v53 }
 0x27b   :  { %v1758_v4 = vand.u32 4294901760, %v1757_v39  ;;  %v5312_v43 = vpack.c.bf16 %v1752_v3, %v1740_v23  ;;  %v1775_v57 = vsub.f32 %v6915_v58, %v7877_v60  ;;  %v1769_v35 = vsub.f32 %v6917_v18, %v7879_v2 }
 0x27c   :  { %v1764_v0 = vand.u32 4294901760, %v1763_v15  ;;  %v1781_v7 = vsub.f32 %v6919_v53, %v7878_v1  ;;  %v7882_v39 = vand.u32 4294901760, %v6921_v48  ;;  %v7889_v3 = vand.u32 4294901760, %v6923_v36 }
 0x27d   :  { %v5314_v25 = vpack.c.bf16 %v1758_v4, %v1746_v40  ;;  %v1776_v59 = vand.u32 4294901760, %v1775_v57  ;;  %v1770_v45 = vand.u32 4294901760, %v1769_v35  ;;  %v7887_v23 = vand.u32 4294901760, %v6925_v49 }
 0x27e   :  { %v1782_v44 = vand.u32 4294901760, %v1781_v7  ;;  %v1787_v60 = vsub.f32 %v6921_v48, %v7882_v39  ;;  %v7888_v40 = vand.u32 4294901760, %v6927_v56  ;;  %v1799_v15 = vsub.f32 %v6923_v36, %v7889_v3 }
 0x27f   :  { %v5316_v4 = vpack.c.bf16 %v1776_v59, %v1764_v0  ;;  %v1793_v57 = vsub.f32 %v6925_v49, %v7887_v23  ;;  %v5324_v59 = vpack.c.bf16 %v6692_v9, %v6690_v55  ;;  %v5326_v0 = vpack.c.bf16 %v6698_v12, %v6694_v50 }
 0x280   :  { %v5318_v35 = vpack.c.bf16 %v1782_v44, %v1770_v45  ;;  %v1788_v1 = vand.u32 4294901760, %v1787_v60  ;;  %v1805_v7 = vsub.f32 %v6927_v56, %v7888_v40  ;;  %v1800_v2 = vand.u32 4294901760, %v1799_v15 }
 0x281   :  { %v1794_v20 = vand.u32 4294901760, %v1793_v57  ;;  %v5328_v23 = vpack.c.bf16 %v6708_v47, %v6702_v24  ;;  %v5330_v44 = vpack.c.bf16 %v6717_v51, %v6715_v41  ;;  %v5332_v45 = vpack.c.bf16 %v6723_v62, %v6719_v26 }
 0x282   :  { %v1806_v39 = vand.u32 4294901760, %v1805_v7  ;;  %v5320_v19 = vpack.c.bf16 %v1800_v2, %v1788_v1  ;;  %v5334_v60 = vpack.c.bf16 %v7987_v54, %v6727_v13  ;;  %v5338_v2 = vpack.c.bf16 %v6745_v46, %v6743_v31 }
 0x283   :  { %v5340_v1 = vpack.c.bf16 %v6752_v33, %v6747_v28  ;;  %v5344_v15 = vpack.c.bf16 %v6906_v8, %v6904_v17  ;;  %v5346_v57 = vpack.c.bf16 %v6910_v27, %v6908_v10  ;;  %v5348_v7 = vpack.c.bf16 %v6915_v58, %v6913_v42 }
 0x284   :  { %v5322_v21 = vpack.c.bf16 %v1806_v39, %v1794_v20  ;;  %v5336_v20 = vpack.c.bf16 %v6741_v6, %v7988_v22  ;;  %v5342_v39 = vpack.c.bf16 %v6756_v37, %v6754_v32  ;;  %v5350_v40 = vpack.c.bf16 %v6919_v53, %v6917_v18  ;;  %v3721_v37 = vld [vmem:[%s7781_s5] ss:$0 sm:$0xff] }
 0x285   :  { %v5352_v3 = vpack.c.bf16 %v6923_v36, %v6921_v48  ;;  %v5354_v33 = vpack.c.bf16 %v6927_v56, %v6925_v49 }
 0x339   :  { %v1459_v8 = vpop.f32.mrb[2].mxu1 }
 0x33a   :  { %v5742_v17 = vadd.f32 %v3721_v37, %v1459_v8  ;;  %v4551_v32 = vpop.f32.mrb[3].mxu1  ;;  %v7989_v37 = vld [vmem:[#allocation20_spill] sm:$0xff]  ;;  %v7994_v8 = vld [vmem:[#allocation27_spill] sm:$0xff] }
 0x33b   :  { %v7990_v32 = vld [vmem:[#allocation21_spill] sm:$0xff] }
 0x33c   :  { %v1463_v27 = vmax.f32 %v5742_v17, 0.0  ;;  %v7993_v17 = vld [vmem:[#allocation24_spill] sm:$0xff] }
 0x33e   :  { %v7094_v10 = vand.u32 4294901760, %v1463_v27 }
 0x340   :  { %v1606_v58 = vsub.f32 %v1463_v27, %v7094_v10  ;;  %v7995_v27 = vld [vmem:[#allocation31_spill] sm:$0xff] }
 0x342   :  { %v1607_v42 = vand.u32 4294901760, %v1606_v58 }
 0x344   :  { %v1608_v53 = vsub.f32 %v1606_v58, %v1607_v42 }
 0x346   :  { %v1609_v18 = vand.u32 4294901760, %v1608_v53  ;;  %v7997_v53 = vld [vmem:[#allocation33_spill] sm:$0xff] }
 0x348   :  { %1610 = vmatmul.mubr.f32.vlgmr.msra.gmra.mrb[2].mxu0 %v1609_v18  ;;  %v7998_v18 = vld [vmem:[#allocation34_spill] sm:$0xff] }
 0x349   :  { %5295 = vmatpush1.bf16.msra.mxu0 %v6934_v61  ;;  %1840 = vmatprep.mubr.f32.mxu0 %v7920_v14  ;;  %v8004_v61 = vand.u32 4294901760, %v6692_v9  ;;  %v8011_v9 = vand.u32 4294901760, %v6717_v51  ;;  %v8017_v51 = vand.u32 4294901760, %v6741_v6  ;;  %v8027_v6 = vld [vmem:[#allocation40_spill] sm:$0xff] }
 0x34a   :  { %5297 = vmatprep.subr.bf16.mxu0 %v6964_v34  ;;  %v8003_v34 = vand.u32 4294901760, %v6690_v55  ;;  %v8010_v55 = vand.u32 4294901760, %v6715_v41  ;;  %v8016_v41 = vand.u32 4294901760, %v7988_v22 }
 0x34d   :  { %5299 = vmatpush1.bf16.msra.mxu0 %v6966_v11  ;;  %v5388_v11 = vpack.c.bf16 %v8004_v61, %v8003_v34  ;;  %v8035_v61 = vld [vmem:[#allocation44_spill] sm:$0xff] }
 0x34e   :  { %5301 = vmatprep.subr.bf16.mxu0 %v6970_v5  ;;  %v8005_v5 = vld [vmem:[#allocation39_spill] sm:$0xff] }
 0x351   :  { %5303 = vmatpush1.bf16.msra.mxu0 %v6984_v38  ;;  %v8006_v38 = vand.u32 4294901760, %v6694_v50  ;;  %v8012_v50 = vand.u32 4294901760, %v6719_v26  ;;  %v8019_v26 = vand.u32 4294901760, %v6745_v46  ;;  %v8031_v46 = vld [vmem:[#allocation42_spill] sm:$0xff] }
 0x352   :  { %5305 = vmatprep.subr.bf16.mxu0 %v7000_v30  ;;  %v8007_v30 = vand.u32 4294901760, %v6698_v12  ;;  %v8013_v12 = vand.u32 4294901760, %v6723_v62  ;;  %v8020_v62 = vand.u32 4294901760, %v6747_v28 }
 0x355   :  { %5307 = vmatpush1.bf16.msra.mxu0 %v7003_v52  ;;  %v8002_v52 = vld [vmem:[#allocation38_spill] sm:$0xff] }
 0x356   :  { %5309 = vmatprep.subr.bf16.mxu0 %v7009_v29  ;;  %v8001_v29 = vld [vmem:[#allocation37_spill] sm:$0xff] }
 0x359   :  { %5311 = vmatpush1.bf16.msra.mxu0 %v7026_v63  ;;  %v5390_v63 = vpack.c.bf16 %v8007_v30, %v8006_v38  ;;  %v8037_v38 = vld [vmem:[#allocation45_spill] sm:$0xff] }
 0x35a   :  { %5313 = vmatprep.subr.bf16.mxu0 %v5312_v43  ;;  %v7999_v43 = vld [vmem:[#allocation35_spill] sm:$0xff]  ;;  %v8038_v30 = vand.u32 4294901760, %v8037_v38 }
 0x35d   :  { %5315 = vmatpush1.bf16.msra.mxu0 %v5314_v25  ;;  %v8008_v25 = vand.u32 4294901760, %v6702_v24  ;;  %v8014_v24 = vand.u32 4294901760, %v6727_v13 }
 0x35e   :  { %5317 = vmatprep.subr.bf16.mxu0 %v5316_v4  ;;  %v5396_v4 = vpack.c.bf16 %v8013_v12, %v8012_v50  ;;  %v8044_v50 = vand.u32 4294901760, %v6923_v36  ;;  %v2370_v36 = vld [vmem:[#allocation11 + $0x8] sm:$0xff] }
 0x361   :  { %5319 = vmatpush1.bf16.msra.mxu0 %v5318_v35  ;;  %v5400_v35 = vpack.c.bf16 %v8017_v51, %v8016_v41  ;;  %v2378_v41 = vld [vmem:[#allocation11 + $0x48] sm:$0xff] }
 0x362   :  { %5321 = vmatprep.subr.bf16.mxu0 %v5320_v19  ;;  %v7992_v19 = vld [vmem:[#allocation23_spill] sm:$0xff] }
 0x365   :  { %5323 = vmatpush1.bf16.msra.mxu0 %v5322_v21  ;;  %v7991_v21 = vld [vmem:[#allocation22_spill] sm:$0xff] }
 0x366   :  { %5325 = vmatprep.subr.bf16.mxu0 %v5324_v59  ;;  %v8018_v59 = vand.u32 4294901760, %v6743_v31 }
 0x368   :  { %1842 = vmatmul.mubr.f32.vlgmr.msra.gmra.mrb[2].mxu0 %v7094_v10 }
 0x369   :  { %5327 = vmatpush1.bf16.msra.mxu0 %v5326_v0  ;;  %1976 = vmatprep.mubr.f32.mxu0 %v7920_v14  ;;  %v5402_v0 = vpack.c.bf16 %v8019_v26, %v8018_v59  ;;  %v2379_v26 = vld [vmem:[#allocation11 + $0x50] sm:$0xff] }
 0x36a   :  { %5329 = vmatprep.subr.bf16.mxu0 %v5328_v23 }
 0x36d   :  { %5331 = vmatpush1.bf16.msra.mxu0 %v5330_v44  ;;  %v8021_v44 = vld [vmem:[#allocation28_spill] sm:$0xff] }
 0x36e   :  { %5333 = vmatprep.subr.bf16.mxu0 %v5332_v45  ;;  %v8022_v13 = vand.u32 4294901760, %v8021_v44 }
 0x370   :  { %v5404_v45 = vpack.c.bf16 %v8022_v13, %v8020_v62  ;;  %v2423_v62 = vand.u32 4294901760, %v2379_v26 }
 0x371   :  { %5335 = vmatpush1.bf16.msra.mxu0 %v5334_v60 }
 0x372   :  { %5337 = vmatprep.subr.bf16.mxu0 %v5336_v20  ;;  %v8025_v20 = vld [vmem:[#allocation30_spill] sm:$0xff] }
 0x373   :  { %v8026_v22 = vand.u32 4294901760, %v8025_v20 }
 0x375   :  { %5339 = vmatpush1.bf16.msra.mxu0 %v5338_v2 }
 0x376   :  { %5341 = vmatprep.subr.bf16.mxu0 %v5340_v1  ;;  %v8028_v1 = vand.u32 4294901760, %v8027_v6 }
 0x379   :  { %5343 = vmatpush1.bf16.msra.mxu0 %v5342_v39  ;;  %v8029_v39 = vld [vmem:[#allocation41_spill] sm:$0xff] }
 0x37a   :  { %5345 = vmatprep.subr.bf16.mxu0 %v5344_v15  ;;  %v8030_v31 = vand.u32 4294901760, %v8029_v39  ;;  %v2383_v39 = vld [vmem:[#allocation11 + $0x70] sm:$0xff] }
 0x37c   :  { %v5408_v15 = vpack.c.bf16 %v8030_v31, %v8028_v1 }
 0x37d   :  { %5347 = vmatpush1.bf16.msra.mxu0 %v5346_v57  ;;  %v8032_v57 = vand.u32 4294901760, %v8031_v46 }
 0x37e   :  { %5349 = vmatprep.subr.bf16.mxu0 %v5348_v7  ;;  %v8033_v7 = vld [vmem:[#allocation43_spill] sm:$0xff] }
 0x37f   :  { %v8034_v28 = vand.u32 4294901760, %v8033_v7  ;;  %v2384_v7 = vld [vmem:[#allocation11 + $0x78] sm:$0xff] }
 0x381   :  { %5351 = vmatpush1.bf16.msra.mxu0 %v5350_v40  ;;  %v5394_v40 = vpack.c.bf16 %v8011_v9, %v8010_v55  ;;  %v5410_v34 = vpack.c.bf16 %v8034_v28, %v8032_v57 }
 0x382   :  { %5353 = vmatprep.subr.bf16.mxu0 %v5352_v3  ;;  %v8009_v3 = vand.u32 4294901760, %v6708_v47  ;;  %v8015_v47 = vand.u32 4294901760, %v7987_v54  ;;  %v8023_v54 = vld [vmem:[#allocation29_spill] sm:$0xff] }
 0x383   :  { %v8024_v60 = vand.u32 4294901760, %v8023_v54  ;;  %v2382_v54 = vld [vmem:[#allocation11 + $0x68] sm:$0xff] }
 0x384   :  { %v5392_v23 = vpack.c.bf16 %v8009_v3, %v8008_v25  ;;  %v8039_v25 = vld [vmem:[#allocation46_spill] sm:$0xff]  ;;  %v2432_v20 = vand.u32 4294901760, %v2382_v54 }
 0x385   :  { %5355 = vmatpush1.bf16.msra.mxu0 %v5354_v33  ;;  %v7996_v33 = vld [vmem:[#allocation32_spill] sm:$0xff]  ;;  %v5406_v2 = vpack.c.bf16 %v8026_v22, %v8024_v60  ;;  %v8040_v3 = vand.u32 4294901760, %v8039_v25  ;;  %v2435_v25 = vand.u32 4294901760, %v2383_v39 }
 0x386   :  { %5357 = vmatprep.subr.bf16.mxu0 %v7989_v37 }
 0x388   :  { %1979 = vmatmul.mubr.f32.vlgmr.msra.gmra.mrb[2].mxu0 %v1606_v58  ;;  %v8000_v58 = vld [vmem:[#allocation36_spill] sm:$0xff] }
 0x389   :  { %5359 = vmatpush1.bf16.msra.mxu0 %v7990_v32  ;;  %2081 = vmatprep.mubr.f32.mxu0 %v7920_v14 }
 0x38a   :  { %5361 = vmatprep.subr.bf16.mxu0 %v7991_v21 }
 0x38d   :  { %5363 = vmatpush1.bf16.msra.mxu0 %v7992_v19 }
 0x38e   :  { %5365 = vmatprep.subr.bf16.mxu0 %v7993_v17 }
 0x391   :  { %5367 = vmatpush1.bf16.msra.mxu0 %v6725_v16 }
 0x392   :  { %5369 = vmatprep.subr.bf16.mxu0 %v7994_v8 }
 0x395   :  { %5371 = vmatpush1.bf16.msra.mxu0 %v7995_v27 }
 0x396   :  { %5373 = vmatprep.subr.bf16.mxu0 %v7996_v33 }
 0x399   :  { %5375 = vmatpush1.bf16.msra.mxu0 %v7997_v53 }
 0x39a   :  { %5377 = vmatprep.subr.bf16.mxu0 %v7998_v18 }
 0x39d   :  { %5379 = vmatpush1.bf16.msra.mxu0 %v7999_v43 }
 0x39e   :  { %5381 = vmatprep.subr.bf16.mxu0 %v8000_v58 }
 0x3a1   :  { %5383 = vmatpush1.bf16.msra.mxu0 %v8001_v29 }
 0x3a2   :  { %5385 = vmatprep.subr.bf16.mxu0 %v8002_v52 }
 0x3a5   :  { %5387 = vmatpush1.bf16.msra.mxu0 %v8005_v5 }
 0x3a6   :  { %5389 = vmatprep.subr.bf16.mxu0 %v5388_v11  ;;  %v8036_v11 = vand.u32 4294901760, %v8035_v61  ;;  %v7257_v61 = vsub.f32 %v2379_v26, %v2423_v62 }
 0x3a8   :  { %2085 = vmatmul.mubr.f32.vlgmr.msra.gmra.mrb[2].mxu0 %v1607_v42  ;;  %v5398_v42 = vpack.c.bf16 %v8015_v47, %v8014_v24  ;;  %v8046_v24 = vand.u32 4294901760, %v6927_v56  ;;  %v2396_v56 = vand.u32 4294901760, %v2370_v36 }
 0x3a9   :  { %5391 = vmatpush1.bf16.msra.mxu0 %v5390_v63  ;;  %2251 = vmatprep.mubr.f32.mxu0 %v7920_v14  ;;  %v5412_v63 = vpack.c.bf16 %v8038_v30, %v8036_v11 }
 0x3aa   :  { %5393 = vmatprep.subr.bf16.mxu0 %v5392_v23  ;;  %v8041_v23 = vld [vmem:[#allocation47_spill] sm:$0xff] }
 0x3ab   :  { %v8042_v55 = vand.u32 4294901760, %v8041_v23 }
 0x3ad   :  { %5395 = vmatpush1.bf16.msra.mxu0 %v5394_v40  ;;  %v5414_v9 = vpack.c.bf16 %v8042_v55, %v8040_v3  ;;  %v8043_v40 = vand.u32 4294901760, %v6921_v48  ;;  %v2369_v48 = vld [vmem:[#allocation11] sm:$0xff]  ;;  %v2438_v3 = vand.u32 4294901760, %v2384_v7 }
 0x3ae   :  { %5397 = vmatprep.subr.bf16.mxu0 %v5396_v4  ;;  %v8045_v4 = vand.u32 4294901760, %v6925_v49  ;;  %v2393_v49 = vand.u32 4294901760, %v2369_v48 }
 0x3af   :  { %v5416_v12 = vpack.c.bf16 %v8044_v50, %v8043_v40  ;;  %v7273_v40 = vpack.c.bf16 %v2438_v3, %v2435_v25  ;;  %v7275_v50 = vsub.f32 %v2384_v7, %v2438_v3 }
 0x3b0   :  { %v5418_v47 = vpack.c.bf16 %v8046_v24, %v8045_v4  ;;  %v7237_v22 = vsub.f32 %v2369_v48, %v2393_v49 }
 0x3b1   :  { %5399 = vmatpush1.bf16.msra.mxu0 %v5398_v42  ;;  %v2377_v42 = vld [vmem:[#allocation11 + $0x40] sm:$0xff] }
 0x3b2   :  { %5401 = vmatprep.subr.bf16.mxu0 %v5400_v35  ;;  %v2417_v51 = vand.u32 4294901760, %v2377_v42  ;;  %v2420_v35 = vand.u32 4294901760, %v2378_v41  ;;  %v2486_v23 = vand.u32 4294901760, %v7237_v22 }
 0x3b4   :  { %v7229_v59 = vpack.c.bf16 %v2420_v35, %v2417_v51  ;;  %v7253_v28 = vsub.f32 %v2377_v42, %v2417_v51 }
 0x3b5   :  { %5403 = vmatpush1.bf16.msra.mxu0 %v5402_v0  ;;  %v2380_v0 = vld [vmem:[#allocation11 + $0x58] sm:$0xff] }
 0x3b6   :  { %5405 = vmatprep.subr.bf16.mxu0 %v5404_v45  ;;  %v2426_v44 = vand.u32 4294901760, %v2380_v0  ;;  %v2381_v45 = vld [vmem:[#allocation11 + $0x60] sm:$0xff] }
 0x3b7   :  { %v2429_v60 = vand.u32 4294901760, %v2381_v45 }
 0x3b8   :  { %v7233_v13 = vpack.c.bf16 %v2426_v44, %v2423_v62  ;;  %v7259_v11 = vsub.f32 %v2380_v0, %v2426_v44  ;;  %v7908_v0 = vand.u32 4294901760, %v7253_v28 }
 0x3b9   :  { %5407 = vmatpush1.bf16.msra.mxu0 %v5406_v2  ;;  %v7239_v2 = vsub.f32 %v2370_v36, %v2396_v56  ;;  %v7261_v38 = vpack.c.bf16 %v2432_v20, %v2429_v60  ;;  %v7263_v30 = vsub.f32 %v2381_v45, %v2429_v60 }
 0x3ba   :  { %5409 = vmatprep.subr.bf16.mxu0 %v5408_v15  ;;  %v2543_v45 = vsub.f32 %v7253_v28, %v7908_v0  ;;  %v7905_v7 = vand.u32 4294901760, %v7259_v11  ;;  %v2363_v0 = vld [vmem:[#allocation5] sm:$0xff] }
 0x3bb   :  { %v2493_v55 = vand.u32 4294901760, %v7239_v2 }
 0x3bc   :  { %v2544_v60 = vand.u32 4294901760, %v2543_v45 }
 0x3bd   :  { %5411 = vmatpush1.bf16.msra.mxu0 %v5410_v34  ;;  %v7255_v34 = vsub.f32 %v2378_v41, %v2420_v35  ;;  %v2494_v4 = vsub.f32 %v7239_v2, %v2493_v55 }
 0x3be   :  { %5413 = vmatprep.subr.bf16.mxu0 %v5412_v63  ;;  %v7265_v63 = vsub.f32 %v2382_v54, %v2432_v20 }
 0x3bf   :  { %v2495_v36 = vand.u32 4294901760, %v2494_v4  ;;  %v7907_v62 = vand.u32 4294901760, %v7255_v34 }
 0x3c1   :  { %5415 = vmatpush1.bf16.msra.mxu0 %v5414_v9  ;;  %v7270_v9 = vsub.f32 %v2383_v39, %v2435_v25  ;;  %v2550_v54 = vsub.f32 %v7255_v34, %v7907_v62  ;;  %v7906_v39 = vand.u32 4294901760, %v7257_v61 }
 0x3c2   :  { %5417 = vmatprep.subr.bf16.mxu0 %v5416_v12  ;;  %v2487_v12 = vsub.f32 %v7237_v22, %v2486_v23 }
 0x3c3   :  { %v2551_v20 = vand.u32 4294901760, %v2550_v54  ;;  %v2557_v3 = vsub.f32 %v7257_v61, %v7906_v39 }
 0x3c4   :  { %v2488_v48 = vand.u32 4294901760, %v2487_v12  ;;  %v2564_v12 = vsub.f32 %v7259_v11, %v7905_v7 }
 0x3c5   :  { %5419 = vmatpush1.bf16.msra.mxu0 %v5418_v47  ;;  %v7327_v25 = vpack.c.bf16 %v2551_v20, %v2544_v60  ;;  %v2558_v4 = vand.u32 4294901760, %v2557_v3  ;;  %v5501_v60 = vpack.c.bf16 %v7239_v2, %v7237_v22 }
 0x3c6   :  { %5421 = vmatprep.subr.bf16.mxu0 %v7989_v37  ;;  %v7213_v37 = vpack.c.bf16 %v2396_v56, %v2393_v49 }
 0x3c8   :  { %2253 = vmatmul.mubr.f32.vlgmr.msra.gmra.mrb[2].mxu0 %v7094_v10  ;;  %5454 = vmatpush3.bf16.msra.mxu1 %v7213_v37 }
 0x3c9   :  { %5423 = vmatpush1.bf16.msra.mxu0 %v7990_v32  ;;  %2355 = vmatprep.mubr.f32.mxu0 %v7920_v14  ;;  %v2371_v32 = vld [vmem:[#allocation11 + $0x10] sm:$0xff] }
 0x3ca   :  { %5425 = vmatprep.subr.bf16.mxu0 %v7991_v21  ;;  %v2372_v21 = vld [vmem:[#allocation11 + $0x18] sm:$0xff] }
 0x3cd   :  { %5427 = vmatpush1.bf16.msra.mxu0 %v7992_v19  ;;  %v2399_v19 = vand.u32 4294901760, %v2371_v32 }
 0x3ce   :  { %5429 = vmatprep.subr.bf16.mxu0 %v7993_v17  ;;  %v2402_v17 = vand.u32 4294901760, %v2372_v21 }
 0x3cf   :  { %v7241_v6 = vsub.f32 %v2371_v32, %v2399_v19  ;;  %v7293_v32 = vpack.c.bf16 %v2495_v36, %v2488_v48  ;;  %v2565_v48 = vand.u32 4294901760, %v2564_v12  ;;  %v7904_v36 = vand.u32 4294901760, %v7263_v30 }
 0x3d0   :  { %v7243_v1 = vsub.f32 %v2372_v21, %v2402_v17 }
 0x3d1   :  { %5431 = vmatpush1.bf16.msra.mxu0 %v6725_v16  ;;  %v8047_v16 = vmov 0.0|0.0   ;;  %v2500_v24 = vand.u32 4294901760, %v7241_v6 }
 0x3d2   :  { %5433 = vmatprep.subr.bf16.mxu0 %v7994_v8  ;;  %5455 = vmatprep.subr.bf16.mxu1 %v8047_v16  ;;  %v7217_v8 = vpack.c.bf16 %v2402_v17, %v2399_v19  ;;  %v2507_v47 = vand.u32 4294901760, %v7243_v1  ;;  %v5504_v20 = vpack.c.bf16 %v7243_v1, %v7241_v6 }
 0x3d3   :  { %v2501_v49 = vsub.f32 %v7241_v6, %v2500_v24 }
 0x3d4   :  { %5457 = vmatpush3.bf16.msra.mxu1 %v7217_v8  ;;  %v2508_v56 = vsub.f32 %v7243_v1, %v2507_v47 }
 0x3d5   :  { %5435 = vmatpush1.bf16.msra.mxu0 %v7995_v27  ;;  %v2374_v27 = vld [vmem:[#allocation11 + $0x28] sm:$0xff]  ;;  %5458 = vmatprep.subr.bf16.mxu1 %v8047_v16  ;;  %v2502_v21 = vand.u32 4294901760, %v2501_v49  ;;  %v7903_v49 = vand.u32 4294901760, %v7265_v63 }
 0x3d6   :  { %5437 = vmatprep.subr.bf16.mxu0 %v7996_v33  ;;  %v2509_v19 = vand.u32 4294901760, %v2508_v56  ;;  %v5492_v56 = vpack.c.bf16 %v2565_v48, %v2558_v4  ;;  %v5513_v4 = vpack.c.bf16 %v7255_v34, %v7253_v28  ;;  %v5516_v48 = vpack.c.bf16 %v7259_v11, %v7257_v61 }
 0x3d9   :  { %5439 = vmatpush1.bf16.msra.mxu0 %v7997_v53  ;;  %v2408_v53 = vand.u32 4294901760, %v2374_v27 }
 0x3da   :  { %5441 = vmatprep.subr.bf16.mxu0 %v7998_v18 }
 0x3db   :  { %v7247_v15 = vsub.f32 %v2374_v27, %v2408_v53  ;;  %v7297_v27 = vpack.c.bf16 %v2509_v19, %v2502_v21  ;;  %v2571_v21 = vsub.f32 %v7263_v30, %v7904_v36  ;;  %v2578_v19 = vsub.f32 %v7265_v63, %v7903_v49 }
 0x3dd   :  { %5443 = vmatpush1.bf16.msra.mxu0 %v7999_v43  ;;  %v2375_v43 = vld [vmem:[#allocation11 + $0x30] sm:$0xff]  ;;  %v8049_v2 = vand.u32 4294901760, %v7247_v15 }
 0x3de   :  { %5445 = vmatprep.subr.bf16.mxu0 %v8000_v58  ;;  %v2376_v58 = vld [vmem:[#allocation11 + $0x38] sm:$0xff] }
 0x3e1   :  { %5447 = vmatpush1.bf16.msra.mxu0 %v8001_v29  ;;  %v2411_v29 = vand.u32 4294901760, %v2375_v43 }
 0x3e2   :  { %5449 = vmatprep.subr.bf16.mxu0 %v8002_v52  ;;  %v2414_v52 = vand.u32 4294901760, %v2376_v58 }
 0x3e3   :  { %v7249_v46 = vsub.f32 %v2375_v43, %v2411_v29 }
 0x3e4   :  { %v7251_v57 = vsub.f32 %v2376_v58, %v2414_v52 }
 0x3e5   :  { %5451 = vmatpush1.bf16.msra.mxu0 %v8005_v5  ;;  %v7225_v5 = vpack.c.bf16 %v2414_v52, %v2411_v29  ;;  %v7910_v29 = vand.u32 4294901760, %v7249_v46 }
 0x3e6   :  { %5596 = vmatprep.subr.bf16.mxu0 %v8047_v16  ;;  %v7909_v52 = vand.u32 4294901760, %v7251_v57  ;;  %v5510_v12 = vpack.c.bf16 %v7251_v57, %v7249_v46  ;;  %v8051_v6 = vand.u32 4294901760, %v7251_v57 }
 0x3e7   :  { %v2529_v41 = vsub.f32 %v7249_v46, %v7910_v29 }
 0x3e8   :  { %2357 = vmatmul.mubr.f32.vlgmr.msra.gmra.mrb[2].mxu0 %v7094_v10  ;;  %v2373_v10 = vld [vmem:[#allocation11 + $0x20] sm:$0xff]  ;;  %v2536_v51 = vsub.f32 %v7251_v57, %v7909_v52  ;;  %v8057_v57 = vand.u32 4294901760, %v7265_v63 }
 0x3e9   :  { %4794 = vmatprep.mubr.msk.f32.mxu0 %vm6010_vm0, %v7920_v14  ;;  %v2405_v33 = vand.u32 4294901760, %v2373_v10  ;;  %v2530_v35 = vand.u32 4294901760, %v2529_v41 }
 0x3ea   :  { %v2537_v26 = vand.u32 4294901760, %v2536_v51 }
 0x3eb   :  { %v7221_v18 = vpack.c.bf16 %v2408_v53, %v2405_v33  ;;  %v7245_v31 = vsub.f32 %v2373_v10, %v2405_v33  ;;  %v7911_v10 = vand.u32 4294901760, %v7247_v15 }
 0x3ec   :  { %v7317_v44 = vpack.c.bf16 %v2537_v26, %v2530_v35 }
 0x3ed   :  { %5460 = vmatpush3.bf16.msra.mxu1 %v7221_v18  ;;  %v7912_v17 = vand.u32 4294901760, %v7245_v31  ;;  %v2522_v53 = vsub.f32 %v7247_v15, %v7911_v10  ;;  %v5507_v3 = vpack.c.bf16 %v7247_v15, %v7245_v31  ;;  %v8048_v22 = vand.u32 4294901760, %v7245_v31 }
 0x3ee   :  { %5461 = vmatprep.subr.bf16.mxu1 %v8047_v16  ;;  %v8055_v15 = vand.u32 4294901760, %v7259_v11  ;;  %v3047_v11 = vld [vmem:[#allocation13 + $0x68] sm:$0xff] }
 0x3ef   :  { %v2515_v33 = vsub.f32 %v7245_v31, %v7912_v17  ;;  %v2523_v58 = vand.u32 4294901760, %v2522_v53  ;;  %v2579_v53 = vand.u32 4294901760, %v2578_v19  ;;  %v5522_v19 = vpack.c.bf16 %v7275_v50, %v7270_v9 }
 0x3f0   :  { %v8054_v31 = vand.u32 4294901760, %v7257_v61 }
 0x3f1   :  { %5463 = vmatpush3.bf16.msra.mxu1 %v7225_v5  ;;  %v2516_v43 = vand.u32 4294901760, %v2515_v33  ;;  %v2572_v33 = vand.u32 4294901760, %v2571_v21  ;;  %v5519_v21 = vpack.c.bf16 %v7265_v63, %v7263_v30  ;;  %v3048_v63 = vld [vmem:[#allocation13 + $0x70] sm:$0xff] }
 0x3f2   :  { %5464 = vmatprep.subr.bf16.mxu1 %v8047_v16 }
 0x3f3   :  { %v7307_v42 = vpack.c.bf16 %v2523_v58, %v2516_v43  ;;  %v7902_v43 = vand.u32 4294901760, %v7270_v9  ;;  %v7901_v58 = vand.u32 4294901760, %v7275_v50  ;;  %v5495_v41 = vpack.c.bf16 %v2579_v53, %v2572_v33 }
 0x3f4   :  { %v1498_v33 = vlaneseq }
 0x3f5   :  { %5466 = vmatpush3.bf16.msra.mxu1 %v7229_v59  ;;  %v2585_v51 = vsub.f32 %v7270_v9, %v7902_v43  ;;  %v2592_v35 = vsub.f32 %v7275_v50, %v7901_v58 }
 0x3f6   :  { %5467 = vmatprep.subr.bf16.mxu1 %v8047_v16  ;;  %v1499_v53 = vshrl.u32 %v1498_v33, 7 }
 0x3f7   :  { %v2586_v26 = vand.u32 4294901760, %v2585_v51  ;;  %v2593_v45 = vand.u32 4294901760, %v2592_v35  ;;  %v1496_v35 = vld [vmem:[%s7783_s7] sm:$0x3] }
 0x3f8   :  { %v1500_v51 = vsub.s32 0, %v1499_v53 }
 0x3f9   :  { %5469 = vmatpush3.bf16.msra.mxu1 %v7233_v13  ;;  %v5498_v54 = vpack.c.bf16 %v2593_v45, %v2586_v26  ;;  %v1504_v26 = vsub.s32 1, %v1499_v53 }
 0x3fa   :  { %5470 = vmatprep.subr.bf16.mxu1 %v8047_v16  ;;  %v1501_v45 = vrot.slane %v1496_v35, %v1500_v51 }
 0x3fb   :  { %v1505_v58 = vrot.slane %v1496_v35, %v1504_v26 }
 0x3fd   :  { %5472 = vmatpush3.bf16.msra.mxu1 %v7261_v38 }
 0x3fe   :  { %5473 = vmatprep.subr.bf16.mxu1 %v8047_v16 }
 0x401   :  { %5475 = vmatpush3.bf16.msra.mxu1 %v7273_v40 }
 0x402   :  { %5476 = vmatprep.subr.bf16.mxu1 %v8047_v16 }
 0x4bb   :  { %v2358_v43 = vpop.f32.mrb[2].mxu0 }
 0x4bc   :  { %v5743_v49 = vadd.f32 %v2358_v43, %v1501_v45  ;;  %v2360_v36 = vpop.f32.mrb[3].mxu0  ;;  %v3043_v45 = vld [vmem:[#allocation13 + $0x48] sm:$0xff] }
 0x4bd   :  { %v5744_v7 = vadd.f32 %v2360_v36, %v1505_v58  ;;  %v3041_v58 = vld [vmem:[#allocation13 + $0x38] sm:$0xff] }
 0x4be   :  { %3699 = vst [vmem:[#allocation14 + $0x8] sm:$0xff] %v5743_v49 }
 0x4bf   :  { %v2364_v39 = vmul.f32 0.5, %v5744_v7  ;;  %3700 = vst [vmem:[#allocation14 + $0x10] sm:$0xff] %v5744_v7 }
 0x4c1   :  { %v2365_v62 = vmul.f32 1.442695, %v2364_v39  ;;  %v3039_v39 = vld [vmem:[#allocation13 + $0x28] sm:$0xff] }
 0x4c3   :  { %5810 = vpow2.f32 %v2365_v62 }
 0x4cd   :  { %v5811_v52 = vpop.eup %5810 }
 0x4ce   :  { %v2367_v33 = vmul.f32 %v5811_v52, %v2363_v0  ;;  %v3037_v0 = vld [vmem:[#allocation13 + $0x18] sm:$0xff] }
 0x4cf   :  { %v3067_v7 = vand.u32 4294901760, %v3037_v0 }
 0x4d0   :  { %v2368_v29 = vadd.f32 %v5743_v49, %v2367_v33  ;;  %v3073_v49 = vand.u32 4294901760, %v3039_v39 }
 0x4d2   :  { %3698 = vst [vmem:[#allocation14] sm:$0xff] %v2368_v29  ;;  %v7370_v10 = vand.u32 4294901760, %v2368_v29  ;;  %v7416_v17 = vsub.f32 %v3039_v39, %v3073_v49 }
 0x4d4   :  { %v7373_v53 = vsub.f32 %v2368_v29, %v7370_v10  ;;  %v3036_v29 = vld [vmem:[#allocation13 + $0x10] sm:$0xff] }
 0x4d5   :  { %v3064_v62 = vand.u32 4294901760, %v3036_v29 }
 0x4d6   :  { %v2475_v51 = vand.u32 4294901760, %v7373_v53 }
 0x4d7   :  { %v7404_v26 = vsub.f32 %v3036_v29, %v3064_v62  ;;  %v7406_v33 = vpack.c.bf16 %v3067_v7, %v3064_v62  ;;  %v3085_v29 = vand.u32 4294901760, %v3043_v45 }
 0x4d8   :  { %v2476_v36 = vsub.f32 %v7373_v53, %v2475_v51 }
 0x4da   :  { %v2477_v43 = vand.u32 4294901760, %v2476_v36  ;;  %v7408_v36 = vsub.f32 %v3037_v0, %v3067_v7 }
 0x4dc   :  { %4585 = vmatmul.mubr.f32.vlgmr.msra.gmra.mrb[4].mxu1 %v2477_v43 }
 0x4dd   :  { %5478 = vmatpush3.bf16.msra.mxu1 %v7293_v32  ;;  %4619 = vmatprep.mubr.msk.f32.mxu1 %vm6010_vm0, %v7920_v14  ;;  %v3034_v32 = vld [vmem:[#allocation13] sm:$0xff] }
 0x4de   :  { %5479 = vmatprep.subr.bf16.mxu1 %v8047_v16  ;;  %v3058_v52 = vand.u32 4294901760, %v3034_v32 }
 0x4e1   :  { %5481 = vmatpush3.bf16.msra.mxu1 %v7297_v27  ;;  %v3035_v27 = vld [vmem:[#allocation13 + $0x8] sm:$0xff] }
 0x4e2   :  { %5482 = vmatprep.subr.bf16.mxu1 %v8047_v16 }
 0x4e5   :  { %5484 = vmatpush3.bf16.msra.mxu1 %v7307_v42  ;;  %v3061_v42 = vand.u32 4294901760, %v3035_v27 }
 0x4e6   :  { %5485 = vmatprep.subr.bf16.mxu1 %v8047_v16 }
 0x4e7   :  { %v7402_v35 = vsub.f32 %v3035_v27, %v3061_v42  ;;  %v3079_v27 = vand.u32 4294901760, %v3041_v58 }
 0x4e9   :  { %5487 = vmatpush3.bf16.msra.mxu1 %v7317_v44  ;;  %v3038_v44 = vld [vmem:[#allocation13 + $0x20] sm:$0xff]  ;;  %v7422_v0 = vsub.f32 %v3041_v58, %v3079_v27 }
 0x4ea   :  { %5488 = vmatprep.subr.bf16.mxu1 %v8047_v16 }
 0x4ed   :  { %5490 = vmatpush3.bf16.msra.mxu1 %v7327_v25  ;;  %v3070_v25 = vand.u32 4294901760, %v3038_v44 }
 0x4ee   :  { %5491 = vmatprep.subr.bf16.mxu1 %v8047_v16 }
 0x4ef   :  { %v7410_v43 = vsub.f32 %v3038_v44, %v3070_v25  ;;  %v7426_v44 = vsub.f32 %v3043_v45, %v3085_v29 }
 0x4f1   :  { %5493 = vmatpush3.bf16.msra.mxu1 %v5492_v56  ;;  %v3040_v56 = vld [vmem:[#allocation13 + $0x30] sm:$0xff] }
 0x4f2   :  { %5494 = vmatprep.subr.bf16.mxu1 %v8047_v16 }
 0x4f5   :  { %5496 = vmatpush3.bf16.msra.mxu1 %v5495_v41  ;;  %v3042_v41 = vld [vmem:[#allocation13 + $0x40] sm:$0xff] }
 0x4f6   :  { %5497 = vmatprep.subr.bf16.mxu1 %v8047_v16 }
 0x4f9   :  { %5499 = vmatpush3.bf16.msra.mxu1 %v5498_v54  ;;  %v7398_v54 = vpack.c.bf16 %v3061_v42, %v3058_v52 }
 0x4fa   :  { %5500 = vmatprep.subr.bf16.mxu1 %v8047_v16 }
 0x4fb   :  { %5598 = vmatpush3.bf16.msra.mxu0 %v7398_v54 }
 0x4fc   :  { %4620 = vmatmul.mubr.f32.vlgmr.msra.gmra.mrb[4].mxu1 %v7370_v10  ;;  %5599 = vmatprep.subr.bf16.mxu0 %v8047_v16 }
 0x4fd   :  { %5502 = vmatpush3.bf16.msra.mxu1 %v5501_v60  ;;  %4654 = vmatprep.mubr.msk.f32.mxu1 %vm6010_vm0, %v7920_v14  ;;  %v7400_v60 = vsub.f32 %v3034_v32, %v3058_v52  ;;  %v3076_v32 = vand.u32 4294901760, %v3040_v56  ;;  %v3082_v52 = vand.u32 4294901760, %v3042_v41 }
 0x4fe   :  { %5503 = vmatprep.subr.bf16.mxu1 %v8047_v16 }
 0x4ff   :  { %v7420_v42 = vsub.f32 %v3040_v56, %v3076_v32  ;;  %v7424_v62 = vsub.f32 %v3042_v41, %v3082_v52  ;;  %5601 = vmatpush3.bf16.msra.mxu0 %v7406_v33  ;;  %v7440_v39 = vpack.c.bf16 %v3079_v27, %v3076_v32 }
 0x500   :  { %5602 = vmatprep.subr.bf16.mxu0 %v8047_v16 }
 0x501   :  { %5505 = vmatpush3.bf16.msra.mxu1 %v5504_v20  ;;  %v7432_v20 = vpack.c.bf16 %v3073_v49, %v3070_v25 }
 0x502   :  { %5506 = vmatprep.subr.bf16.mxu1 %v8047_v16 }
 0x503   :  { %5604 = vmatpush3.bf16.msra.mxu0 %v7432_v20 }
 0x504   :  { %5605 = vmatprep.subr.bf16.mxu0 %v8047_v16 }
 0x505   :  { %5508 = vmatpush3.bf16.msra.mxu1 %v5507_v3  ;;  %v7448_v3 = vpack.c.bf16 %v3085_v29, %v3082_v52 }
 0x506   :  { %5509 = vmatprep.subr.bf16.mxu1 %v8047_v16 }
 0x507   :  { %5607 = vmatpush3.bf16.msra.mxu0 %v7440_v39 }
 0x508   :  { %5608 = vmatprep.subr.bf16.mxu0 %v8047_v16 }
 0x509   :  { %5511 = vmatpush3.bf16.msra.mxu1 %v5510_v12  ;;  %v5549_v12 = vpack.c.bf16 %v2493_v55, %v2486_v23  ;;  %v5555_v23 = vpack.c.bf16 %v8049_v2, %v8048_v22  ;;  %v8050_v55 = vand.u32 4294901760, %v7249_v46  ;;  %v8056_v46 = vand.u32 4294901760, %v7263_v30 }
 0x50a   :  { %5512 = vmatprep.subr.bf16.mxu1 %v8047_v16  ;;  %v3097_v30 = vand.u32 4294901760, %v3047_v11 }
 0x50b   :  { %5610 = vmatpush3.bf16.msra.mxu0 %v7448_v3  ;;  %v5558_v1 = vpack.c.bf16 %v8051_v6, %v8050_v55  ;;  %v3179_v55 = vand.u32 4294901760, %v7410_v43  ;;  %v3186_v6 = vand.u32 4294901760, %v7416_v17 }
 0x50c   :  { %5611 = vmatprep.subr.bf16.mxu0 %v8047_v16  ;;  %v7572_v45 = vsub.f32 %v3047_v11, %v3097_v30 }
 0x50d   :  { %5514 = vmatpush3.bf16.msra.mxu1 %v5513_v4  ;;  %v5552_v4 = vpack.c.bf16 %v2507_v47, %v2500_v24  ;;  %v8052_v24 = vand.u32 4294901760, %v7253_v28  ;;  %v8053_v47 = vand.u32 4294901760, %v7255_v34  ;;  %v8058_v28 = vand.u32 4294901760, %v7270_v9  ;;  %v3049_v9 = vld [vmem:[#allocation13 + $0x78] sm:$0xff] }
 0x50e   :  { %5515 = vmatprep.subr.bf16.mxu1 %v8047_v16  ;;  %v8059_v34 = vand.u32 4294901760, %v7275_v50  ;;  %v3103_v50 = vand.u32 4294901760, %v3049_v9 }
 0x510   :  { %v7577_v27 = vsub.f32 %v3049_v9, %v3103_v50 }
 0x511   :  { %5517 = vmatpush3.bf16.msra.mxu1 %v5516_v48  ;;  %v5561_v48 = vpack.c.bf16 %v8053_v47, %v8052_v24  ;;  %v3180_v47 = vsub.f32 %v7410_v43, %v3179_v55 }
 0x512   :  { %5518 = vmatprep.subr.bf16.mxu1 %v8047_v16 }
 0x515   :  { %5520 = vmatpush3.bf16.msra.mxu1 %v5519_v21  ;;  %v5564_v21 = vpack.c.bf16 %v8055_v15, %v8054_v31  ;;  %v3181_v15 = vand.u32 4294901760, %v3180_v47 }
 0x516   :  { %5521 = vmatprep.subr.bf16.mxu1 %v8047_v16 }
 0x519   :  { %5523 = vmatpush3.bf16.msra.mxu1 %v5522_v19  ;;  %v5567_v19 = vpack.c.bf16 %v8057_v57, %v8056_v46  ;;  %v3193_v46 = vand.u32 4294901760, %v7420_v42  ;;  %v3200_v57 = vand.u32 4294901760, %v7422_v0 }
 0x51a   :  { %5524 = vmatprep.subr.bf16.mxu1 %v8047_v16 }
 0x51c   :  { %4655 = vmatmul.mubr.f32.vlgmr.msra.gmra.mrb[4].mxu1 %v7373_v53  ;;  %v5570_v53 = vpack.c.bf16 %v8059_v34, %v8058_v28  ;;  %v3194_v28 = vsub.f32 %v7420_v42, %v3193_v46  ;;  %v3201_v34 = vsub.f32 %v7422_v0, %v3200_v57 }
 0x51d   :  { %5526 = vmatpush3.bf16.msra.mxu1 %v7213_v37  ;;  %4689 = vmatprep.mubr.msk.f32.mxu1 %vm6010_vm0, %v7920_v14 }
 0x51e   :  { %5527 = vmatprep.subr.bf16.mxu1 %v8047_v16 }
 0x521   :  { %5529 = vmatpush3.bf16.msra.mxu1 %v7217_v8 }
 0x522   :  { %5530 = vmatprep.subr.bf16.mxu1 %v8047_v16 }
 0x525   :  { %5532 = vmatpush3.bf16.msra.mxu1 %v7221_v18 }
 0x526   :  { %5533 = vmatprep.subr.bf16.mxu1 %v8047_v16 }
 0x529   :  { %5535 = vmatpush3.bf16.msra.mxu1 %v7225_v5 }
 0x52a   :  { %5536 = vmatprep.subr.bf16.mxu1 %v8047_v16 }
 0x52d   :  { %5538 = vmatpush3.bf16.msra.mxu1 %v7229_v59 }
 0x52e   :  { %5539 = vmatprep.subr.bf16.mxu1 %v8047_v16 }
 0x531   :  { %5541 = vmatpush3.bf16.msra.mxu1 %v7233_v13 }
 0x532   :  { %5542 = vmatprep.subr.bf16.mxu1 %v8047_v16 }
 0x535   :  { %5544 = vmatpush3.bf16.msra.mxu1 %v7261_v38 }
 0x536   :  { %5545 = vmatprep.subr.bf16.mxu1 %v8047_v16 }
 0x539   :  { %5547 = vmatpush3.bf16.msra.mxu1 %v7273_v40 }
 0x53a   :  { %5548 = vmatprep.subr.bf16.mxu1 %v8047_v16 }
 0x53c   :  { %4690 = vmatmul.mubr.f32.vlgmr.msra.gmra.mrb[4].mxu1 %v2475_v51  ;;  %v3158_v51 = vand.u32 4294901760, %v7402_v35 }
 0x53d   :  { %5550 = vmatpush3.bf16.msra.mxu1 %v5549_v12  ;;  %4724 = vmatprep.mubr.msk.f32.mxu1 %vm6010_vm0, %v7920_v14  ;;  %v3165_v12 = vand.u32 4294901760, %v7404_v26 }
 0x53e   :  { %5551 = vmatprep.subr.bf16.mxu1 %v8047_v16  ;;  %v3159_v49 = vsub.f32 %v7402_v35, %v3158_v51 }
 0x53f   :  { %v3166_v2 = vsub.f32 %v7404_v26, %v3165_v12 }
 0x540   :  { %v3160_v29 = vand.u32 4294901760, %v3159_v49 }
 0x541   :  { %5553 = vmatpush3.bf16.msra.mxu1 %v5552_v4  ;;  %v3172_v4 = vand.u32 4294901760, %v7408_v36 }
 0x542   :  { %5554 = vmatprep.subr.bf16.mxu1 %v8047_v16 }
 0x545   :  { %5556 = vmatpush3.bf16.msra.mxu1 %v5555_v23  ;;  %v3173_v23 = vsub.f32 %v7408_v36, %v3172_v4 }
 0x546   :  { %5557 = vmatprep.subr.bf16.mxu1 %v8047_v16 }
 0x547   :  { %v3174_v24 = vand.u32 4294901760, %v3173_v23 }
 0x549   :  { %5559 = vmatpush3.bf16.msra.mxu1 %v5558_v1  ;;  %v3167_v1 = vand.u32 4294901760, %v3166_v2  ;;  %v7915_v2 = vand.u32 4294901760, %v7572_v45 }
 0x54a   :  { %5560 = vmatprep.subr.bf16.mxu1 %v8047_v16 }
 0x54b   :  { %v5624_v31 = vpack.c.bf16 %v3174_v24, %v3167_v1  ;;  %v3243_v24 = vsub.f32 %v7572_v45, %v7915_v2 }
 0x54d   :  { %5562 = vmatpush3.bf16.msra.mxu1 %v5561_v48  ;;  %v3187_v48 = vsub.f32 %v7416_v17, %v3186_v6 }
 0x54e   :  { %5563 = vmatprep.subr.bf16.mxu1 %v8047_v16 }
 0x551   :  { %5565 = vmatpush3.bf16.msra.mxu1 %v5564_v21  ;;  %v3188_v21 = vand.u32 4294901760, %v3187_v48  ;;  %v3244_v48 = vand.u32 4294901760, %v3243_v24 }
 0x552   :  { %5566 = vmatprep.subr.bf16.mxu1 %v8047_v16 }
 0x555   :  { %5568 = vmatpush3.bf16.msra.mxu1 %v5567_v19  ;;  %v5627_v19 = vpack.c.bf16 %v3188_v21, %v3181_v15  ;;  %v7913_v21 = vand.u32 4294901760, %v7577_v27 }
 0x556   :  { %5569 = vmatprep.subr.bf16.mxu1 %v8047_v16 }
 0x559   :  { %5571 = vmatpush3.bf16.msra.mxu1 %v5570_v53  ;;  %v3195_v53 = vand.u32 4294901760, %v3194_v28 }
 0x55a   :  { %5572 = vmatprep.subr.bf16.mxu1 %v8047_v16 }
 0x55c   :  { %4725 = vmatmul.mubr.f32.vlgmr.msra.gmra.mrb[4].mxu1 %v7370_v10 }
 0x55d   :  { %5574 = vmatpush3.bf16.msra.mxu1 %v7213_v37  ;;  %4759 = vmatprep.mubr.msk.f32.mxu1 %vm6010_vm0, %v7920_v14  ;;  %v3044_v37 = vld [vmem:[#allocation13 + $0x50] sm:$0xff] }
 0x55e   :  { %5575 = vmatprep.subr.bf16.mxu1 %v8047_v16 }
 0x561   :  { %5577 = vmatpush3.bf16.msra.mxu1 %v7217_v8  ;;  %v3045_v8 = vld [vmem:[#allocation13 + $0x58] sm:$0xff] }
 0x562   :  { %5578 = vmatprep.subr.bf16.mxu1 %v8047_v16 }
 0x565   :  { %5580 = vmatpush3.bf16.msra.mxu1 %v7221_v18  ;;  %v3088_v18 = vand.u32 4294901760, %v3044_v37 }
 0x566   :  { %5581 = vmatprep.subr.bf16.mxu1 %v8047_v16 }
 0x567   :  { %v7566_v56 = vsub.f32 %v3044_v37, %v3088_v18  ;;  %v3202_v37 = vand.u32 4294901760, %v3201_v34 }
 0x569   :  { %5583 = vmatpush3.bf16.msra.mxu1 %v7225_v5  ;;  %v3091_v5 = vand.u32 4294901760, %v3045_v8 }
 0x56a   :  { %5584 = vmatprep.subr.bf16.mxu1 %v8047_v16 }
 0x56b   :  { %v7548_v61 = vpack.c.bf16 %v3091_v5, %v3088_v18  ;;  %v7568_v58 = vsub.f32 %v3045_v8, %v3091_v5  ;;  %v3207_v8 = vand.u32 4294901760, %v7424_v62  ;;  %v3214_v18 = vand.u32 4294901760, %v7426_v44 }
 0x56c   :  { %v5630_v5 = vpack.c.bf16 %v3202_v37, %v3195_v53  ;;  %v3257_v53 = vsub.f32 %v7577_v27, %v7913_v21 }
 0x56d   :  { %5586 = vmatpush3.bf16.msra.mxu1 %v7229_v59  ;;  %v3046_v59 = vld [vmem:[#allocation13 + $0x60] sm:$0xff]  ;;  %5613 = vmatpush3.bf16.msra.mxu0 %v7548_v61  ;;  %v3215_v11 = vsub.f32 %v7426_v44, %v3214_v18  ;;  %v3228_v9 = vand.u32 4294901760, %v7568_v58 }
 0x56e   :  { %5587 = vmatprep.subr.bf16.mxu1 %v8047_v16  ;;  %5614 = vmatprep.subr.bf16.mxu0 %v8047_v16 }
 0x571   :  { %5589 = vmatpush3.bf16.msra.mxu1 %v7233_v13  ;;  %v3094_v13 = vand.u32 4294901760, %v3046_v59 }
 0x572   :  { %5590 = vmatprep.subr.bf16.mxu1 %v8047_v16 }
 0x573   :  { %v7570_v41 = vsub.f32 %v3046_v59, %v3094_v13  ;;  %v3208_v59 = vsub.f32 %v7424_v62, %v3207_v8 }
 0x575   :  { %5592 = vmatpush3.bf16.msra.mxu1 %v7261_v38  ;;  %v7552_v38 = vpack.c.bf16 %v3097_v30, %v3094_v13  ;;  %v3209_v13 = vand.u32 4294901760, %v3208_v59  ;;  %v3216_v30 = vand.u32 4294901760, %v3215_v11  ;;  %v3258_v59 = vand.u32 4294901760, %v3257_v53 }
 0x576   :  { %5593 = vmatprep.subr.bf16.mxu1 %v8047_v16 }
 0x577   :  { %5616 = vmatpush3.bf16.msra.mxu0 %v7552_v38 }
 0x578   :  { %5617 = vmatprep.subr.bf16.mxu0 %v8047_v16 }
 0x579   :  { %5595 = vmatpush3.bf16.msra.mxu1 %v7273_v40  ;;  %v3100_v40 = vand.u32 4294901760, %v3048_v63 }
 0x57b   :  { %v7558_v7 = vpack.c.bf16 %v3103_v50, %v3100_v40  ;;  %v7575_v32 = vsub.f32 %v3048_v63, %v3100_v40  ;;  %v3221_v63 = vand.u32 4294901760, %v7566_v56  ;;  %v5633_v40 = vpack.c.bf16 %v3216_v30, %v3209_v13 }
 0x57c   :  { %4760 = vmatmul.mubr.f32.vlgmr.msra.gmra.mrb[4].mxu1 %v7370_v10  ;;  %v3151_v10 = vand.u32 4294901760, %v7400_v60  ;;  %v5645_v13 = vpack.c.bf16 %v7402_v35, %v7400_v60  ;;  %v5648_v30 = vpack.c.bf16 %v7408_v36, %v7404_v26  ;;  %v5702_v35 = vpack.c.bf16 %v3200_v57, %v3193_v46 }
 0x57d   :  { %5619 = vmatpush3.bf16.msra.mxu0 %v7558_v7  ;;  %v3222_v50 = vsub.f32 %v7566_v56, %v3221_v63  ;;  %v7914_v15 = vand.u32 4294901760, %v7575_v32  ;;  %v5666_v24 = vpack.c.bf16 %v7577_v27, %v7575_v32  ;;  %v5705_v26 = vpack.c.bf16 %v3214_v18, %v3207_v8 }
 0x57e   :  { %v3152_v25 = vsub.f32 %v7400_v60, %v3151_v10  ;;  %5620 = vmatprep.subr.bf16.mxu0 %v8047_v16  ;;  %v5699_v60 = vpack.c.bf16 %v3186_v6, %v3179_v55  ;;  %v8060_v36 = vand.u32 4294901760, %v7570_v41 }
 0x57f   :  { %v3223_v49 = vand.u32 4294901760, %v3222_v50  ;;  %v3250_v34 = vsub.f32 %v7575_v32, %v7914_v15  ;;  %v5651_v50 = vpack.c.bf16 %v7416_v17, %v7410_v43  ;;  %v5708_v17 = vpack.c.bf16 %v3228_v9, %v3221_v63 }
 0x580   :  { %v3153_v52 = vand.u32 4294901760, %v3152_v25  ;;  %v3229_v25 = vsub.f32 %v7568_v58, %v3228_v9  ;;  %v8061_v43 = vand.u32 4294901760, %v7572_v45 }
 0x581   :  { %v3251_v37 = vand.u32 4294901760, %v3250_v34 }
 0x582   :  { %v7582_v22 = vpack.c.bf16 %v3160_v29, %v3153_v52  ;;  %v3230_v52 = vand.u32 4294901760, %v3229_v25  ;;  %v7916_v29 = vand.u32 4294901760, %v7570_v41  ;;  %v5654_v25 = vpack.c.bf16 %v7422_v0, %v7420_v42 }
 0x583   :  { %v5642_v11 = vpack.c.bf16 %v3258_v59, %v3251_v37  ;;  %v5711_v42 = vpack.c.bf16 %v8061_v43, %v8060_v36  ;;  %v8062_v0 = vand.u32 4294901760, %v7575_v32 }
 0x584   :  { %v5636_v23 = vpack.c.bf16 %v3230_v52, %v3223_v49  ;;  %v3236_v1 = vsub.f32 %v7570_v41, %v7916_v29  ;;  %v5657_v49 = vpack.c.bf16 %v7426_v44, %v7424_v62  ;;  %v5660_v52 = vpack.c.bf16 %v7568_v58, %v7566_v56 }
 0x585   :  { %v8063_v62 = vand.u32 4294901760, %v7577_v27 }
 0x586   :  { %v3237_v47 = vand.u32 4294901760, %v3236_v1  ;;  %v5663_v1 = vpack.c.bf16 %v7572_v45, %v7570_v41 }
 0x587   :  { %v5714_v44 = vpack.c.bf16 %v8063_v62, %v8062_v0 }
 0x588   :  { %v5639_v28 = vpack.c.bf16 %v3244_v48, %v3237_v47  ;;  %v3722_v47 = vld [vmem:[%s7785_s9] ss:$0 sm:$0xff] }
 0x64f   :  { %v3029_v48 = vpop.f32.mrb[4].mxu1 }
 0x650   :  { %v5745_v34 = vadd.f32 %v3722_v47, %v3029_v48  ;;  %v4761_v53 = vpop.f32.mrb[5].mxu1 }
 0x652   :  { %v3033_v37 = vmax.f32 %v5745_v34, 0.0 }
 0x654   :  { %v7657_v59 = vand.u32 4294901760, %v3033_v37 }
 0x656   :  { %v3139_v21 = vsub.f32 %v3033_v37, %v7657_v59 }
 0x658   :  { %v3140_v15 = vand.u32 4294901760, %v3139_v21 }
 0x65a   :  { %v3141_v2 = vsub.f32 %v3139_v21, %v3140_v15 }
 0x65c   :  { %v3142_v29 = vand.u32 4294901760, %v3141_v2 }
 0x65e   :  { %4795 = vmatmul.mubr.f32.vlgmr.msra.gmra.mrb[4].mxu0 %v3142_v29 }
 0x65f   :  { %5622 = vmatpush3.bf16.msra.mxu0 %v7582_v22  ;;  %4829 = vmatprep.mubr.msk.f32.mxu0 %vm6010_vm0, %v7920_v14  ;;  %v5693_v22 = vpack.c.bf16 %v3158_v51, %v3151_v10 }
 0x660   :  { %5623 = vmatprep.subr.bf16.mxu0 %v8047_v16 }
 0x663   :  { %5625 = vmatpush3.bf16.msra.mxu0 %v5624_v31  ;;  %v5696_v31 = vpack.c.bf16 %v3172_v4, %v3165_v12 }
 0x664   :  { %5626 = vmatprep.subr.bf16.mxu0 %v8047_v16 }
 0x667   :  { %5628 = vmatpush3.bf16.msra.mxu0 %v5627_v19 }
 0x668   :  { %5629 = vmatprep.subr.bf16.mxu0 %v8047_v16 }
 0x66b   :  { %5631 = vmatpush3.bf16.msra.mxu0 %v5630_v5 }
 0x66c   :  { %5632 = vmatprep.subr.bf16.mxu0 %v8047_v16 }
 0x66f   :  { %5634 = vmatpush3.bf16.msra.mxu0 %v5633_v40 }
 0x670   :  { %5635 = vmatprep.subr.bf16.mxu0 %v8047_v16 }
 0x673   :  { %5637 = vmatpush3.bf16.msra.mxu0 %v5636_v23 }
 0x674   :  { %5638 = vmatprep.subr.bf16.mxu0 %v8047_v16 }
 0x677   :  { %5640 = vmatpush3.bf16.msra.mxu0 %v5639_v28 }
 0x678   :  { %5641 = vmatprep.subr.bf16.mxu0 %v8047_v16 }
 0x67b   :  { %5643 = vmatpush3.bf16.msra.mxu0 %v5642_v11 }
 0x67c   :  { %5644 = vmatprep.subr.bf16.mxu0 %v8047_v16 }
 0x67e   :  { %4830 = vmatmul.mubr.f32.vlgmr.msra.gmra.mrb[4].mxu0 %v7657_v59 }
 0x67f   :  { %5646 = vmatpush3.bf16.msra.mxu0 %v5645_v13  ;;  %4864 = vmatprep.mubr.msk.f32.mxu0 %vm6010_vm0, %v7920_v14 }
 0x680   :  { %5647 = vmatprep.subr.bf16.mxu0 %v8047_v16 }
 0x683   :  { %5649 = vmatpush3.bf16.msra.mxu0 %v5648_v30 }
 0x684   :  { %5650 = vmatprep.subr.bf16.mxu0 %v8047_v16 }
 0x687   :  { %5652 = vmatpush3.bf16.msra.mxu0 %v5651_v50 }
 0x688   :  { %5653 = vmatprep.subr.bf16.mxu0 %v8047_v16 }
 0x68b   :  { %5655 = vmatpush3.bf16.msra.mxu0 %v5654_v25 }
 0x68c   :  { %5656 = vmatprep.subr.bf16.mxu0 %v8047_v16 }
 0x68f   :  { %5658 = vmatpush3.bf16.msra.mxu0 %v5657_v49 }
 0x690   :  { %5659 = vmatprep.subr.bf16.mxu0 %v8047_v16 }
 0x693   :  { %5661 = vmatpush3.bf16.msra.mxu0 %v5660_v52 }
 0x694   :  { %5662 = vmatprep.subr.bf16.mxu0 %v8047_v16 }
 0x697   :  { %5664 = vmatpush3.bf16.msra.mxu0 %v5663_v1 }
 0x698   :  { %5665 = vmatprep.subr.bf16.mxu0 %v8047_v16 }
 0x69b   :  { %5667 = vmatpush3.bf16.msra.mxu0 %v5666_v24 }
 0x69c   :  { %5668 = vmatprep.subr.bf16.mxu0 %v8047_v16 }
 0x69e   :  { %4865 = vmatmul.mubr.f32.vlgmr.msra.gmra.mrb[4].mxu0 %v3139_v21 }
 0x69f   :  { %5670 = vmatpush3.bf16.msra.mxu0 %v7398_v54  ;;  %4899 = vmatprep.mubr.msk.f32.mxu0 %vm6010_vm0, %v7920_v14 }
 0x6a0   :  { %5671 = vmatprep.subr.bf16.mxu0 %v8047_v16 }
 0x6a3   :  { %5673 = vmatpush3.bf16.msra.mxu0 %v7406_v33 }
 0x6a4   :  { %5674 = vmatprep.subr.bf16.mxu0 %v8047_v16 }
 0x6a7   :  { %5676 = vmatpush3.bf16.msra.mxu0 %v7432_v20 }
 0x6a8   :  { %5677 = vmatprep.subr.bf16.mxu0 %v8047_v16 }
 0x6ab   :  { %5679 = vmatpush3.bf16.msra.mxu0 %v7440_v39 }
 0x6ac   :  { %5680 = vmatprep.subr.bf16.mxu0 %v8047_v16 }
 0x6af   :  { %5682 = vmatpush3.bf16.msra.mxu0 %v7448_v3 }
 0x6b0   :  { %5683 = vmatprep.subr.bf16.mxu0 %v8047_v16 }
 0x6b3   :  { %5685 = vmatpush3.bf16.msra.mxu0 %v7548_v61 }
 0x6b4   :  { %5686 = vmatprep.subr.bf16.mxu0 %v8047_v16 }
 0x6b7   :  { %5688 = vmatpush3.bf16.msra.mxu0 %v7552_v38 }
 0x6b8   :  { %5689 = vmatprep.subr.bf16.mxu0 %v8047_v16 }
 0x6bb   :  { %5691 = vmatpush3.bf16.msra.mxu0 %v7558_v7 }
 0x6bc   :  { %5692 = vmatprep.subr.bf16.mxu0 %v8047_v16 }
 0x6be   :  { %4900 = vmatmul.mubr.f32.vlgmr.msra.gmra.mrb[4].mxu0 %v3140_v15 }
 0x6bf   :  { %5694 = vmatpush3.bf16.msra.mxu0 %v5693_v22  ;;  %4934 = vmatprep.mubr.msk.f32.mxu0 %vm6010_vm0, %v7920_v14 }
 0x6c0   :  { %5695 = vmatprep.subr.bf16.mxu0 %v8047_v16 }
 0x6c3   :  { %5697 = vmatpush3.bf16.msra.mxu0 %v5696_v31 }
 0x6c4   :  { %5698 = vmatprep.subr.bf16.mxu0 %v8047_v16 }
 0x6c7   :  { %5700 = vmatpush3.bf16.msra.mxu0 %v5699_v60 }
 0x6c8   :  { %5701 = vmatprep.subr.bf16.mxu0 %v8047_v16 }
 0x6cb   :  { %5703 = vmatpush3.bf16.msra.mxu0 %v5702_v35 }
 0x6cc   :  { %5704 = vmatprep.subr.bf16.mxu0 %v8047_v16 }
 0x6cf   :  { %5706 = vmatpush3.bf16.msra.mxu0 %v5705_v26 }
 0x6d0   :  { %5707 = vmatprep.subr.bf16.mxu0 %v8047_v16 }
 0x6d3   :  { %5709 = vmatpush3.bf16.msra.mxu0 %v5708_v17 }
 0x6d4   :  { %5710 = vmatprep.subr.bf16.mxu0 %v8047_v16 }
 0x6d7   :  { %5712 = vmatpush3.bf16.msra.mxu0 %v5711_v42 }
 0x6d8   :  { %5713 = vmatprep.subr.bf16.mxu0 %v8047_v16 }
 0x6db   :  { %5715 = vmatpush3.bf16.msra.mxu0 %v5714_v44 }
 0x6dc   :  { %5716 = vmatprep.subr.bf16.mxu0 %v8047_v16 }
 0x6de   :  { %4935 = vmatmul.mubr.f32.vlgmr.msra.gmra.mrb[4].mxu0 %v7657_v59 }
 0x6df   :  { %5718 = vmatpush3.bf16.msra.mxu0 %v7398_v54  ;;  %4969 = vmatprep.mubr.msk.f32.mxu0 %vm6010_vm0, %v7920_v14  ;;  %v3723_v14 = vld [vmem:[%s7787_s11] ss:$0 sm:$0xff] }
 0x6e0   :  { %5719 = vmatprep.subr.bf16.mxu0 %v8047_v16 }
 0x6e3   :  { %5721 = vmatpush3.bf16.msra.mxu0 %v7406_v33 }
 0x6e4   :  { %5722 = vmatprep.subr.bf16.mxu0 %v8047_v16 }
 0x6e7   :  { %5724 = vmatpush3.bf16.msra.mxu0 %v7432_v20 }
 0x6e8   :  { %5725 = vmatprep.subr.bf16.mxu0 %v8047_v16 }
 0x6eb   :  { %5727 = vmatpush3.bf16.msra.mxu0 %v7440_v39 }
 0x6ec   :  { %5728 = vmatprep.subr.bf16.mxu0 %v8047_v16 }
 0x6ef   :  { %5730 = vmatpush3.bf16.msra.mxu0 %v7448_v3 }
 0x6f0   :  { %5731 = vmatprep.subr.bf16.mxu0 %v8047_v16 }
 0x6f3   :  { %5733 = vmatpush3.bf16.msra.mxu0 %v7548_v61 }
 0x6f4   :  { %5734 = vmatprep.subr.bf16.mxu0 %v8047_v16 }
 0x6f7   :  { %5736 = vmatpush3.bf16.msra.mxu0 %v7552_v38 }
 0x6f8   :  { %5737 = vmatprep.subr.bf16.mxu0 %v8047_v16 }
 0x6fb   :  { %5739 = vmatpush3.bf16.msra.mxu0 %v7558_v7 }
 0x6fe   :  { %4970 = vmatmul.mubr.f32.vlgmr.msra.gmra.mrb[4].mxu0 %v7657_v59 }
 0x7d1   :  { %v3694_v54 = vpop.f32.mrb[4].mxu0 }
 0x7d2   :  { %v5746_v33 = vadd.f32 %v3723_v14, %v3694_v54  ;;  %v4971_v20 = vpop.f32.mrb[5].mxu0 }
 0x7d4   :  { %3701 = vst [vmem:[#allocation14 + $0x18] sm:$0xff] %v5746_v33 }
 0x7d5   :  { %5977 = shalt.err (!%p5974_p4)
}
 0x7d6   :  { %s5978_s20 = scalar_lea.hbm %s7788_s12, 512 }
 0x7d7   :  { %p5979_p5 = scmp.ne.s32.totalorder %s7788_s12, %s5978_s20  ;;  %p5982_p6 = scmp.lt.u32.totalorder %s5978_s20, %s7788_s12 }
 0x7d9   :  { %p5984_p7 = pnand %p5982_p6, %p5979_p5 }
 0x7db   :  { %5987 = shalt.err (!%p5984_p7)
}
 0x7dc   :  { %3711 = dma.vmem_to_hbm [thread:$0]  %s3709_s17, 512, %s7788_s12, [#allocation4]  }
 0x7dd   :  { %5996 = dma.done.wait [#allocation4], 512  }
 0x7de   :  { %5997 = vsyncadd [#allocation4], 4294966784 }
 0x7df   :  { %3715 = vsyncpa [#allocation3], 1 }
 0x7e0   :  { %3716 = vsyncpa [#allocation6], 1 }
 0x7e1   :  { %3717 = vsyncpa [#allocation9], 1 }
 0x7e2   :  { %3718 = vsyncpa [#allocation12], 1 }
 0x7e3   :  { %3719 = vsyncpa [#allocation4], 1 }

// kernel: tpu_custom_call.1
= control target key start
LH: loop header
LB: loop body
LE: loop exit
PB: predicated region body
PF: predicated region fallthrough
CT: control target
= control target key end

     0   :  { %17 = vsyncpa [#allocation3], 0  ;;  %s7776_s0 = inlined_call_operand.hbm [shape: f32[8,128], index: 0, kind: input, shape index: {}]   ;;  %s7777_s1 = inlined_call_operand.hbm [shape: f32[8,128], index: 1, kind: input, shape index: {}]   ;;  %s7778_s2 = inlined_call_operand.hbm [shape: f32[128,128], index: 2, kind: input, shape index: {}]   ;;  %s7779_s3 = inlined_call_operand.vmem [shape: f32[1,128], index: 3, kind: input, shape index: {}]   ;;  %s7780_s4 = inlined_call_operand.hbm [shape: f32[128,128], index: 4, kind: input, shape index: {}]   ;;  %s7781_s5 = inlined_call_operand.vmem [shape: f32[1,128], index: 5, kind: input, shape index: {}]   ;;  %s7782_s6 = inlined_call_operand.hbm [shape: f32[128,256], index: 6, kind: input, shape index: {}]   ;;  %s7783_s7 = inlined_call_operand.vmem [shape: f32[1,256], index: 7, kind: input, shape index: {}]   ;;  %s7784_s8 = inlined_call_operand.hbm [shape: f32[128,128], index: 8, kind: input, shape index: {}]   ;;  %s7785_s9 = inlined_call_operand.vmem [shape: f32[1,128], index: 9, kind: input, shape index: {}]   ;;  %s7786_s10 = inlined_call_operand.hbm [shape: f32[128,128], index: 10, kind: input, shape index: {}]   ;;  %s7787_s11 = inlined_call_operand.vmem [shape: f32[1,128], index: 11, kind: input, shape index: {}]   ;;  %s7788_s12 = inlined_call_operand.hbm [shape: f32[8,512], index: 12, kind: output, shape index: {}]  }
   0x1   :  { %18 = vsyncpa [#allocation6], 0 }
   0x2   :  { %19 = vsyncpa [#allocation9], 0 }
   0x3   :  { %20 = vsyncpa [#allocation12], 0 }
   0x4   :  { %21 = vsyncpa [#allocation4], 0  ;;  %s5998_s21 = smov [#allocation5]   ;;  %s5812_s25 = scalar_lea.hbm %s7777_s1, 128 }
   0x5   :  { %s38_s22 = sshll.u32 %s5998_s21, 4  ;;  %p5813_p0 = scmp.ne.s32.totalorder %s7777_s1, %s5812_s25  ;;  %s39_s22 = int_to_ptr.vmem [resolvable:$true] %s38_s22 }
   0x6   :  { %p5816_p1 = scmp.lt.u32.totalorder %s5812_s25, %s7777_s1 }
   0x8   :  { %p5818_p2 = pnand %p5816_p1, %p5813_p0 }
   0xa   :  { %5821 = shalt.err (!%p5818_p2)
}
   0xb   :  { %s5822_s30 = scalar_lea.vmem %s39_s22, 128  ;;  %p5827_p4 = scmp.lt.s32.totalorder %s39_s22, %s39_s22 }
   0xc   :  { %p5823_p3 = scmp.ne.s32.totalorder %s39_s22, %s5822_s30  ;;  %p5828_p5 = scmp.lt.s32.totalorder %s5822_s30, %s5822_s30 }
   0xe   :  { %p5829_p6 = por %p5828_p5, %p5827_p4 }
  0x10   :  { %p5830_p7 = pnand %p5829_p6, %p5823_p3 }
  0x12   :  { %5833 = shalt.err (!%p5830_p7)
}
  0x13   :  { %41 = dma.hbm_to_vmem [thread:$0]  %s7777_s1, 128, %s39_s22, [#allocation6]  }
  0x14   :  { %s5999_s15 = smov [#allocation8]   ;;  %s6000_s17 = smov [#allocation11]  }
  0x15   :  { %s61_s16 = sshll.u32 %s5999_s15, 4  ;;  %s89_s18 = sshll.u32 %s6000_s17, 4  ;;  %s62_s16 = int_to_ptr.vmem [resolvable:$true] %s61_s16  ;;  %s90_s18 = int_to_ptr.vmem [resolvable:$true] %s89_s18 }
  0x16   :  { %s5834_s21 = scalar_lea.hbm %s7780_s4, 2048 }
  0x17   :  { %p5835_p8 = scmp.ne.s32.totalorder %s7780_s4, %s5834_s21  ;;  %p5838_p9 = scmp.lt.u32.totalorder %s5834_s21, %s7780_s4 }
  0x19   :  { %p5840_p10 = pnand %p5838_p9, %p5835_p8 }
  0x1b   :  { %5843 = shalt.err (!%p5840_p10)
}
  0x1c   :  { %s5844_s1 = scalar_lea.vmem %s62_s16, 2048  ;;  %p5849_p12 = scmp.lt.s32.totalorder %s62_s16, %s62_s16 }
  0x1d   :  { %p5845_p11 = scmp.ne.s32.totalorder %s62_s16, %s5844_s1  ;;  %p5850_p13 = scmp.lt.s32.totalorder %s5844_s1, %s5844_s1 }
  0x1f   :  { %p5851_p0 = por %p5850_p13, %p5849_p12 }
  0x21   :  { %p5852_p1 = pnand %p5851_p0, %p5845_p11 }
  0x23   :  { %5855 = shalt.err (!%p5852_p1)
}
  0x24   :  { %s6001_s22 = smov 128   ;;  %s6002_s27 = smov 8  }
  0x25   :  { %67 = dma.hbm_to_vmem [thread:$0]  %s7780_s4, 2048, %s62_s16, [#allocation9], %s6001_s22, %s6001_s22, %s6002_s27  }
  0x26   :  { %s5856_s14 = scalar_lea.hbm %s7784_s8, 2048 }
  0x27   :  { %p5857_p2 = scmp.ne.s32.totalorder %s7784_s8, %s5856_s14  ;;  %p5860_p3 = scmp.lt.u32.totalorder %s5856_s14, %s7784_s8 }
  0x29   :  { %p5862_p4 = pnand %p5860_p3, %p5857_p2 }
  0x2b   :  { %5865 = shalt.err (!%p5862_p4)
}
  0x2c   :  { %s5866_s21 = scalar_lea.vmem %s90_s18, 2048  ;;  %p5871_p6 = scmp.lt.s32.totalorder %s90_s18, %s90_s18 }
  0x2d   :  { %p5867_p5 = scmp.ne.s32.totalorder %s90_s18, %s5866_s21  ;;  %p5872_p7 = scmp.lt.s32.totalorder %s5866_s21, %s5866_s21 }
  0x2f   :  { %p5873_p8 = por %p5872_p7, %p5871_p6 }
  0x31   :  { %p5874_p9 = pnand %p5873_p8, %p5867_p5 }
  0x33   :  { %5877 = shalt.err (!%p5874_p9)
}
  0x34   :  { %95 = dma.hbm_to_vmem [thread:$0]  %s7784_s8, 2048, %s90_s18, [#allocation12], %s6001_s22, %s6001_s22, %s6002_s27  }
  0x35   :  { %s6003_s23 = smov [#allocation2]   ;;  %s6004_s25 = smov [#allocation7]  }
  0x36   :  { %s28_s24 = sshll.u32 %s6003_s23, 4  ;;  %s47_s26 = sshll.u32 %s6004_s25, 4  ;;  %s29_s24 = int_to_ptr.vmem [resolvable:$true] %s28_s24  ;;  %s48_s26 = int_to_ptr.vmem [resolvable:$true] %s47_s26 }
  0x37   :  { %s5878_s29 = scalar_lea.hbm %s7776_s0, 128 }
  0x38   :  { %p5879_p10 = scmp.ne.s32.totalorder %s7776_s0, %s5878_s29  ;;  %p5882_p11 = scmp.lt.u32.totalorder %s5878_s29, %s7776_s0 }
  0x3a   :  { %p5884_p12 = pnand %p5882_p11, %p5879_p10 }
  0x3c   :  { %5887 = shalt.err (!%p5884_p12)
}
  0x3d   :  { %s5888_s8 = scalar_lea.vmem %s29_s24, 128  ;;  %p5893_p0 = scmp.lt.s32.totalorder %s29_s24, %s29_s24 }
  0x3e   :  { %p5889_p13 = scmp.ne.s32.totalorder %s29_s24, %s5888_s8  ;;  %p5894_p1 = scmp.lt.s32.totalorder %s5888_s8, %s5888_s8 }
  0x40   :  { %p5895_p2 = por %p5894_p1, %p5893_p0 }
  0x42   :  { %p5896_p3 = pnand %p5895_p2, %p5889_p13 }
  0x44   :  { %5899 = shalt.err (!%p5896_p3)
}
  0x45   :  { %31 = dma.hbm_to_vmem [thread:$0]  %s7776_s0, 128, %s29_s24, [#allocation3]  }
  0x46   :  { %s5900_s21 = scalar_lea.hbm %s7778_s2, 2048 }
  0x47   :  { %p5901_p4 = scmp.ne.s32.totalorder %s7778_s2, %s5900_s21  ;;  %p5904_p5 = scmp.lt.u32.totalorder %s5900_s21, %s7778_s2 }
  0x49   :  { %p5906_p6 = pnand %p5904_p5, %p5901_p4 }
  0x4b   :  { %5909 = shalt.err (!%p5906_p6)
}
  0x4c   :  { %s5910_s1 = scalar_lea.vmem %s48_s26, 2048  ;;  %p5915_p8 = scmp.lt.s32.totalorder %s48_s26, %s48_s26 }
  0x4d   :  { %p5911_p7 = scmp.ne.s32.totalorder %s48_s26, %s5910_s1  ;;  %p5916_p9 = scmp.lt.s32.totalorder %s5910_s1, %s5910_s1 }
  0x4f   :  { %p5917_p10 = por %p5916_p9, %p5915_p8 }
  0x51   :  { %p5918_p11 = pnand %p5917_p10, %p5911_p7 }
  0x53   :  { %5921 = shalt.err (!%p5918_p11)
}
  0x54   :  { %53 = dma.hbm_to_vmem [thread:$0]  %s7778_s2, 2048, %s48_s26, [#allocation6], %s6001_s22, %s6001_s22, %s6002_s27  }
  0x55   :  { %s6005_s28 = smov [#allocation10]   ;;  %s5922_s14 = scalar_lea.hbm %s7782_s6, 4096 }
  0x56   :  { %s75_s29 = sshll.u32 %s6005_s28, 4  ;;  %p5923_p12 = scmp.ne.s32.totalorder %s7782_s6, %s5922_s14  ;;  %s76_s29 = int_to_ptr.vmem [resolvable:$true] %s75_s29 }
  0x57   :  { %p5926_p13 = scmp.lt.u32.totalorder %s5922_s14, %s7782_s6 }
  0x59   :  { %p5928_p0 = pnand %p5926_p13, %p5923_p12 }
  0x5b   :  { %5931 = shalt.err (!%p5928_p0)
}
  0x5c   :  { %s5932_s19 = scalar_lea.vmem %s76_s29, 4096  ;;  %p5937_p2 = scmp.lt.s32.totalorder %s76_s29, %s76_s29 }
  0x5d   :  { %p5933_p1 = scmp.ne.s32.totalorder %s76_s29, %s5932_s19  ;;  %p5938_p3 = scmp.lt.s32.totalorder %s5932_s19, %s5932_s19 }
  0x5f   :  { %p5939_p4 = por %p5938_p3, %p5937_p2 }
  0x61   :  { %p5940_p5 = pnand %p5939_p4, %p5933_p1 }
  0x63   :  { %5943 = shalt.err (!%p5940_p5)
}
  0x64   :  { %s6006_s2 = smov 256   ;;  %s6007_s26 = smov 16  }
  0x65   :  { %81 = dma.hbm_to_vmem [thread:$0]  %s7782_s6, 4096, %s76_s29, [#allocation9], %s6006_s2, %s6006_s2, %s6007_s26  }
  0x66   :  { %s6008_s4 = smov [#allocation13]   ;;  %s5944_s1 = scalar_lea.hbm %s7786_s10, 2048 }
  0x67   :  { %s103_s16 = sshll.u32 %s6008_s4, 4  ;;  %p5945_p6 = scmp.ne.s32.totalorder %s7786_s10, %s5944_s1  ;;  %s104_s16 = int_to_ptr.vmem [resolvable:$true] %s103_s16 }
  0x68   :  { %p5948_p7 = scmp.lt.u32.totalorder %s5944_s1, %s7786_s10 }
  0x6a   :  { %p5950_p8 = pnand %p5948_p7, %p5945_p6 }
  0x6c   :  { %5953 = shalt.err (!%p5950_p8)
}
  0x6d   :  { %s5954_s13 = scalar_lea.vmem %s104_s16, 2048  ;;  %p5959_p10 = scmp.lt.s32.totalorder %s104_s16, %s104_s16 }
  0x6e   :  { %p5955_p9 = scmp.ne.s32.totalorder %s104_s16, %s5954_s13  ;;  %p5960_p11 = scmp.lt.s32.totalorder %s5954_s13, %s5954_s13 }
  0x70   :  { %p5961_p12 = por %p5960_p11, %p5959_p10 }
  0x72   :  { %p5962_p13 = pnand %p5961_p12, %p5955_p9 }
  0x74   :  { %5965 = shalt.err (!%p5962_p13)
}
  0x75   :  { %109 = dma.hbm_to_vmem [thread:$0]  %s7786_s10, 2048, %s104_s16, [#allocation12], %s6001_s22, %s6001_s22, %s6002_s27  }
  0x76   :  { %5988 = dma.done.wait [#allocation3], 128  }
  0x77   :  { %5989 = vsyncadd [#allocation3], 4294967168 }
  0x78   :  { %5990 = dma.done.wait [#allocation6], 2176  }
  0x79   :  { %5991 = vsyncadd [#allocation6], 4294965120 }
  0x7a   :  { %5992 = dma.done.wait [#allocation9], 6144  }
  0x7b   :  { %5993 = vsyncadd [#allocation9], 4294961152 }
  0x7c   :  { %5994 = dma.done.wait [#allocation12], 4096  }
  0x7d   :  { %5995 = vsyncadd [#allocation12], 4294963200  ;;  %v7805_v0 = vmov 0.0|0.0   ;;  %vm6010_vm0 = vmmov 0   ;;  %v7799_v1 = vmov 0.0   ;;  %v134_v2 = vld [vmem:[#allocation7] sm:$0xff] }
  0x7e   :  { %4972 = vmatprep.subr.bf16.mxu1 %v7805_v0  ;;  %5044 = vmatprep.subr.bf16.mxu0 %v7805_v0  ;;  %v135_v3 = vld [vmem:[#allocation7 + $0x8] sm:$0xff]  ;;  %v136_v4 = vld [vmem:[#allocation7 + $0x10] sm:$0xff]  ;;  %v158_v5 = vand.u32 4294901760, %v134_v2  ;;  %v137_v7 = vld [vmem:[#allocation7 + $0x18] sm:$0xff]  ;;  %s6012_s18 = smov [#allocation14]  }
  0x7f   :  { %4164 = vmatprep.mubr.msk.f32.mxu1 %vm6010_vm0, %v7799_v1  ;;  %4269 = vmatprep.mubr.msk.f32.mxu0 %vm6010_vm0, %v7799_v1  ;;  %v161_v6 = vand.u32 4294901760, %v135_v3  ;;  %v164_v8 = vand.u32 4294901760, %v136_v4  ;;  %v167_v9 = vand.u32 4294901760, %v137_v7  ;;  %v138_v10 = vld [vmem:[#allocation7 + $0x20] sm:$0xff]  ;;  %v139_v11 = vld [vmem:[#allocation7 + $0x28] sm:$0xff]  ;;  %v6188_v16 = vld [vmem:[#allocation7 + $0x30] sm:$0xff] }
  0x80   :  { %v170_v14 = vand.u32 4294901760, %v138_v10  ;;  %v173_v15 = vand.u32 4294901760, %v139_v11  ;;  %v6190_v17 = vld [vmem:[#allocation7 + $0x38] sm:$0xff]  ;;  %v176_v19 = vand.u32 4294901760, %v6188_v16  ;;  %v142_v21 = vld [vmem:[#allocation7 + $0x40] sm:$0xff]  ;;  %v143_v22 = vld [vmem:[#allocation7 + $0x48] sm:$0xff]  ;;  %v6208_v27 = vsub.f32 %v134_v2, %v158_v5 }
  0x81   :  { %v6180_v12 = vpack.c.bf16 %v161_v6, %v158_v5  ;;  %v6184_v13 = vpack.c.bf16 %v167_v9, %v164_v8  ;;  %v179_v20 = vand.u32 4294901760, %v6190_v17  ;;  %v182_v24 = vand.u32 4294901760, %v142_v21  ;;  %v133_v26 = vld [vmem:[#allocation2] sm:$0xff]  ;;  %v6216_v30 = vld [vmem:[#allocation7 + $0x58] sm:$0xff]  ;;  %v6232_v37 = vld [vmem:[#allocation7 + $0x60] sm:$0xff]  ;;  %s3708_s17 = sshll.u32 %s6012_s18, 4  ;;  %s3709_s17 = int_to_ptr.vmem [resolvable:$true] %s3708_s17 }
  0x82   :  { %v6194_v18 = vpack.c.bf16 %v173_v15, %v170_v14  ;;  %v185_v25 = vand.u32 4294901760, %v143_v22  ;;  %v6210_v28 = vsub.f32 %v135_v3, %v161_v6  ;;  %v6214_v29 = vld [vmem:[#allocation7 + $0x50] sm:$0xff]  ;;  %v6218_v31 = vand.u32 4294901760, %v133_v26  ;;  %v6234_v38 = vld [vmem:[#allocation7 + $0x68] sm:$0xff]  ;;  %v6255_v47 = vld [vmem:[#allocation7 + $0x78] sm:$0xff]  ;;  %s5966_s19 = scalar_lea.vmem %s3709_s17, 512  ;;  %p5971_p1 = scmp.lt.s32.totalorder %s3709_s17, %s3709_s17 }
  0x83   :  { %4974 = vmatpush3.bf16.msra.mxu1 %v6180_v12  ;;  %5046 = vmatpush3.bf16.msra.mxu0 %v6180_v12  ;;  %v6206_v23 = vpack.c.bf16 %v179_v20, %v176_v19  ;;  %v6220_v32 = vsub.f32 %v136_v4, %v164_v8  ;;  %v188_v34 = vand.u32 4294901760, %v6214_v29  ;;  %v191_v35 = vand.u32 4294901760, %v6216_v30  ;;  %v6253_v46 = vld [vmem:[#allocation7 + $0x70] sm:$0xff]  ;;  %v6286_v63 = vld [vmem:[#allocation8] sm:$0xff]  ;;  %v6298_v4 = vld [vmem:[#allocation8 + $0x8] sm:$0xff]  ;;  %p5967_p0 = scmp.ne.s32.totalorder %s3709_s17, %s5966_s19  ;;  %p5972_p2 = scmp.lt.s32.totalorder %s5966_s19, %s5966_s19 }
  0x84   :  { %4975 = vmatprep.subr.bf16.mxu1 %v7805_v0  ;;  %5047 = vmatprep.subr.bf16.mxu0 %v7805_v0  ;;  %v6224_v33 = vpack.c.bf16 %v185_v25, %v182_v24  ;;  %v6228_v36 = vsub.f32 %v137_v7, %v167_v9  ;;  %v251_v39 = vand.u32 4294901760, %v6208_v27  ;;  %v258_v40 = vand.u32 4294901760, %v6210_v28  ;;  %v6311_v9 = vld [vmem:[#allocation8 + $0x10] sm:$0xff] }
  0x85   :  { %v6238_v41 = vsub.f32 %v138_v10, %v170_v14  ;;  %v6241_v42 = vsub.f32 %v133_v26, %v6218_v31  ;;  %v6249_v43 = vpack.c.bf16 %v191_v35, %v188_v34  ;;  %v194_v44 = vand.u32 4294901760, %v6232_v37  ;;  %v6313_v10 = vld [vmem:[#allocation8 + $0x18] sm:$0xff]  ;;  %p5973_p3 = por %p5972_p2, %p5971_p1 }
  0x86   :  { %v7801_v45 = vand.u32 4294901760, %v6234_v38  ;;  %v265_v48 = vand.u32 4294901760, %v6220_v32  ;;  %v6258_v49 = vsub.f32 %v139_v11, %v173_v15  ;;  %v252_v50 = vsub.f32 %v6208_v27, %v251_v39 }
  0x87   :  { %4977 = vmatpush3.bf16.msra.mxu1 %v6184_v13  ;;  %5049 = vmatpush3.bf16.msra.mxu0 %v6184_v13  ;;  %v259_v51 = vsub.f32 %v6210_v28, %v258_v40  ;;  %v272_v52 = vand.u32 4294901760, %v6228_v36  ;;  %v7792_v53 = vand.u32 4294901760, %v6253_v46  ;;  %v7790_v54 = vand.u32 4294901760, %v6255_v47  ;;  %p5974_p4 = pnand %p5973_p3, %p5967_p0 }
  0x88   :  { %4978 = vmatprep.subr.bf16.mxu1 %v7805_v0  ;;  %5050 = vmatprep.subr.bf16.mxu0 %v7805_v0  ;;  %v240_v55 = vand.u32 4294901760, %v6241_v42  ;;  %v6274_v56 = vpack.c.bf16 %v7801_v45, %v194_v44  ;;  %v6279_v57 = vsub.f32 %v6220_v32, %v265_v48  ;;  %v7796_v58 = vand.u32 4294901760, %v6238_v41 }
  0x89   :  { %v253_v59 = vand.u32 4294901760, %v252_v50  ;;  %v260_v60 = vand.u32 4294901760, %v259_v51  ;;  %v273_v61 = vsub.f32 %v6228_v36, %v272_v52  ;;  %v7794_v62 = vand.u32 4294901760, %v6258_v49  ;;  %v6342_v51 = vld [vmem:[#allocation8 + $0x38] sm:$0xff] }
  0x8a   :  { %v6291_v2 = vsub.f32 %v6188_v16, %v176_v19  ;;  %v6296_v3 = vsub.f32 %v6190_v17, %v179_v20  ;;  %v6300_v5 = vsub.f32 %v142_v21, %v182_v24  ;;  %v6302_v6 = vsub.f32 %v143_v22, %v185_v25  ;;  %v6322_v17 = vld [vmem:[#allocation8 + $0x20] sm:$0xff]  ;;  %v6324_v19 = vld [vmem:[#allocation8 + $0x28] sm:$0xff]  ;;  %v6332_v25 = vld [vmem:[#allocation8 + $0x30] sm:$0xff] }
  0x8b   :  { %4980 = vmatpush3.bf16.msra.mxu1 %v6194_v18  ;;  %5052 = vmatpush3.bf16.msra.mxu0 %v6194_v18  ;;  %v6308_v7 = vpack.c.bf16 %v7790_v54, %v7792_v53  ;;  %v241_v8 = vsub.f32 %v6241_v42, %v240_v55  ;;  %v5069_v11 = vpack.c.bf16 %v258_v40, %v251_v39  ;;  %v267_v14 = vand.u32 4294901760, %v6279_v57 }
  0x8c   :  { %4981 = vmatprep.subr.bf16.mxu1 %v7805_v0  ;;  %5053 = vmatprep.subr.bf16.mxu0 %v7805_v0  ;;  %v280_v15 = vsub.f32 %v6238_v41, %v7796_v58  ;;  %v7789_v16 = vand.u32 4294901760, %v6286_v63  ;;  %v4997_v20 = vpack.c.bf16 %v260_v60, %v253_v59  ;;  %v274_v21 = vand.u32 4294901760, %v273_v61 }
  0x8d   :  { %v287_v22 = vsub.f32 %v6258_v49, %v7794_v62  ;;  %v7791_v24 = vand.u32 4294901760, %v6298_v4  ;;  %v293_v26 = vand.u32 4294901760, %v6291_v2  ;;  %v7793_v40 = vand.u32 4294901760, %v6311_v9 }
  0x8e   :  { %v6338_v39 = vsub.f32 %v6286_v63, %v7789_v16  ;;  %v7795_v50 = vand.u32 4294901760, %v6313_v10  ;;  %v242_v57 = vand.u32 4294901760, %v241_v8  ;;  %v7797_v60 = vand.u32 4294901760, %v6322_v17 }
  0x8f   :  { %4983 = vmatpush3.bf16.msra.mxu1 %v6206_v23  ;;  %5055 = vmatpush3.bf16.msra.mxu0 %v6206_v23  ;;  %v6347_v59 = vsub.f32 %v6298_v4, %v7791_v24  ;;  %v7798_v61 = vand.u32 4294901760, %v6324_v19  ;;  %v300_v16 = vand.u32 4294901760, %v6296_v3  ;;  %v6357_v54 = vsub.f32 %v6311_v9, %v7793_v40 }
  0x90   :  { %4984 = vmatprep.subr.bf16.mxu1 %v7805_v0  ;;  %5056 = vmatprep.subr.bf16.mxu0 %v7805_v0  ;;  %v6362_v8 = vsub.f32 %v6313_v10, %v7795_v50  ;;  %v7803_v24 = vand.u32 4294901760, %v6332_v25  ;;  %v6370_v53 = vsub.f32 %v6322_v17, %v7797_v60  ;;  %v7802_v62 = vand.u32 4294901760, %v6342_v51 }
  0x91   :  { %v6375_v40 = vsub.f32 %v6324_v19, %v7798_v61  ;;  %v6381_v50 = vsub.f32 %v6214_v29, %v188_v34  ;;  %v6386_v58 = vsub.f32 %v6216_v30, %v191_v35  ;;  %v5072_v60 = vpack.c.bf16 %v272_v52, %v265_v48 }
  0x92   :  { %v6393_v61 = vsub.f32 %v6332_v25, %v7803_v24  ;;  %v281_v1 = vand.u32 4294901760, %v280_v15  ;;  %v288_v45 = vand.u32 4294901760, %v287_v22  ;;  %v307_v29 = vand.u32 4294901760, %v6300_v5 }
  0x93   :  { %4986 = vmatpush3.bf16.msra.mxu1 %v6224_v33  ;;  %5058 = vmatpush3.bf16.msra.mxu0 %v6224_v33  ;;  %v6399_v34 = vsub.f32 %v6342_v51, %v7802_v62  ;;  %v5000_v30 = vpack.c.bf16 %v274_v21, %v267_v14  ;;  %v294_v35 = vsub.f32 %v6291_v2, %v293_v26  ;;  %v314_v52 = vand.u32 4294901760, %v6302_v6 }
  0x94   :  { %4987 = vmatprep.subr.bf16.mxu1 %v7805_v0  ;;  %5059 = vmatprep.subr.bf16.mxu0 %v7805_v0  ;;  %7917 = vst [vmem:[#allocation20_spill] sm:$0xff] %v6393_v61  ;;  %v301_v48 = vsub.f32 %v6296_v3, %v300_v16  ;;  %v7919_v15 = vand.u32 4294901760, %v6234_v38  ;;  %v7920_v14 = vmov 0.0   ;;  %v7921_v21 = vand.u32 4294901760, %v6238_v41 }
  0x95   :  { %7918 = vst [vmem:[#allocation21_spill] sm:$0xff] %v6399_v34  ;;  %v7922_v22 = vand.u32 4294901760, %v6258_v49  ;;  %v315_v62 = vsub.f32 %v6302_v6, %v314_v52  ;;  %v328_v24 = vand.u32 4294901760, %v6386_v58 }
  0x97   :  { %4989 = vmatpush3.bf16.msra.mxu1 %v6249_v43  ;;  %5061 = vmatpush3.bf16.msra.mxu0 %v6249_v43  ;;  %v329_v61 = vsub.f32 %v6386_v58, %v328_v24 }
  0x98   :  { %4990 = vmatprep.subr.bf16.mxu1 %v7805_v0  ;;  %5062 = vmatprep.subr.bf16.mxu0 %v7805_v0 }
  0x9b   :  { %4992 = vmatpush3.bf16.msra.mxu1 %v6274_v56  ;;  %5064 = vmatpush3.bf16.msra.mxu0 %v6274_v56 }
  0x9c   :  { %4993 = vmatprep.subr.bf16.mxu1 %v7805_v0  ;;  %5065 = vmatprep.subr.bf16.mxu0 %v7805_v0 }
  0x9f   :  { %4995 = vmatpush3.bf16.msra.mxu1 %v6308_v7  ;;  %5067 = vmatpush3.bf16.msra.mxu0 %v6308_v7 }
  0xa0   :  { %4996 = vmatprep.subr.bf16.mxu1 %v7805_v0  ;;  %5068 = vmatprep.subr.bf16.mxu0 %v7805_v0 }
  0xa2   :  { %4165 = vmatmul.mubr.f32.vlgmr.msra.gmra.mrb[0].mxu1 %v242_v57  ;;  %4270 = vmatmul.mubr.f32.vlgmr.msra.gmra.mrb[0].mxu0 %v240_v55  ;;  %v6409_v55 = vsub.f32 %v6232_v37, %v194_v44  ;;  %v5075_v57 = vpack.c.bf16 %v7922_v22, %v7921_v21  ;;  %v308_v37 = vsub.f32 %v6300_v5, %v307_v29  ;;  %v321_v44 = vand.u32 4294901760, %v6381_v50 }
  0xa3   :  { %4998 = vmatpush3.bf16.msra.mxu1 %v4997_v20  ;;  %5070 = vmatpush3.bf16.msra.mxu0 %v5069_v11  ;;  %v6414_v11 = vsub.f32 %v6234_v38, %v7919_v15  ;;  %v5003_v20 = vpack.c.bf16 %v288_v45, %v281_v1  ;;  %v295_v38 = vand.u32 4294901760, %v294_v35  ;;  %v302_v15 = vand.u32 4294901760, %v301_v48 }
  0xa4   :  { %4999 = vmatprep.subr.bf16.mxu1 %v7805_v0  ;;  %5071 = vmatprep.subr.bf16.mxu0 %v7805_v0  ;;  %v7923_v1 = vand.u32 4294901760, %v6253_v46  ;;  %v7924_v21 = vand.u32 4294901760, %v6255_v47  ;;  %v309_v35 = vand.u32 4294901760, %v308_v37  ;;  %v322_v48 = vsub.f32 %v6381_v50, %v321_v44 }
  0xa5   :  { %4199 = vmatprep.mubr.msk.f32.mxu1 %vm6010_vm0, %v7920_v14  ;;  %4304 = vmatprep.mubr.msk.f32.mxu0 %vm6010_vm0, %v7920_v14  ;;  %v335_v22 = vand.u32 4294901760, %v6409_v55  ;;  %v5006_v34 = vpack.c.bf16 %v302_v15, %v295_v38  ;;  %v5084_v38 = vpack.c.bf16 %v328_v24, %v321_v44 }
  0xa6   :  { %v6433_v45 = vsub.f32 %v6253_v46, %v7923_v1  ;;  %v342_v46 = vand.u32 4294901760, %v6414_v11  ;;  %v7925_v1 = vmov 0.0|0.0  }
  0xa7   :  { %5001 = vmatpush3.bf16.msra.mxu1 %v5000_v30  ;;  %5073 = vmatpush3.bf16.msra.mxu0 %v5072_v60  ;;  %v6438_v30 = vsub.f32 %v6255_v47, %v7924_v21  ;;  %v5078_v60 = vpack.c.bf16 %v300_v16, %v293_v26  ;;  %v5081_v47 = vpack.c.bf16 %v314_v52, %v307_v29  ;;  %v323_v21 = vand.u32 4294901760, %v322_v48 }
  0xa8   :  { %5002 = vmatprep.subr.bf16.mxu1 %v7805_v0  ;;  %5074 = vmatprep.subr.bf16.mxu0 %v7805_v0  ;;  %v316_v0 = vand.u32 4294901760, %v315_v62  ;;  %v336_v16 = vsub.f32 %v6409_v55, %v335_v22  ;;  %v349_v26 = vand.u32 4294901760, %v6433_v45  ;;  %v343_v62 = vsub.f32 %v6414_v11, %v342_v46 }
  0xa9   :  { %v356_v37 = vand.u32 4294901760, %v6438_v30 }
  0xaa   :  { %v337_v15 = vand.u32 4294901760, %v336_v16  ;;  %v344_v52 = vand.u32 4294901760, %v343_v62  ;;  %v350_v48 = vsub.f32 %v6433_v45, %v349_v26 }
  0xab   :  { %5004 = vmatpush3.bf16.msra.mxu1 %v5003_v20  ;;  %5076 = vmatpush3.bf16.msra.mxu0 %v5075_v57  ;;  %v5009_v20 = vpack.c.bf16 %v316_v0, %v309_v35  ;;  %v330_v57 = vand.u32 4294901760, %v329_v61  ;;  %v5087_v61 = vpack.c.bf16 %v342_v46, %v335_v22  ;;  %v5090_v44 = vpack.c.bf16 %v356_v37, %v349_v26  ;;  %v814_v46 = vld [vmem:[#allocation8 + $0x78] sm:$0xff] }
  0xac   :  { %5005 = vmatprep.subr.bf16.mxu1 %v7925_v1  ;;  %5077 = vmatprep.subr.bf16.mxu0 %v7925_v1  ;;  %v5015_v0 = vpack.c.bf16 %v344_v52, %v337_v15  ;;  %v5024_v22 = vpack.c.bf16 %v6228_v36, %v6220_v32  ;;  %v7926_v32 = vand.u32 4294901760, %v6286_v63  ;;  %v7933_v63 = vand.u32 4294901760, %v6342_v51  ;;  %v812_v51 = vld [vmem:[#allocation8 + $0x68] sm:$0xff] }
  0xad   :  { %v5012_v29 = vpack.c.bf16 %v330_v57, %v323_v21  ;;  %v868_v16 = vand.u32 4294901760, %v814_v46  ;;  %v7824_v26 = vand.u32 4294901760, %v6338_v39 }
  0xaf   :  { %5007 = vmatpush3.bf16.msra.mxu1 %v5006_v34  ;;  %5079 = vmatpush3.bf16.msra.mxu0 %v5078_v60  ;;  %v357_v34 = vsub.f32 %v6438_v30, %v356_v37  ;;  %v351_v60 = vand.u32 4294901760, %v350_v48  ;;  %v917_v62 = vsub.f32 %v6338_v39, %v7824_v26 }
  0xb0   :  { %5008 = vmatprep.subr.bf16.mxu1 %v7925_v1  ;;  %5080 = vmatprep.subr.bf16.mxu0 %v7925_v1 }
  0xb1   :  { %v358_v35 = vand.u32 4294901760, %v357_v34 }
  0xb3   :  { %5010 = vmatpush3.bf16.msra.mxu1 %v5009_v20  ;;  %5082 = vmatpush3.bf16.msra.mxu0 %v5081_v47  ;;  %v5018_v24 = vpack.c.bf16 %v358_v35, %v351_v60  ;;  %v5021_v47 = vpack.c.bf16 %v6210_v28, %v6208_v27  ;;  %v5027_v27 = vpack.c.bf16 %v6258_v49, %v6238_v41  ;;  %v7928_v41 = vand.u32 4294901760, %v6311_v9  ;;  %v809_v9 = vld [vmem:[#allocation8 + $0x50] sm:$0xff] }
  0xb4   :  { %5011 = vmatprep.subr.bf16.mxu1 %v7925_v1  ;;  %5083 = vmatprep.subr.bf16.mxu0 %v7925_v1  ;;  %v5042_v28 = vpack.c.bf16 %v6438_v30, %v6433_v45  ;;  %v813_v30 = vld [vmem:[#allocation8 + $0x70] sm:$0xff]  ;;  %v7823_v20 = vand.u32 4294901760, %v6347_v59  ;;  %v918_v60 = vand.u32 4294901760, %v917_v62 }
  0xb5   :  { %v865_v21 = vand.u32 4294901760, %v813_v30 }
  0xb6   :  { %v924_v37 = vsub.f32 %v6347_v59, %v7823_v20  ;;  %v1478_v20 = vld [vmem:[#allocation10 + $0x70] sm:$0xff] }
  0xb7   :  { %5013 = vmatpush3.bf16.msra.mxu1 %v5012_v29  ;;  %5085 = vmatpush3.bf16.msra.mxu0 %v5084_v38  ;;  %v6558_v57 = vpack.c.bf16 %v868_v16, %v865_v21 }
  0xb8   :  { %5014 = vmatprep.subr.bf16.mxu1 %v7925_v1  ;;  %5086 = vmatprep.subr.bf16.mxu0 %v7925_v1  ;;  %v925_v35 = vand.u32 4294901760, %v924_v37 }
  0xbb   :  { %5016 = vmatpush3.bf16.msra.mxu1 %v5015_v0  ;;  %5088 = vmatpush3.bf16.msra.mxu0 %v5087_v61  ;;  %v6579_v0 = vsub.f32 %v813_v30, %v865_v21  ;;  %v6581_v61 = vsub.f32 %v814_v46, %v868_v16 }
  0xbc   :  { %5017 = vmatprep.subr.bf16.mxu1 %v7925_v1  ;;  %5089 = vmatprep.subr.bf16.mxu0 %v7925_v1 }
  0xbf   :  { %5019 = vmatpush3.bf16.msra.mxu1 %v5018_v24  ;;  %5091 = vmatpush3.bf16.msra.mxu0 %v5090_v44  ;;  %v7821_v24 = vand.u32 4294901760, %v6357_v54  ;;  %v7820_v44 = vand.u32 4294901760, %v6362_v8 }
  0xc0   :  { %5020 = vmatprep.subr.bf16.mxu1 %v7925_v1  ;;  %5092 = vmatprep.subr.bf16.mxu0 %v7925_v1 }
  0xc2   :  { %4200 = vmatmul.mubr.f32.vlgmr.msra.gmra.mrb[0].mxu1 %v6218_v31  ;;  %4305 = vmatmul.mubr.f32.vlgmr.msra.gmra.mrb[0].mxu0 %v6218_v31 }
  0xc3   :  { %5022 = vmatpush3.bf16.msra.mxu1 %v5021_v47  ;;  %5094 = vmatpush3.bf16.msra.mxu0 %v6180_v12  ;;  %v5030_v12 = vpack.c.bf16 %v6296_v3, %v6291_v2  ;;  %v807_v3 = vld [vmem:[#allocation8 + $0x40] sm:$0xff]  ;;  %v6586_v47 = vpack.c.bf16 %v925_v35, %v918_v60 }
  0xc4   :  { %5023 = vmatprep.subr.bf16.mxu1 %v7925_v1  ;;  %5095 = vmatprep.subr.bf16.mxu0 %v7925_v1 }
  0xc5   :  { %4234 = vmatprep.mubr.msk.f32.mxu1 %vm6010_vm0, %v7920_v14  ;;  %4339 = vmatprep.mubr.msk.f32.mxu0 %vm6010_vm0, %v7920_v14 }
  0xc7   :  { %5025 = vmatpush3.bf16.msra.mxu1 %v5024_v22  ;;  %5097 = vmatpush3.bf16.msra.mxu0 %v6184_v13  ;;  %v5033_v13 = vpack.c.bf16 %v6302_v6, %v6300_v5  ;;  %v847_v5 = vand.u32 4294901760, %v807_v3  ;;  %v931_v22 = vsub.f32 %v6357_v54, %v7821_v24 }
  0xc8   :  { %5026 = vmatprep.subr.bf16.mxu1 %v7925_v1  ;;  %5098 = vmatprep.subr.bf16.mxu0 %v7925_v1 }
  0xc9   :  { %v6566_v38 = vsub.f32 %v807_v3, %v847_v5 }
  0xcb   :  { %5028 = vmatpush3.bf16.msra.mxu1 %v5027_v27  ;;  %5100 = vmatpush3.bf16.msra.mxu0 %v6194_v18  ;;  %v5036_v18 = vpack.c.bf16 %v6386_v58, %v6381_v50  ;;  %v7932_v58 = vand.u32 4294901760, %v6332_v25  ;;  %v811_v50 = vld [vmem:[#allocation8 + $0x60] sm:$0xff]  ;;  %v938_v27 = vsub.f32 %v6362_v8, %v7820_v44 }
  0xcc   :  { %5029 = vmatprep.subr.bf16.mxu1 %v7925_v1  ;;  %5101 = vmatprep.subr.bf16.mxu0 %v7925_v1 }
  0xcd   :  { %v6539_v2 = vpack.c.bf16 %v7933_v63, %v7932_v58  ;;  %v7935_v58 = vld [vmem:[#allocation21_spill] sm:$0xff] }
  0xce   :  { %v7816_v63 = vand.u32 4294901760, %v7935_v58 }
  0xcf   :  { %5031 = vmatpush3.bf16.msra.mxu1 %v5030_v12  ;;  %5103 = vmatpush3.bf16.msra.mxu0 %v6206_v23  ;;  %v5039_v23 = vpack.c.bf16 %v6414_v11, %v6409_v55  ;;  %v859_v55 = vand.u32 4294901760, %v811_v50  ;;  %v862_v11 = vand.u32 4294901760, %v812_v51  ;;  %v7819_v12 = vand.u32 4294901760, %v6370_v53 }
  0xd0   :  { %5032 = vmatprep.subr.bf16.mxu1 %v7925_v1  ;;  %5104 = vmatprep.subr.bf16.mxu0 %v7925_v1 }
  0xd1   :  { %v6552_v45 = vpack.c.bf16 %v862_v11, %v859_v55  ;;  %v6575_v48 = vsub.f32 %v811_v50, %v859_v55  ;;  %v6577_v34 = vsub.f32 %v812_v51, %v862_v11 }
  0xd3   :  { %5034 = vmatpush3.bf16.msra.mxu1 %v5033_v13  ;;  %5106 = vmatpush3.bf16.msra.mxu0 %v6224_v33  ;;  %v7927_v33 = vand.u32 4294901760, %v6298_v4  ;;  %v808_v4 = vld [vmem:[#allocation8 + $0x48] sm:$0xff]  ;;  %v7818_v13 = vand.u32 4294901760, %v6375_v40  ;;  %v7811_v35 = vand.u32 4294901760, %v6575_v48 }
  0xd4   :  { %5035 = vmatprep.subr.bf16.mxu1 %v7925_v1  ;;  %5107 = vmatprep.subr.bf16.mxu0 %v7925_v1  ;;  %v850_v6 = vand.u32 4294901760, %v808_v4 }
  0xd5   :  { %v6510_v36 = vpack.c.bf16 %v7927_v33, %v7926_v32  ;;  %v952_v32 = vsub.f32 %v6375_v40, %v7818_v13 }
  0xd6   :  { %v6568_v15 = vsub.f32 %v808_v4, %v850_v6 }
  0xd7   :  { %5037 = vmatpush3.bf16.msra.mxu1 %v5036_v18  ;;  %5109 = vmatpush3.bf16.msra.mxu0 %v6249_v43  ;;  %v7929_v43 = vand.u32 4294901760, %v6313_v10  ;;  %v810_v10 = vld [vmem:[#allocation8 + $0x58] sm:$0xff]  ;;  %v932_v18 = vand.u32 4294901760, %v931_v22  ;;  %v7810_v22 = vand.u32 4294901760, %v6577_v34 }
  0xd8   :  { %5038 = vmatprep.subr.bf16.mxu1 %v7925_v1  ;;  %5110 = vmatprep.subr.bf16.mxu0 %v7925_v1 }
  0xd9   :  { %v6520_v49 = vpack.c.bf16 %v7929_v43, %v7928_v41  ;;  %v953_v43 = vand.u32 4294901760, %v952_v32 }
  0xdb   :  { %5040 = vmatpush3.bf16.msra.mxu1 %v5039_v23  ;;  %5112 = vmatpush3.bf16.msra.mxu0 %v6274_v56  ;;  %v939_v23 = vand.u32 4294901760, %v938_v27 }
  0xdc   :  { %5041 = vmatprep.subr.bf16.mxu1 %v7925_v1  ;;  %5113 = vmatprep.subr.bf16.mxu0 %v7925_v1 }
  0xdd   :  { %v6602_v33 = vpack.c.bf16 %v939_v23, %v932_v18  ;;  %v1001_v18 = vsub.f32 %v6575_v48, %v7811_v35  ;;  %v1008_v23 = vsub.f32 %v6577_v34, %v7810_v22 }
  0xdf   :  { %5043 = vmatpush3.bf16.msra.mxu1 %v5042_v28  ;;  %5115 = vmatpush3.bf16.msra.mxu0 %v6308_v7  ;;  %v6544_v7 = vpack.c.bf16 %v850_v6, %v847_v5  ;;  %v945_v28 = vsub.f32 %v6370_v53, %v7819_v12  ;;  %v966_v5 = vsub.f32 %v7935_v58, %v7816_v63  ;;  %v1009_v32 = vand.u32 4294901760, %v1008_v23  ;;  %v1472_v63 = vld [vmem:[#allocation10 + $0x40] sm:$0xff]  ;;  %v1481_v23 = vld [vmem:[#allocation10 + $0x88] sm:$0xff] }
  0xe0   :  { %5116 = vmatprep.subr.bf16.mxu1 %v7925_v1 }
  0xe1   :  { %v946_v41 = vand.u32 4294901760, %v945_v28  ;;  %v1002_v28 = vand.u32 4294901760, %v1001_v18  ;;  %v1483_v18 = vld [vmem:[#allocation10 + $0x98] sm:$0xff] }
  0xe2   :  { %4235 = vmatmul.mubr.f32.vlgmr.msra.gmra.mrb[0].mxu1 %v6241_v42  ;;  %4340 = vmatmul.mubr.f32.vlgmr.msra.gmra.mrb[0].mxu0 %v6218_v31  ;;  %v7930_v42 = vand.u32 4294901760, %v6322_v17  ;;  %v7931_v31 = vand.u32 4294901760, %v6324_v19  ;;  %v853_v17 = vand.u32 4294901760, %v809_v9  ;;  %v856_v19 = vand.u32 4294901760, %v810_v10 }
  0xe3   :  { %5118 = vmatpush3.bf16.msra.mxu1 %v6510_v36  ;;  %4374 = vmatprep.mubr.msk.f32.mxu1 %vm6010_vm0, %v7920_v14  ;;  %v5147_v3 = vpack.c.bf16 %v953_v43, %v946_v41  ;;  %v7809_v41 = vand.u32 4294901760, %v6579_v0  ;;  %v7808_v43 = vand.u32 4294901760, %v6581_v61 }
  0xe4   :  { %5119 = vmatprep.subr.bf16.mxu1 %v7925_v1  ;;  %1604 = vmatprep.mubr.f32.mxu0 %v7920_v14  ;;  %v6531_v56 = vpack.c.bf16 %v7931_v31, %v7930_v42  ;;  %v6548_v25 = vpack.c.bf16 %v856_v19, %v853_v17  ;;  %v6570_v29 = vsub.f32 %v809_v9, %v853_v17  ;;  %v7934_v42 = vld [vmem:[#allocation20_spill] sm:$0xff]  ;;  %v967_v9 = vand.u32 4294901760, %v966_v5 }
  0xe5   :  { %v6572_v52 = vsub.f32 %v810_v10, %v856_v19  ;;  %v7817_v31 = vand.u32 4294901760, %v7934_v42  ;;  %v7815_v10 = vand.u32 4294901760, %v6566_v38  ;;  %v7814_v17 = vand.u32 4294901760, %v6568_v15 }
  0xe6   :  { %v7813_v30 = vand.u32 4294901760, %v6570_v29  ;;  %v1015_v5 = vsub.f32 %v6579_v0, %v7809_v41 }
  0xe7   :  { %5121 = vmatpush3.bf16.msra.mxu1 %v6520_v49  ;;  %v959_v4 = vsub.f32 %v7934_v42, %v7817_v31  ;;  %v973_v50 = vsub.f32 %v6566_v38, %v7815_v10  ;;  %v980_v51 = vsub.f32 %v6568_v15, %v7814_v17  ;;  %v7812_v46 = vand.u32 4294901760, %v6572_v52  ;;  %v1475_v10 = vld [vmem:[#allocation10 + $0x58] sm:$0xff]  ;;  %v1474_v31 = vld [vmem:[#allocation10 + $0x50] sm:$0xff] }
  0xe8   :  { %5122 = vmatprep.subr.bf16.mxu1 %v7925_v1  ;;  %v987_v16 = vsub.f32 %v6570_v29, %v7813_v30 }
  0xe9   :  { %v960_v6 = vand.u32 4294901760, %v959_v4  ;;  %v974_v55 = vand.u32 4294901760, %v973_v50  ;;  %v981_v11 = vand.u32 4294901760, %v980_v51  ;;  %v994_v62 = vsub.f32 %v6572_v52, %v7812_v46 }
  0xea   :  { %v988_v37 = vand.u32 4294901760, %v987_v16  ;;  %v5159_v4 = vpack.c.bf16 %v1009_v32, %v1002_v28  ;;  %v3720_v28 = vld [vmem:[%s7779_s3] ss:$0 sm:$0xff] }
  0xeb   :  { %5124 = vmatpush3.bf16.msra.mxu1 %v6531_v56  ;;  %v5150_v19 = vpack.c.bf16 %v967_v9, %v960_v6  ;;  %v5153_v21 = vpack.c.bf16 %v981_v11, %v974_v55  ;;  %v995_v60 = vand.u32 4294901760, %v994_v62  ;;  %v1022_v6 = vsub.f32 %v6581_v61, %v7808_v43 }
  0xec   :  { %5125 = vmatprep.subr.bf16.mxu1 %v7925_v1  ;;  %v1016_v9 = vand.u32 4294901760, %v1015_v5  ;;  %v5165_v55 = vpack.c.bf16 %v6347_v59, %v6338_v39  ;;  %v5168_v11 = vpack.c.bf16 %v6362_v8, %v6357_v54 }
  0xed   :  { %v5156_v27 = vpack.c.bf16 %v995_v60, %v988_v37  ;;  %v1023_v50 = vand.u32 4294901760, %v1022_v6  ;;  %v1480_v60 = vld [vmem:[#allocation10 + $0x80] sm:$0xff] }
  0xef   :  { %5127 = vmatpush3.bf16.msra.mxu1 %v6539_v2  ;;  %v5162_v51 = vpack.c.bf16 %v1023_v50, %v1016_v9 }
  0xf0   :  { %5128 = vmatprep.subr.bf16.mxu1 %v7925_v1 }
  0xf3   :  { %5130 = vmatpush3.bf16.msra.mxu1 %v6544_v7 }
  0xf4   :  { %5131 = vmatprep.subr.bf16.mxu1 %v7925_v1 }
  0xf7   :  { %5133 = vmatpush3.bf16.msra.mxu1 %v6548_v25 }
  0xf8   :  { %5134 = vmatprep.subr.bf16.mxu1 %v7925_v1 }
  0xfb   :  { %5136 = vmatpush3.bf16.msra.mxu1 %v6552_v45 }
  0xfc   :  { %5137 = vmatprep.subr.bf16.mxu1 %v7925_v1 }
  0xff   :  { %5139 = vmatpush3.bf16.msra.mxu1 %v6558_v57 }
 0x100   :  { %5140 = vmatprep.subr.bf16.mxu1 %v7925_v1 }
 0x1b5   :  { %v499_v32 = vpop.f32.mrb[0].mxu1  ;;  %v794_v5 = vpop.f32.mrb[0].mxu0 }
 0x1b6   :  { %v5740_v6 = vadd.f32 %v3720_v28, %v499_v32  ;;  %v4236_v9 = vpop.f32.mrb[1].mxu1  ;;  %v4341_v50 = vpop.f32.mrb[1].mxu0  ;;  %v1468_v28 = vld [vmem:[#allocation10 + $0x20] sm:$0xff]  ;;  %v1470_v32 = vld [vmem:[#allocation10 + $0x30] sm:$0xff] }
 0x1b8   :  { %v5741_v43 = vadd.f32 %v5740_v6, %v794_v5  ;;  %v1473_v5 = vld [vmem:[#allocation10 + $0x48] sm:$0xff] }
 0x1ba   :  { %v798_v41 = vmax.f32 %v5741_v43, 0.0 }
 0x1bc   :  { %v6663_v22 = vand.u32 4294901760, %v798_v41 }
 0x1be   :  { %v6666_v35 = vsub.f32 %v798_v41, %v6663_v22  ;;  %v1471_v41 = vld [vmem:[#allocation10 + $0x38] sm:$0xff] }
 0x1c0   :  { %v7822_v46 = vand.u32 4294901760, %v6666_v35 }
 0x1c2   :  { %v906_v30 = vsub.f32 %v6666_v35, %v7822_v46  ;;  %v1477_v46 = vld [vmem:[#allocation10 + $0x68] sm:$0xff] }
 0x1c4   :  { %v907_v17 = vand.u32 4294901760, %v906_v30  ;;  %v1466_v30 = vld [vmem:[#allocation10 + $0x10] sm:$0xff] }
 0x1c5   :  { %v1514_v43 = vand.u32 4294901760, %v1466_v30 }
 0x1c6   :  { %4375 = vmatmul.mubr.f32.vlgmr.msra.gmra.mrb[2].mxu1 %v907_v17 }
 0x1c7   :  { %5142 = vmatpush3.bf16.msra.mxu1 %v6586_v47  ;;  %4409 = vmatprep.mubr.msk.f32.mxu1 %vm6010_vm0, %v7920_v14  ;;  %v1465_v47 = vld [vmem:[#allocation10 + $0x8] sm:$0xff]  ;;  %v6698_v12 = vsub.f32 %v1466_v30, %v1514_v43  ;;  %v1528_v30 = vand.u32 4294901760, %v1475_v10 }
 0x1c8   :  { %5143 = vmatprep.subr.bf16.mxu1 %v7925_v1  ;;  %v1508_v17 = vand.u32 4294901760, %v1465_v47 }
 0x1c9   :  { %v6723_v62 = vsub.f32 %v1475_v10, %v1528_v30  ;;  %v1538_v10 = vand.u32 4294901760, %v1478_v20 }
 0x1cb   :  { %5145 = vmatpush3.bf16.msra.mxu1 %v6602_v33  ;;  %v1467_v33 = vld [vmem:[#allocation10 + $0x18] sm:$0xff] }
 0x1cc   :  { %5146 = vmatprep.subr.bf16.mxu1 %v7925_v1 }
 0x1cf   :  { %5148 = vmatpush3.bf16.msra.mxu1 %v5147_v3  ;;  %v1464_v3 = vld [vmem:[#allocation10] sm:$0xff] }
 0x1d0   :  { %5149 = vmatprep.subr.bf16.mxu1 %v7925_v1 }
 0x1d3   :  { %5151 = vmatpush3.bf16.msra.mxu1 %v5150_v19  ;;  %v1512_v19 = vand.u32 4294901760, %v1467_v33 }
 0x1d4   :  { %5152 = vmatprep.subr.bf16.mxu1 %v7925_v1 }
 0x1d5   :  { %v6688_v6 = vpack.c.bf16 %v1512_v19, %v1508_v17  ;;  %v6692_v9 = vsub.f32 %v1467_v33, %v1512_v19  ;;  %v1518_v33 = vand.u32 4294901760, %v1468_v28  ;;  %v1479_v19 = vld [vmem:[#allocation10 + $0x78] sm:$0xff] }
 0x1d7   :  { %5154 = vmatpush3.bf16.msra.mxu1 %v5153_v21  ;;  %v1510_v21 = vand.u32 4294901760, %v1464_v3  ;;  %7936 = vst [vmem:[#allocation20_spill] sm:$0xff] %v6688_v6  ;;  %5261 = vmatprep.subr.bf16.mxu0 %v6688_v6 }
 0x1d8   :  { %5155 = vmatprep.subr.bf16.mxu1 %v7925_v1 }
 0x1d9   :  { %v6694_v50 = vsub.f32 %v1464_v3, %v1510_v21  ;;  %v6696_v13 = vpack.c.bf16 %v1514_v43, %v1510_v21  ;;  %v1522_v3 = vand.u32 4294901760, %v1470_v32  ;;  %v1526_v21 = vand.u32 4294901760, %v1472_v63 }
 0x1da   :  { %v1532_v43 = vand.u32 4294901760, %v1477_v46 }
 0x1db   :  { %5157 = vmatpush3.bf16.msra.mxu1 %v5156_v27  ;;  %v1469_v27 = vld [vmem:[#allocation10 + $0x28] sm:$0xff]  ;;  %7937 = vst [vmem:[#allocation21_spill] sm:$0xff] %v6696_v13  ;;  %5263 = vmatpush1.bf16.msra.mxu0 %v6696_v13  ;;  %v6727_v13 = vsub.f32 %v1472_v63, %v1526_v21  ;;  %v1542_v63 = vand.u32 4294901760, %v1480_v60 }
 0x1dc   :  { %5158 = vmatprep.subr.bf16.mxu1 %v7925_v1 }
 0x1df   :  { %5160 = vmatpush3.bf16.msra.mxu1 %v5159_v4  ;;  %v1516_v4 = vand.u32 4294901760, %v1469_v27 }
 0x1e0   :  { %5161 = vmatprep.subr.bf16.mxu1 %v7925_v1 }
 0x1e1   :  { %v6702_v24 = vsub.f32 %v1469_v27, %v1516_v4  ;;  %v1530_v27 = vand.u32 4294901760, %v1474_v31 }
 0x1e3   :  { %5163 = vmatpush3.bf16.msra.mxu1 %v5162_v51  ;;  %v1520_v51 = vand.u32 4294901760, %v1471_v41  ;;  %v6725_v16 = vpack.c.bf16 %v1530_v27, %v1526_v21 }
 0x1e4   :  { %5164 = vmatprep.subr.bf16.mxu1 %v7925_v1 }
 0x1e5   :  { %v6700_v44 = vpack.c.bf16 %v1520_v51, %v1516_v4  ;;  %v1476_v4 = vld [vmem:[#allocation10 + $0x60] sm:$0xff] }
 0x1e6   :  { %4410 = vmatmul.mubr.f32.vlgmr.msra.gmra.mrb[2].mxu1 %v6663_v22 }
 0x1e7   :  { %5166 = vmatpush3.bf16.msra.mxu1 %v5165_v55  ;;  %4444 = vmatprep.mubr.msk.f32.mxu1 %vm6010_vm0, %v7920_v14  ;;  %v6690_v55 = vsub.f32 %v1465_v47, %v1508_v17  ;;  %7938 = vst [vmem:[#allocation22_spill] sm:$0xff] %v6700_v44  ;;  %v6708_v47 = vsub.f32 %v1471_v41, %v1520_v51  ;;  %v1524_v17 = vand.u32 4294901760, %v1473_v5 }
 0x1e8   :  { %5167 = vmatprep.subr.bf16.mxu1 %v7925_v1  ;;  %5265 = vmatprep.subr.bf16.mxu0 %v6700_v44  ;;  %v6715_v41 = vsub.f32 %v1468_v28, %v1518_v33  ;;  %v6717_v51 = vsub.f32 %v1470_v32, %v1522_v3  ;;  %v1482_v44 = vld [vmem:[#allocation10 + $0x90] sm:$0xff]  ;;  %v7941_v28 = vpack.c.bf16 %v6375_v40, %v6370_v53 }
 0x1e9   :  { %v6719_v26 = vsub.f32 %v1473_v5, %v1524_v17  ;;  %v6721_v37 = vpack.c.bf16 %v1528_v30, %v1524_v17  ;;  %v6732_v32 = vsub.f32 %v1474_v31, %v1530_v27  ;;  %v1536_v5 = vand.u32 4294901760, %v1479_v19 }
 0x1ea   :  { %v1540_v17 = vand.u32 4294901760, %v1481_v23  ;;  %v1544_v30 = vand.u32 4294901760, %v1483_v18  ;;  %v1546_v27 = vand.u32 4294901760, %v1482_v44 }
 0x1eb   :  { %5169 = vmatpush3.bf16.msra.mxu1 %v5168_v11  ;;  %v6713_v11 = vpack.c.bf16 %v1522_v3, %v1518_v33  ;;  %7940 = vst [vmem:[#allocation24_spill] sm:$0xff] %v6721_v37  ;;  %7942 = vst [vmem:[#allocation25_spill] sm:$0xff] %v6732_v32  ;;  %v6734_v33 = vsub.f32 %v1477_v46, %v1532_v43  ;;  %v1534_v3 = vand.u32 4294901760, %v1476_v4 }
 0x1ec   :  { %5170 = vmatprep.subr.bf16.mxu1 %v7925_v1  ;;  %v6739_v21 = vpack.c.bf16 %v1536_v5, %v1532_v43  ;;  %v6741_v6 = vsub.f32 %v1479_v19, %v1536_v5  ;;  %v6745_v46 = vsub.f32 %v1478_v20, %v1538_v10  ;;  %v6754_v32 = vsub.f32 %v1480_v60, %v1542_v63 }
 0x1ed   :  { %7939 = vst [vmem:[#allocation23_spill] sm:$0xff] %v6713_v11  ;;  %7943 = vst [vmem:[#allocation26_spill] sm:$0xff] %v6734_v33  ;;  %5267 = vmatpush1.bf16.msra.mxu0 %v6713_v11  ;;  %v6743_v31 = vsub.f32 %v1476_v4, %v1534_v3  ;;  %v7945_v11 = vpack.c.bf16 %v7935_v58, %v7934_v42  ;;  %v6752_v33 = vsub.f32 %v1483_v18, %v1544_v30 }
 0x1ee   :  { %5269 = vmatprep.subr.bf16.mxu0 %v6721_v37  ;;  %7944 = vst [vmem:[#allocation27_spill] sm:$0xff] %v6739_v21  ;;  %7947 = vst [vmem:[#allocation29_spill] sm:$0xff] %v6754_v32  ;;  %v6756_v37 = vsub.f32 %v1482_v44, %v1546_v27  ;;  %v6760_v19 = vpack.c.bf16 %v1538_v10, %v1534_v3  ;;  %v6763_v20 = vpack.c.bf16 %v1544_v30, %v1540_v17 }
 0x1ef   :  { %5172 = vmatpush3.bf16.msra.mxu1 %v7941_v28  ;;  %v6747_v28 = vsub.f32 %v1481_v23, %v1540_v17  ;;  %7946 = vst [vmem:[#allocation28_spill] sm:$0xff] %v6752_v33  ;;  %v7951_v23 = vpack.c.bf16 %v6568_v15, %v6566_v38  ;;  %v6770_v44 = vpack.c.bf16 %v1546_v27, %v1542_v63  ;;  %v7956_v4 = vand.u32 4294901760, %v6338_v39 }
 0x1f0   :  { %5173 = vmatprep.subr.bf16.mxu1 %v7925_v1  ;;  %7948 = vst [vmem:[#allocation30_spill] sm:$0xff] %v6756_v37  ;;  %7949 = vst [vmem:[#allocation31_spill] sm:$0xff] %v6760_v19  ;;  %v7953_v60 = vpack.c.bf16 %v6572_v52, %v6570_v29  ;;  %v7954_v18 = vpack.c.bf16 %v6577_v34, %v6575_v48  ;;  %v7955_v43 = vpack.c.bf16 %v6581_v61, %v6579_v0 }
 0x1f1   :  { %5271 = vmatpush1.bf16.msra.mxu0 %v6725_v16  ;;  %7950 = vst [vmem:[#allocation32_spill] sm:$0xff] %v6763_v20  ;;  %7952 = vst [vmem:[#allocation33_spill] sm:$0xff] %v6770_v44  ;;  %v7958_v3 = vand.u32 4294901760, %v6666_v35  ;;  %v7959_v10 = vand.u32 4294901760, %v6357_v54  ;;  %v7960_v17 = vand.u32 4294901760, %v6362_v8  ;;  %v7961_v39 = vand.u32 4294901760, %v6370_v53 }
 0x1f2   :  { %5273 = vmatprep.subr.bf16.mxu0 %v6739_v21  ;;  %v7964_v54 = vand.u32 4294901760, %v7935_v58  ;;  %v7965_v27 = vand.u32 4294901760, %v6566_v38  ;;  %v7967_v53 = vand.u32 4294901760, %v6570_v29  ;;  %v7970_v58 = vand.u32 4294901760, %v6577_v34  ;;  %v1491_v34 = vld [vmem:[#allocation10 + $0xd8] sm:$0xff] }
 0x1f3   :  { %5175 = vmatpush3.bf16.msra.mxu1 %v7945_v11  ;;  %v7957_v11 = vand.u32 4294901760, %v6347_v59  ;;  %v5216_v30 = vpack.c.bf16 %v7960_v17, %v7959_v10  ;;  %v7962_v59 = vand.u32 4294901760, %v6375_v40  ;;  %v7968_v40 = vand.u32 4294901760, %v6572_v52 }
 0x1f4   :  { %5176 = vmatprep.subr.bf16.mxu1 %v7925_v1  ;;  %v7971_v38 = vand.u32 4294901760, %v6579_v0 }
 0x1f5   :  { %5275 = vmatpush1.bf16.msra.mxu0 %v6760_v19  ;;  %v5213_v5 = vpack.c.bf16 %v7957_v11, %v7956_v4  ;;  %v5219_v63 = vpack.c.bf16 %v7962_v59, %v7961_v39  ;;  %v1490_v11 = vld [vmem:[#allocation10 + $0xd0] sm:$0xff]  ;;  %v1495_v39 = vld [vmem:[#allocation10 + $0xf8] sm:$0xff] }
 0x1f6   :  { %5277 = vmatprep.subr.bf16.mxu0 %v6763_v20 }
 0x1f7   :  { %5178 = vmatpush3.bf16.msra.mxu1 %v7951_v23  ;;  %v7966_v23 = vand.u32 4294901760, %v6568_v15  ;;  %v7972_v15 = vand.u32 4294901760, %v6581_v61  ;;  %v1560_v61 = vand.u32 4294901760, %v1491_v34 }
 0x1f8   :  { %5179 = vmatprep.subr.bf16.mxu1 %v7925_v1 }
 0x1f9   :  { %5279 = vmatpush1.bf16.msra.mxu0 %v6770_v44  ;;  %v5234_v4 = vpack.c.bf16 %v7972_v15, %v7971_v38 }
 0x1fb   :  { %5181 = vmatpush3.bf16.msra.mxu1 %v7953_v60  ;;  %v5225_v60 = vpack.c.bf16 %v7966_v23, %v7965_v27  ;;  %v7843_v27 = vand.u32 4294901760, %v6692_v9 }
 0x1fc   :  { %5182 = vmatprep.subr.bf16.mxu1 %v7925_v1 }
 0x1ff   :  { %5184 = vmatpush3.bf16.msra.mxu1 %v7954_v18  ;;  %v5228_v18 = vpack.c.bf16 %v7968_v40, %v7967_v53  ;;  %v7846_v53 = vand.u32 4294901760, %v6694_v50  ;;  %v7866_v40 = vand.u32 4294901760, %v6698_v12 }
 0x200   :  { %5185 = vmatprep.subr.bf16.mxu1 %v7925_v1 }
 0x203   :  { %5187 = vmatpush3.bf16.msra.mxu1 %v7955_v43 }
 0x204   :  { %5188 = vmatprep.subr.bf16.mxu1 %v7925_v1 }
 0x206   :  { %4445 = vmatmul.mubr.f32.vlgmr.msra.gmra.mrb[2].mxu1 %v6666_v35  ;;  %v7963_v35 = vand.u32 4294901760, %v7934_v42  ;;  %v7969_v42 = vand.u32 4294901760, %v6575_v48 }
 0x207   :  { %5190 = vmatpush3.bf16.msra.mxu1 %v6510_v36  ;;  %4479 = vmatprep.mubr.msk.f32.mxu1 %vm6010_vm0, %v7920_v14 }
 0x208   :  { %5191 = vmatprep.subr.bf16.mxu1 %v7925_v1  ;;  %v5222_v8 = vpack.c.bf16 %v7964_v54, %v7963_v35  ;;  %v5231_v43 = vpack.c.bf16 %v7970_v58, %v7969_v42  ;;  %v1492_v35 = vld [vmem:[#allocation10 + $0xe0] sm:$0xff]  ;;  %v1494_v54 = vld [vmem:[#allocation10 + $0xf0] sm:$0xff]  ;;  %v1631_v58 = vsub.f32 %v6692_v9, %v7843_v27 }
 0x209   :  { %v1566_v23 = vand.u32 4294901760, %v1492_v35 }
 0x20a   :  { %v1632_v15 = vand.u32 4294901760, %v1631_v58  ;;  %v6915_v58 = vsub.f32 %v1491_v34, %v1560_v61  ;;  %v7850_v34 = vand.u32 4294901760, %v6717_v51 }
 0x20b   :  { %5193 = vmatpush3.bf16.msra.mxu1 %v6520_v49 }
 0x20c   :  { %5194 = vmatprep.subr.bf16.mxu1 %v7925_v1  ;;  %7984 = vst [vmem:[#allocation45_spill] sm:$0xff] %v6915_v58 }
 0x20f   :  { %5196 = vmatpush3.bf16.msra.mxu1 %v6531_v56 }
 0x210   :  { %5197 = vmatprep.subr.bf16.mxu1 %v7925_v1 }
 0x213   :  { %5199 = vmatpush3.bf16.msra.mxu1 %v6539_v2 }
 0x214   :  { %5200 = vmatprep.subr.bf16.mxu1 %v7925_v1 }
 0x217   :  { %5202 = vmatpush3.bf16.msra.mxu1 %v6544_v7 }
 0x218   :  { %5203 = vmatprep.subr.bf16.mxu1 %v7925_v1 }
 0x21b   :  { %5205 = vmatpush3.bf16.msra.mxu1 %v6548_v25 }
 0x21c   :  { %5206 = vmatprep.subr.bf16.mxu1 %v7925_v1 }
 0x21f   :  { %5208 = vmatpush3.bf16.msra.mxu1 %v6552_v45 }
 0x220   :  { %5209 = vmatprep.subr.bf16.mxu1 %v7925_v1 }
 0x223   :  { %5211 = vmatpush3.bf16.msra.mxu1 %v6558_v57 }
 0x224   :  { %5212 = vmatprep.subr.bf16.mxu1 %v7925_v1 }
 0x226   :  { %4480 = vmatmul.mubr.f32.vlgmr.msra.gmra.mrb[2].mxu1 %v7958_v3  ;;  %v1562_v3 = vand.u32 4294901760, %v1490_v11 }
 0x227   :  { %5214 = vmatpush3.bf16.msra.mxu1 %v5213_v5  ;;  %4514 = vmatprep.mubr.msk.f32.mxu1 %vm6010_vm0, %v7920_v14 }
 0x228   :  { %5215 = vmatprep.subr.bf16.mxu1 %v7925_v1 }
 0x22b   :  { %5217 = vmatpush3.bf16.msra.mxu1 %v5216_v30  ;;  %v1493_v30 = vld [vmem:[#allocation10 + $0xe8] sm:$0xff] }
 0x22c   :  { %5218 = vmatprep.subr.bf16.mxu1 %v7925_v1  ;;  %v1564_v59 = vand.u32 4294901760, %v1493_v30 }
 0x22f   :  { %5220 = vmatpush3.bf16.msra.mxu1 %v5219_v63  ;;  %v1568_v63 = vand.u32 4294901760, %v1495_v39 }
 0x230   :  { %5221 = vmatprep.subr.bf16.mxu1 %v7925_v1 }
 0x233   :  { %5223 = vmatpush3.bf16.msra.mxu1 %v5222_v8  ;;  %v7840_v8 = vand.u32 4294901760, %v6690_v55 }
 0x234   :  { %5224 = vmatprep.subr.bf16.mxu1 %v7925_v1 }
 0x235   :  { %v1619_v42 = vsub.f32 %v6690_v55, %v7840_v8 }
 0x237   :  { %5226 = vmatpush3.bf16.msra.mxu1 %v5225_v60  ;;  %v1570_v60 = vand.u32 4294901760, %v1494_v54  ;;  %v1620_v38 = vand.u32 4294901760, %v1619_v42 }
 0x238   :  { %5227 = vmatprep.subr.bf16.mxu1 %v7925_v1 }
 0x23b   :  { %5229 = vmatpush3.bf16.msra.mxu1 %v5228_v18  ;;  %v6887_v18 = vpack.c.bf16 %v1568_v63, %v1564_v59 }
 0x23c   :  { %5230 = vmatprep.subr.bf16.mxu1 %v7925_v1 }
 0x23d   :  { %7977 = vst [vmem:[#allocation38_spill] sm:$0xff] %v6887_v18 }
 0x23f   :  { %5232 = vmatpush3.bf16.msra.mxu1 %v5231_v43  ;;  %v6895_v43 = vpack.c.bf16 %v1570_v60, %v1566_v23 }
 0x240   :  { %5233 = vmatprep.subr.bf16.mxu1 %v7925_v1 }
 0x241   :  { %7978 = vst [vmem:[#allocation39_spill] sm:$0xff] %v6895_v43 }
 0x243   :  { %5235 = vmatpush3.bf16.msra.mxu1 %v5234_v4  ;;  %v1625_v4 = vsub.f32 %v6694_v50, %v7846_v53  ;;  %v6919_v53 = vsub.f32 %v1490_v11, %v1562_v3  ;;  %v7851_v11 = vand.u32 4294901760, %v6723_v62 }
 0x244   :  { %5236 = vmatprep.subr.bf16.mxu1 %v7925_v1 }
 0x245   :  { %7986 = vst [vmem:[#allocation47_spill] sm:$0xff] %v6919_v53 }
 0x246   :  { %4515 = vmatmul.mubr.f32.vlgmr.msra.gmra.mrb[2].mxu1 %v6663_v22 }
 0x247   :  { %5238 = vmatpush3.bf16.msra.mxu1 %v6510_v36  ;;  %4549 = vmatprep.mubr.msk.f32.mxu1 %vm6010_vm0, %v7920_v14  ;;  %v1485_v36 = vld [vmem:[#allocation10 + $0xa8] sm:$0xff] }
 0x248   :  { %5239 = vmatprep.subr.bf16.mxu1 %v7925_v1 }
 0x24b   :  { %5241 = vmatpush3.bf16.msra.mxu1 %v6520_v49  ;;  %v1487_v49 = vld [vmem:[#allocation10 + $0xb8] sm:$0xff] }
 0x24c   :  { %5242 = vmatprep.subr.bf16.mxu1 %v7925_v1 }
 0x24f   :  { %5244 = vmatpush3.bf16.msra.mxu1 %v6531_v56  ;;  %v1548_v56 = vand.u32 4294901760, %v1485_v36 }
 0x250   :  { %5245 = vmatprep.subr.bf16.mxu1 %v7925_v1 }
 0x253   :  { %5247 = vmatpush3.bf16.msra.mxu1 %v6539_v2  ;;  %v1552_v2 = vand.u32 4294901760, %v1487_v49 }
 0x254   :  { %5248 = vmatprep.subr.bf16.mxu1 %v7925_v1 }
 0x255   :  { %v6906_v8 = vsub.f32 %v1487_v49, %v1552_v2  ;;  %v6925_v49 = vsub.f32 %v1492_v35, %v1566_v23 }
 0x257   :  { %5250 = vmatpush3.bf16.msra.mxu1 %v6544_v7  ;;  %v1484_v7 = vld [vmem:[#allocation10 + $0xa0] sm:$0xff]  ;;  %7980 = vst [vmem:[#allocation41_spill] sm:$0xff] %v6906_v8 }
 0x258   :  { %5251 = vmatprep.subr.bf16.mxu1 %v7925_v1  ;;  %v1550_v29 = vand.u32 4294901760, %v1484_v7 }
 0x25b   :  { %5253 = vmatpush3.bf16.msra.mxu1 %v6548_v25  ;;  %v1486_v25 = vld [vmem:[#allocation10 + $0xb0] sm:$0xff] }
 0x25c   :  { %5254 = vmatprep.subr.bf16.mxu1 %v7925_v1  ;;  %v1554_v52 = vand.u32 4294901760, %v1486_v25 }
 0x25e   :  { %v6873_v48 = vpack.c.bf16 %v1554_v52, %v1550_v29  ;;  %v6910_v27 = vsub.f32 %v1486_v25, %v1554_v52  ;;  %v7859_v52 = vand.u32 4294901760, %v6708_v47 }
 0x25f   :  { %5256 = vmatpush3.bf16.msra.mxu1 %v6552_v45  ;;  %v6871_v45 = vpack.c.bf16 %v1552_v2, %v1548_v56  ;;  %v5292_v2 = vpack.c.bf16 %v1632_v15, %v1620_v38 }
 0x260   :  { %5257 = vmatprep.subr.bf16.mxu1 %v7925_v1  ;;  %7974 = vst [vmem:[#allocation35_spill] sm:$0xff] %v6873_v48  ;;  %7982 = vst [vmem:[#allocation43_spill] sm:$0xff] %v6910_v27 }
 0x261   :  { %7973 = vst [vmem:[#allocation34_spill] sm:$0xff] %v6871_v45  ;;  %5281 = vmatprep.subr.bf16.mxu0 %v6871_v45 }
 0x262   :  { %5283 = vmatpush1.bf16.msra.mxu0 %v6873_v48  ;;  %v6921_v48 = vsub.f32 %v1493_v30, %v1564_v59  ;;  %v1661_v30 = vsub.f32 %v6717_v51, %v7850_v34 }
 0x263   :  { %5259 = vmatpush3.bf16.msra.mxu1 %v6558_v57  ;;  %v1489_v57 = vld [vmem:[#allocation10 + $0xc8] sm:$0xff] }
 0x264   :  { %5452 = vmatprep.subr.bf16.mxu1 %v7925_v1  ;;  %v1556_v0 = vand.u32 4294901760, %v1489_v57  ;;  %v1637_v1 = vsub.f32 %v6698_v12, %v7866_v40  ;;  %v1662_v15 = vand.u32 4294901760, %v1661_v30 }
 0x266   :  { %4550 = vmatmul.mubr.f32.vlgmr.msra.gmra.mrb[2].mxu1 %v6663_v22  ;;  %v1488_v22 = vld [vmem:[#allocation10 + $0xc0] sm:$0xff]  ;;  %v6877_v10 = vpack.c.bf16 %v1560_v61, %v1556_v0  ;;  %v6913_v42 = vsub.f32 %v1489_v57, %v1556_v0  ;;  %v1638_v25 = vand.u32 4294901760, %v1637_v1  ;;  %v7853_v57 = vand.u32 4294901760, %v6715_v41 }
 0x267   :  { %4584 = vmatprep.mubr.msk.f32.mxu1 %vm6010_vm0, %v7920_v14  ;;  %v1558_v5 = vand.u32 4294901760, %v1488_v22  ;;  %v7849_v0 = vand.u32 4294901760, %v6719_v26  ;;  %v7852_v1 = vand.u32 4294901760, %v6727_v13 }
 0x268   :  { %7975 = vst [vmem:[#allocation36_spill] sm:$0xff] %v6877_v10  ;;  %5285 = vmatprep.subr.bf16.mxu0 %v6877_v10  ;;  %v6908_v10 = vsub.f32 %v1484_v7, %v1550_v29  ;;  %7983 = vst [vmem:[#allocation44_spill] sm:$0xff] %v6913_v42  ;;  %v1626_v7 = vand.u32 4294901760, %v1625_v4  ;;  %v7862_v29 = vand.u32 4294901760, %v6702_v24 }
 0x269   :  { %v6879_v17 = vpack.c.bf16 %v1562_v3, %v1558_v5  ;;  %v1649_v3 = vsub.f32 %v6715_v41, %v7853_v57  ;;  %v1673_v35 = vsub.f32 %v6727_v13, %v7852_v1  ;;  %v7855_v1 = vand.u32 4294901760, %v6741_v6 }
 0x26a   :  { %7981 = vst [vmem:[#allocation42_spill] sm:$0xff] %v6908_v10  ;;  %v6934_v61 = vpack.c.bf16 %v1638_v25, %v1626_v7  ;;  %v7856_v57 = vand.u32 4294901760, %v6743_v31 }
 0x26b   :  { %7976 = vst [vmem:[#allocation37_spill] sm:$0xff] %v6879_v17  ;;  %5287 = vmatpush1.bf16.msra.mxu0 %v6879_v17  ;;  %v6904_v17 = vsub.f32 %v1485_v36, %v1548_v56  ;;  %v6923_v36 = vsub.f32 %v1495_v39, %v1568_v63  ;;  %v6927_v56 = vsub.f32 %v1494_v54, %v1570_v60  ;;  %v7987_v54 = vld [vmem:[#allocation25_spill] sm:$0xff]  ;;  %v1650_v38 = vand.u32 4294901760, %v1649_v3 }
 0x26c   :  { %5289 = vmatprep.subr.bf16.mxu0 %v6887_v18  ;;  %v6917_v18 = vsub.f32 %v1488_v22, %v1558_v5  ;;  %v1643_v22 = vsub.f32 %v6702_v24, %v7862_v29  ;;  %v1655_v5 = vsub.f32 %v6708_v47, %v7859_v52  ;;  %v1667_v39 = vsub.f32 %v6719_v26, %v7849_v0 }
 0x26d   :  { %7979 = vst [vmem:[#allocation40_spill] sm:$0xff] %v6904_v17  ;;  %v1679_v63 = vsub.f32 %v6723_v62, %v7851_v11  ;;  %v7857_v23 = vand.u32 4294901760, %v7987_v54  ;;  %v1674_v7 = vand.u32 4294901760, %v1673_v35  ;;  %v6966_v11 = vpack.c.bf16 %v1662_v15, %v1650_v38 }
 0x26e   :  { %7985 = vst [vmem:[#allocation46_spill] sm:$0xff] %v6917_v18  ;;  %v1644_v59 = vand.u32 4294901760, %v1643_v22  ;;  %v1656_v60 = vand.u32 4294901760, %v1655_v5  ;;  %v1668_v4 = vand.u32 4294901760, %v1667_v39  ;;  %v7988_v22 = vld [vmem:[#allocation26_spill] sm:$0xff]  ;;  %v7858_v39 = vand.u32 4294901760, %v6745_v46 }
 0x26f   :  { %5291 = vmatpush1.bf16.msra.mxu0 %v6895_v43  ;;  %v1685_v25 = vsub.f32 %v7987_v54, %v7857_v23  ;;  %v7854_v0 = vand.u32 4294901760, %v7988_v22  ;;  %v7860_v35 = vand.u32 4294901760, %v6747_v28 }
 0x270   :  { %5293 = vmatprep.subr.bf16.mxu0 %v5292_v2  ;;  %v1680_v2 = vand.u32 4294901760, %v1679_v63  ;;  %v6964_v34 = vpack.c.bf16 %v1656_v60, %v1644_v59  ;;  %v1703_v59 = vsub.f32 %v6741_v6, %v7855_v1  ;;  %v1697_v63 = vsub.f32 %v6743_v31, %v7856_v57 }
 0x271   :  { %v1686_v3 = vand.u32 4294901760, %v1685_v25  ;;  %v1691_v30 = vsub.f32 %v7988_v22, %v7854_v0  ;;  %v7861_v60 = vand.u32 4294901760, %v6752_v33  ;;  %v1715_v1 = vsub.f32 %v6747_v28, %v7860_v35 }
 0x272   :  { %v6970_v5 = vpack.c.bf16 %v1680_v2, %v1668_v4  ;;  %v1709_v4 = vsub.f32 %v6745_v46, %v7858_v39  ;;  %v7865_v2 = vand.u32 4294901760, %v6754_v32  ;;  %v1704_v25 = vand.u32 4294901760, %v1703_v59 }
 0x273   :  { %v6984_v38 = vpack.c.bf16 %v1686_v3, %v1674_v7  ;;  %v1692_v15 = vand.u32 4294901760, %v1691_v30  ;;  %v1698_v0 = vand.u32 4294901760, %v1697_v63  ;;  %v1727_v57 = vsub.f32 %v6752_v33, %v7861_v60 }
 0x274   :  { %v1710_v23 = vand.u32 4294901760, %v1709_v4  ;;  %v1721_v7 = vsub.f32 %v6754_v32, %v7865_v2  ;;  %v7864_v3 = vand.u32 4294901760, %v6756_v37  ;;  %v1716_v39 = vand.u32 4294901760, %v1715_v1 }
 0x275   :  { %v7000_v30 = vpack.c.bf16 %v1704_v25, %v1692_v15  ;;  %v1728_v59 = vand.u32 4294901760, %v1727_v57  ;;  %v7863_v63 = vand.u32 4294901760, %v6904_v17  ;;  %v7867_v4 = vand.u32 4294901760, %v6906_v8 }
 0x276   :  { %v7003_v52 = vpack.c.bf16 %v1710_v23, %v1698_v0  ;;  %v1722_v35 = vand.u32 4294901760, %v1721_v7  ;;  %v1733_v60 = vsub.f32 %v6756_v37, %v7864_v3  ;;  %v7868_v1 = vand.u32 4294901760, %v6908_v10 }
 0x277   :  { %v7009_v29 = vpack.c.bf16 %v1728_v59, %v1716_v39  ;;  %v1739_v15 = vsub.f32 %v6904_v17, %v7863_v63  ;;  %v7871_v57 = vand.u32 4294901760, %v6910_v27  ;;  %v1751_v0 = vsub.f32 %v6906_v8, %v7867_v4 }
 0x278   :  { %v1734_v25 = vand.u32 4294901760, %v1733_v60  ;;  %v1745_v7 = vsub.f32 %v6908_v10, %v7868_v1  ;;  %v7872_v59 = vand.u32 4294901760, %v6913_v42  ;;  %v7877_v60 = vand.u32 4294901760, %v6915_v58 }
 0x279   :  { %v1740_v23 = vand.u32 4294901760, %v1739_v15  ;;  %v1757_v39 = vsub.f32 %v6910_v27, %v7871_v57  ;;  %v1752_v3 = vand.u32 4294901760, %v1751_v0  ;;  %v7879_v2 = vand.u32 4294901760, %v6917_v18 }
 0x27a   :  { %v7026_v63 = vpack.c.bf16 %v1734_v25, %v1722_v35  ;;  %v1746_v40 = vand.u32 4294901760, %v1745_v7  ;;  %v1763_v15 = vsub.f32 %v6913_v42, %v7872_v59  ;;  %v7878_v1 = vand.u32 4294901760, %v6919_v53 }
 0x27b   :  { %v1758_v4 = vand.u32 4294901760, %v1757_v39  ;;  %v5312_v43 = vpack.c.bf16 %v1752_v3, %v1740_v23  ;;  %v1775_v57 = vsub.f32 %v6915_v58, %v7877_v60  ;;  %v1769_v35 = vsub.f32 %v6917_v18, %v7879_v2 }
 0x27c   :  { %v1764_v0 = vand.u32 4294901760, %v1763_v15  ;;  %v1781_v7 = vsub.f32 %v6919_v53, %v7878_v1  ;;  %v7882_v39 = vand.u32 4294901760, %v6921_v48  ;;  %v7889_v3 = vand.u32 4294901760, %v6923_v36 }
 0x27d   :  { %v5314_v25 = vpack.c.bf16 %v1758_v4, %v1746_v40  ;;  %v1776_v59 = vand.u32 4294901760, %v1775_v57  ;;  %v1770_v45 = vand.u32 4294901760, %v1769_v35  ;;  %v7887_v23 = vand.u32 4294901760, %v6925_v49 }
 0x27e   :  { %v1782_v44 = vand.u32 4294901760, %v1781_v7  ;;  %v1787_v60 = vsub.f32 %v6921_v48, %v7882_v39  ;;  %v7888_v40 = vand.u32 4294901760, %v6927_v56  ;;  %v1799_v15 = vsub.f32 %v6923_v36, %v7889_v3 }
 0x27f   :  { %v5316_v4 = vpack.c.bf16 %v1776_v59, %v1764_v0  ;;  %v1793_v57 = vsub.f32 %v6925_v49, %v7887_v23  ;;  %v5324_v59 = vpack.c.bf16 %v6692_v9, %v6690_v55  ;;  %v5326_v0 = vpack.c.bf16 %v6698_v12, %v6694_v50 }
 0x280   :  { %v5318_v35 = vpack.c.bf16 %v1782_v44, %v1770_v45  ;;  %v1788_v1 = vand.u32 4294901760, %v1787_v60  ;;  %v1805_v7 = vsub.f32 %v6927_v56, %v7888_v40  ;;  %v1800_v2 = vand.u32 4294901760, %v1799_v15 }
 0x281   :  { %v1794_v20 = vand.u32 4294901760, %v1793_v57  ;;  %v5328_v23 = vpack.c.bf16 %v6708_v47, %v6702_v24  ;;  %v5330_v44 = vpack.c.bf16 %v6717_v51, %v6715_v41  ;;  %v5332_v45 = vpack.c.bf16 %v6723_v62, %v6719_v26 }
 0x282   :  { %v1806_v39 = vand.u32 4294901760, %v1805_v7  ;;  %v5320_v19 = vpack.c.bf16 %v1800_v2, %v1788_v1  ;;  %v5334_v60 = vpack.c.bf16 %v7987_v54, %v6727_v13  ;;  %v5338_v2 = vpack.c.bf16 %v6745_v46, %v6743_v31 }
 0x283   :  { %v5340_v1 = vpack.c.bf16 %v6752_v33, %v6747_v28  ;;  %v5344_v15 = vpack.c.bf16 %v6906_v8, %v6904_v17  ;;  %v5346_v57 = vpack.c.bf16 %v6910_v27, %v6908_v10  ;;  %v5348_v7 = vpack.c.bf16 %v6915_v58, %v6913_v42 }
 0x284   :  { %v5322_v21 = vpack.c.bf16 %v1806_v39, %v1794_v20  ;;  %v5336_v20 = vpack.c.bf16 %v6741_v6, %v7988_v22  ;;  %v5342_v39 = vpack.c.bf16 %v6756_v37, %v6754_v32  ;;  %v5350_v40 = vpack.c.bf16 %v6919_v53, %v6917_v18  ;;  %v3721_v37 = vld [vmem:[%s7781_s5] ss:$0 sm:$0xff] }
 0x285   :  { %v5352_v3 = vpack.c.bf16 %v6923_v36, %v6921_v48  ;;  %v5354_v33 = vpack.c.bf16 %v6927_v56, %v6925_v49 }
 0x339   :  { %v1459_v8 = vpop.f32.mrb[2].mxu1 }
 0x33a   :  { %v5742_v17 = vadd.f32 %v3721_v37, %v1459_v8  ;;  %v4551_v32 = vpop.f32.mrb[3].mxu1  ;;  %v7989_v37 = vld [vmem:[#allocation20_spill] sm:$0xff]  ;;  %v7994_v8 = vld [vmem:[#allocation27_spill] sm:$0xff] }
 0x33b   :  { %v7990_v32 = vld [vmem:[#allocation21_spill] sm:$0xff] }
 0x33c   :  { %v1463_v27 = vmax.f32 %v5742_v17, 0.0  ;;  %v7993_v17 = vld [vmem:[#allocation24_spill] sm:$0xff] }
 0x33e   :  { %v7094_v10 = vand.u32 4294901760, %v1463_v27 }
 0x340   :  { %v1606_v58 = vsub.f32 %v1463_v27, %v7094_v10  ;;  %v7995_v27 = vld [vmem:[#allocation31_spill] sm:$0xff] }
 0x342   :  { %v1607_v42 = vand.u32 4294901760, %v1606_v58 }
 0x344   :  { %v1608_v53 = vsub.f32 %v1606_v58, %v1607_v42 }
 0x346   :  { %v1609_v18 = vand.u32 4294901760, %v1608_v53  ;;  %v7997_v53 = vld [vmem:[#allocation33_spill] sm:$0xff] }
 0x348   :  { %1610 = vmatmul.mubr.f32.vlgmr.msra.gmra.mrb[2].mxu0 %v1609_v18  ;;  %v7998_v18 = vld [vmem:[#allocation34_spill] sm:$0xff] }
 0x349   :  { %5295 = vmatpush1.bf16.msra.mxu0 %v6934_v61  ;;  %1840 = vmatprep.mubr.f32.mxu0 %v7920_v14  ;;  %v8004_v61 = vand.u32 4294901760, %v6692_v9  ;;  %v8011_v9 = vand.u32 4294901760, %v6717_v51  ;;  %v8017_v51 = vand.u32 4294901760, %v6741_v6  ;;  %v8027_v6 = vld [vmem:[#allocation40_spill] sm:$0xff] }
 0x34a   :  { %5297 = vmatprep.subr.bf16.mxu0 %v6964_v34  ;;  %v8003_v34 = vand.u32 4294901760, %v6690_v55  ;;  %v8010_v55 = vand.u32 4294901760, %v6715_v41  ;;  %v8016_v41 = vand.u32 4294901760, %v7988_v22 }
 0x34d   :  { %5299 = vmatpush1.bf16.msra.mxu0 %v6966_v11  ;;  %v5388_v11 = vpack.c.bf16 %v8004_v61, %v8003_v34  ;;  %v8035_v61 = vld [vmem:[#allocation44_spill] sm:$0xff] }
 0x34e   :  { %5301 = vmatprep.subr.bf16.mxu0 %v6970_v5  ;;  %v8005_v5 = vld [vmem:[#allocation39_spill] sm:$0xff] }
 0x351   :  { %5303 = vmatpush1.bf16.msra.mxu0 %v6984_v38  ;;  %v8006_v38 = vand.u32 4294901760, %v6694_v50  ;;  %v8012_v50 = vand.u32 4294901760, %v6719_v26  ;;  %v8019_v26 = vand.u32 4294901760, %v6745_v46  ;;  %v8031_v46 = vld [vmem:[#allocation42_spill] sm:$0xff] }
 0x352   :  { %5305 = vmatprep.subr.bf16.mxu0 %v7000_v30  ;;  %v8007_v30 = vand.u32 4294901760, %v6698_v12  ;;  %v8013_v12 = vand.u32 4294901760, %v6723_v62  ;;  %v8020_v62 = vand.u32 4294901760, %v6747_v28 }
 0x355   :  { %5307 = vmatpush1.bf16.msra.mxu0 %v7003_v52  ;;  %v8002_v52 = vld [vmem:[#allocation38_spill] sm:$0xff] }
 0x356   :  { %5309 = vmatprep.subr.bf16.mxu0 %v7009_v29  ;;  %v8001_v29 = vld [vmem:[#allocation37_spill] sm:$0xff] }
 0x359   :  { %5311 = vmatpush1.bf16.msra.mxu0 %v7026_v63  ;;  %v5390_v63 = vpack.c.bf16 %v8007_v30, %v8006_v38  ;;  %v8037_v38 = vld [vmem:[#allocation45_spill] sm:$0xff] }
 0x35a   :  { %5313 = vmatprep.subr.bf16.mxu0 %v5312_v43  ;;  %v7999_v43 = vld [vmem:[#allocation35_spill] sm:$0xff]  ;;  %v8038_v30 = vand.u32 4294901760, %v8037_v38 }
 0x35d   :  { %5315 = vmatpush1.bf16.msra.mxu0 %v5314_v25  ;;  %v8008_v25 = vand.u32 4294901760, %v6702_v24  ;;  %v8014_v24 = vand.u32 4294901760, %v6727_v13 }
 0x35e   :  { %5317 = vmatprep.subr.bf16.mxu0 %v5316_v4  ;;  %v5396_v4 = vpack.c.bf16 %v8013_v12, %v8012_v50  ;;  %v8044_v50 = vand.u32 4294901760, %v6923_v36  ;;  %v2370_v36 = vld [vmem:[#allocation11 + $0x8] sm:$0xff] }
 0x361   :  { %5319 = vmatpush1.bf16.msra.mxu0 %v5318_v35  ;;  %v5400_v35 = vpack.c.bf16 %v8017_v51, %v8016_v41  ;;  %v2378_v41 = vld [vmem:[#allocation11 + $0x48] sm:$0xff] }
 0x362   :  { %5321 = vmatprep.subr.bf16.mxu0 %v5320_v19  ;;  %v7992_v19 = vld [vmem:[#allocation23_spill] sm:$0xff] }
 0x365   :  { %5323 = vmatpush1.bf16.msra.mxu0 %v5322_v21  ;;  %v7991_v21 = vld [vmem:[#allocation22_spill] sm:$0xff] }
 0x366   :  { %5325 = vmatprep.subr.bf16.mxu0 %v5324_v59  ;;  %v8018_v59 = vand.u32 4294901760, %v6743_v31 }
 0x368   :  { %1842 = vmatmul.mubr.f32.vlgmr.msra.gmra.mrb[2].mxu0 %v7094_v10 }
 0x369   :  { %5327 = vmatpush1.bf16.msra.mxu0 %v5326_v0  ;;  %1976 = vmatprep.mubr.f32.mxu0 %v7920_v14  ;;  %v5402_v0 = vpack.c.bf16 %v8019_v26, %v8018_v59  ;;  %v2379_v26 = vld [vmem:[#allocation11 + $0x50] sm:$0xff] }
 0x36a   :  { %5329 = vmatprep.subr.bf16.mxu0 %v5328_v23 }
 0x36d   :  { %5331 = vmatpush1.bf16.msra.mxu0 %v5330_v44  ;;  %v8021_v44 = vld [vmem:[#allocation28_spill] sm:$0xff] }
 0x36e   :  { %5333 = vmatprep.subr.bf16.mxu0 %v5332_v45  ;;  %v8022_v13 = vand.u32 4294901760, %v8021_v44 }
 0x370   :  { %v5404_v45 = vpack.c.bf16 %v8022_v13, %v8020_v62  ;;  %v2423_v62 = vand.u32 4294901760, %v2379_v26 }
 0x371   :  { %5335 = vmatpush1.bf16.msra.mxu0 %v5334_v60 }
 0x372   :  { %5337 = vmatprep.subr.bf16.mxu0 %v5336_v20  ;;  %v8025_v20 = vld [vmem:[#allocation30_spill] sm:$0xff] }
 0x373   :  { %v8026_v22 = vand.u32 4294901760, %v8025_v20 }
 0x375   :  { %5339 = vmatpush1.bf16.msra.mxu0 %v5338_v2 }
 0x376   :  { %5341 = vmatprep.subr.bf16.mxu0 %v5340_v1  ;;  %v8028_v1 = vand.u32 4294901760, %v8027_v6 }
 0x379   :  { %5343 = vmatpush1.bf16.msra.mxu0 %v5342_v39  ;;  %v8029_v39 = vld [vmem:[#allocation41_spill] sm:$0xff] }
 0x37a   :  { %5345 = vmatprep.subr.bf16.mxu0 %v5344_v15  ;;  %v8030_v31 = vand.u32 4294901760, %v8029_v39  ;;  %v2383_v39 = vld [vmem:[#allocation11 + $0x70] sm:$0xff] }
 0x37c   :  { %v5408_v15 = vpack.c.bf16 %v8030_v31, %v8028_v1 }
 0x37d   :  { %5347 = vmatpush1.bf16.msra.mxu0 %v5346_v57  ;;  %v8032_v57 = vand.u32 4294901760, %v8031_v46 }
 0x37e   :  { %5349 = vmatprep.subr.bf16.mxu0 %v5348_v7  ;;  %v8033_v7 = vld [vmem:[#allocation43_spill] sm:$0xff] }
 0x37f   :  { %v8034_v28 = vand.u32 4294901760, %v8033_v7  ;;  %v2384_v7 = vld [vmem:[#allocation11 + $0x78] sm:$0xff] }
 0x381   :  { %5351 = vmatpush1.bf16.msra.mxu0 %v5350_v40  ;;  %v5394_v40 = vpack.c.bf16 %v8011_v9, %v8010_v55  ;;  %v5410_v34 = vpack.c.bf16 %v8034_v28, %v8032_v57 }
 0x382   :  { %5353 = vmatprep.subr.bf16.mxu0 %v5352_v3  ;;  %v8009_v3 = vand.u32 4294901760, %v6708_v47  ;;  %v8015_v47 = vand.u32 4294901760, %v7987_v54  ;;  %v8023_v54 = vld [vmem:[#allocation29_spill] sm:$0xff] }
 0x383   :  { %v8024_v60 = vand.u32 4294901760, %v8023_v54  ;;  %v2382_v54 = vld [vmem:[#allocation11 + $0x68] sm:$0xff] }
 0x384   :  { %v5392_v23 = vpack.c.bf16 %v8009_v3, %v8008_v25  ;;  %v8039_v25 = vld [vmem:[#allocation46_spill] sm:$0xff]  ;;  %v2432_v20 = vand.u32 4294901760, %v2382_v54 }
 0x385   :  { %5355 = vmatpush1.bf16.msra.mxu0 %v5354_v33  ;;  %v7996_v33 = vld [vmem:[#allocation32_spill] sm:$0xff]  ;;  %v5406_v2 = vpack.c.bf16 %v8026_v22, %v8024_v60  ;;  %v8040_v3 = vand.u32 4294901760, %v8039_v25  ;;  %v2435_v25 = vand.u32 4294901760, %v2383_v39 }
 0x386   :  { %5357 = vmatprep.subr.bf16.mxu0 %v7989_v37 }
 0x388   :  { %1979 = vmatmul.mubr.f32.vlgmr.msra.gmra.mrb[2].mxu0 %v1606_v58  ;;  %v8000_v58 = vld [vmem:[#allocation36_spill] sm:$0xff] }
 0x389   :  { %5359 = vmatpush1.bf16.msra.mxu0 %v7990_v32  ;;  %2081 = vmatprep.mubr.f32.mxu0 %v7920_v14 }
 0x38a   :  { %5361 = vmatprep.subr.bf16.mxu0 %v7991_v21 }
 0x38d   :  { %5363 = vmatpush1.bf16.msra.mxu0 %v7992_v19 }
 0x38e   :  { %5365 = vmatprep.subr.bf16.mxu0 %v7993_v17 }
 0x391   :  { %5367 = vmatpush1.bf16.msra.mxu0 %v6725_v16 }
 0x392   :  { %5369 = vmatprep.subr.bf16.mxu0 %v7994_v8 }
 0x395   :  { %5371 = vmatpush1.bf16.msra.mxu0 %v7995_v27 }
 0x396   :  { %5373 = vmatprep.subr.bf16.mxu0 %v7996_v33 }
 0x399   :  { %5375 = vmatpush1.bf16.msra.mxu0 %v7997_v53 }
 0x39a   :  { %5377 = vmatprep.subr.bf16.mxu0 %v7998_v18 }
 0x39d   :  { %5379 = vmatpush1.bf16.msra.mxu0 %v7999_v43 }
 0x39e   :  { %5381 = vmatprep.subr.bf16.mxu0 %v8000_v58 }
 0x3a1   :  { %5383 = vmatpush1.bf16.msra.mxu0 %v8001_v29 }
 0x3a2   :  { %5385 = vmatprep.subr.bf16.mxu0 %v8002_v52 }
 0x3a5   :  { %5387 = vmatpush1.bf16.msra.mxu0 %v8005_v5 }
 0x3a6   :  { %5389 = vmatprep.subr.bf16.mxu0 %v5388_v11  ;;  %v8036_v11 = vand.u32 4294901760, %v8035_v61  ;;  %v7257_v61 = vsub.f32 %v2379_v26, %v2423_v62 }
 0x3a8   :  { %2085 = vmatmul.mubr.f32.vlgmr.msra.gmra.mrb[2].mxu0 %v1607_v42  ;;  %v5398_v42 = vpack.c.bf16 %v8015_v47, %v8014_v24  ;;  %v8046_v24 = vand.u32 4294901760, %v6927_v56  ;;  %v2396_v56 = vand.u32 4294901760, %v2370_v36 }
 0x3a9   :  { %5391 = vmatpush1.bf16.msra.mxu0 %v5390_v63  ;;  %2251 = vmatprep.mubr.f32.mxu0 %v7920_v14  ;;  %v5412_v63 = vpack.c.bf16 %v8038_v30, %v8036_v11 }
 0x3aa   :  { %5393 = vmatprep.subr.bf16.mxu0 %v5392_v23  ;;  %v8041_v23 = vld [vmem:[#allocation47_spill] sm:$0xff] }
 0x3ab   :  { %v8042_v55 = vand.u32 4294901760, %v8041_v23 }
 0x3ad   :  { %5395 = vmatpush1.bf16.msra.mxu0 %v5394_v40  ;;  %v5414_v9 = vpack.c.bf16 %v8042_v55, %v8040_v3  ;;  %v8043_v40 = vand.u32 4294901760, %v6921_v48  ;;  %v2369_v48 = vld [vmem:[#allocation11] sm:$0xff]  ;;  %v2438_v3 = vand.u32 4294901760, %v2384_v7 }
 0x3ae   :  { %5397 = vmatprep.subr.bf16.mxu0 %v5396_v4  ;;  %v8045_v4 = vand.u32 4294901760, %v6925_v49  ;;  %v2393_v49 = vand.u32 4294901760, %v2369_v48 }
 0x3af   :  { %v5416_v12 = vpack.c.bf16 %v8044_v50, %v8043_v40  ;;  %v7273_v40 = vpack.c.bf16 %v2438_v3, %v2435_v25  ;;  %v7275_v50 = vsub.f32 %v2384_v7, %v2438_v3 }
 0x3b0   :  { %v5418_v47 = vpack.c.bf16 %v8046_v24, %v8045_v4  ;;  %v7237_v22 = vsub.f32 %v2369_v48, %v2393_v49 }
 0x3b1   :  { %5399 = vmatpush1.bf16.msra.mxu0 %v5398_v42  ;;  %v2377_v42 = vld [vmem:[#allocation11 + $0x40] sm:$0xff] }
 0x3b2   :  { %5401 = vmatprep.subr.bf16.mxu0 %v5400_v35  ;;  %v2417_v51 = vand.u32 4294901760, %v2377_v42  ;;  %v2420_v35 = vand.u32 4294901760, %v2378_v41  ;;  %v2486_v23 = vand.u32 4294901760, %v7237_v22 }
 0x3b4   :  { %v7229_v59 = vpack.c.bf16 %v2420_v35, %v2417_v51  ;;  %v7253_v28 = vsub.f32 %v2377_v42, %v2417_v51 }
 0x3b5   :  { %5403 = vmatpush1.bf16.msra.mxu0 %v5402_v0  ;;  %v2380_v0 = vld [vmem:[#allocation11 + $0x58] sm:$0xff] }
 0x3b6   :  { %5405 = vmatprep.subr.bf16.mxu0 %v5404_v45  ;;  %v2426_v44 = vand.u32 4294901760, %v2380_v0  ;;  %v2381_v45 = vld [vmem:[#allocation11 + $0x60] sm:$0xff] }
 0x3b7   :  { %v2429_v60 = vand.u32 4294901760, %v2381_v45 }
 0x3b8   :  { %v7233_v13 = vpack.c.bf16 %v2426_v44, %v2423_v62  ;;  %v7259_v11 = vsub.f32 %v2380_v0, %v2426_v44  ;;  %v7908_v0 = vand.u32 4294901760, %v7253_v28 }
 0x3b9   :  { %5407 = vmatpush1.bf16.msra.mxu0 %v5406_v2  ;;  %v7239_v2 = vsub.f32 %v2370_v36, %v2396_v56  ;;  %v7261_v38 = vpack.c.bf16 %v2432_v20, %v2429_v60  ;;  %v7263_v30 = vsub.f32 %v2381_v45, %v2429_v60 }
 0x3ba   :  { %5409 = vmatprep.subr.bf16.mxu0 %v5408_v15  ;;  %v2543_v45 = vsub.f32 %v7253_v28, %v7908_v0  ;;  %v7905_v7 = vand.u32 4294901760, %v7259_v11  ;;  %v2363_v0 = vld [vmem:[#allocation5] sm:$0xff] }
 0x3bb   :  { %v2493_v55 = vand.u32 4294901760, %v7239_v2 }
 0x3bc   :  { %v2544_v60 = vand.u32 4294901760, %v2543_v45 }
 0x3bd   :  { %5411 = vmatpush1.bf16.msra.mxu0 %v5410_v34  ;;  %v7255_v34 = vsub.f32 %v2378_v41, %v2420_v35  ;;  %v2494_v4 = vsub.f32 %v7239_v2, %v2493_v55 }
 0x3be   :  { %5413 = vmatprep.subr.bf16.mxu0 %v5412_v63  ;;  %v7265_v63 = vsub.f32 %v2382_v54, %v2432_v20 }
 0x3bf   :  { %v2495_v36 = vand.u32 4294901760, %v2494_v4  ;;  %v7907_v62 = vand.u32 4294901760, %v7255_v34 }
 0x3c1   :  { %5415 = vmatpush1.bf16.msra.mxu0 %v5414_v9  ;;  %v7270_v9 = vsub.f32 %v2383_v39, %v2435_v25  ;;  %v2550_v54 = vsub.f32 %v7255_v34, %v7907_v62  ;;  %v7906_v39 = vand.u32 4294901760, %v7257_v61 }
 0x3c2   :  { %5417 = vmatprep.subr.bf16.mxu0 %v5416_v12  ;;  %v2487_v12 = vsub.f32 %v7237_v22, %v2486_v23 }
 0x3c3   :  { %v2551_v20 = vand.u32 4294901760, %v2550_v54  ;;  %v2557_v3 = vsub.f32 %v7257_v61, %v7906_v39 }
 0x3c4   :  { %v2488_v48 = vand.u32 4294901760, %v2487_v12  ;;  %v2564_v12 = vsub.f32 %v7259_v11, %v7905_v7 }
 0x3c5   :  { %5419 = vmatpush1.bf16.msra.mxu0 %v5418_v47  ;;  %v7327_v25 = vpack.c.bf16 %v2551_v20, %v2544_v60  ;;  %v2558_v4 = vand.u32 4294901760, %v2557_v3  ;;  %v5501_v60 = vpack.c.bf16 %v7239_v2, %v7237_v22 }
 0x3c6   :  { %5421 = vmatprep.subr.bf16.mxu0 %v7989_v37  ;;  %v7213_v37 = vpack.c.bf16 %v2396_v56, %v2393_v49 }
 0x3c8   :  { %2253 = vmatmul.mubr.f32.vlgmr.msra.gmra.mrb[2].mxu0 %v7094_v10  ;;  %5454 = vmatpush3.bf16.msra.mxu1 %v7213_v37 }
 0x3c9   :  { %5423 = vmatpush1.bf16.msra.mxu0 %v7990_v32  ;;  %2355 = vmatprep.mubr.f32.mxu0 %v7920_v14  ;;  %v2371_v32 = vld [vmem:[#allocation11 + $0x10] sm:$0xff] }
 0x3ca   :  { %5425 = vmatprep.subr.bf16.mxu0 %v7991_v21  ;;  %v2372_v21 = vld [vmem:[#allocation11 + $0x18] sm:$0xff] }
 0x3cd   :  { %5427 = vmatpush1.bf16.msra.mxu0 %v7992_v19  ;;  %v2399_v19 = vand.u32 4294901760, %v2371_v32 }
 0x3ce   :  { %5429 = vmatprep.subr.bf16.mxu0 %v7993_v17  ;;  %v2402_v17 = vand.u32 4294901760, %v2372_v21 }
 0x3cf   :  { %v7241_v6 = vsub.f32 %v2371_v32, %v2399_v19  ;;  %v7293_v32 = vpack.c.bf16 %v2495_v36, %v2488_v48  ;;  %v2565_v48 = vand.u32 4294901760, %v2564_v12  ;;  %v7904_v36 = vand.u32 4294901760, %v7263_v30 }
 0x3d0   :  { %v7243_v1 = vsub.f32 %v2372_v21, %v2402_v17 }
 0x3d1   :  { %5431 = vmatpush1.bf16.msra.mxu0 %v6725_v16  ;;  %v8047_v16 = vmov 0.0|0.0   ;;  %v2500_v24 = vand.u32 4294901760, %v7241_v6 }
 0x3d2   :  { %5433 = vmatprep.subr.bf16.mxu0 %v7994_v8  ;;  %5455 = vmatprep.subr.bf16.mxu1 %v8047_v16  ;;  %v7217_v8 = vpack.c.bf16 %v2402_v17, %v2399_v19  ;;  %v2507_v47 = vand.u32 4294901760, %v7243_v1  ;;  %v5504_v20 = vpack.c.bf16 %v7243_v1, %v7241_v6 }
 0x3d3   :  { %v2501_v49 = vsub.f32 %v7241_v6, %v2500_v24 }
 0x3d4   :  { %5457 = vmatpush3.bf16.msra.mxu1 %v7217_v8  ;;  %v2508_v56 = vsub.f32 %v7243_v1, %v2507_v47 }
 0x3d5   :  { %5435 = vmatpush1.bf16.msra.mxu0 %v7995_v27  ;;  %v2374_v27 = vld [vmem:[#allocation11 + $0x28] sm:$0xff]  ;;  %5458 = vmatprep.subr.bf16.mxu1 %v8047_v16  ;;  %v2502_v21 = vand.u32 4294901760, %v2501_v49  ;;  %v7903_v49 = vand.u32 4294901760, %v7265_v63 }
 0x3d6   :  { %5437 = vmatprep.subr.bf16.mxu0 %v7996_v33  ;;  %v2509_v19 = vand.u32 4294901760, %v2508_v56  ;;  %v5492_v56 = vpack.c.bf16 %v2565_v48, %v2558_v4  ;;  %v5513_v4 = vpack.c.bf16 %v7255_v34, %v7253_v28  ;;  %v5516_v48 = vpack.c.bf16 %v7259_v11, %v7257_v61 }
 0x3d9   :  { %5439 = vmatpush1.bf16.msra.mxu0 %v7997_v53  ;;  %v2408_v53 = vand.u32 4294901760, %v2374_v27 }
 0x3da   :  { %5441 = vmatprep.subr.bf16.mxu0 %v7998_v18 }
 0x3db   :  { %v7247_v15 = vsub.f32 %v2374_v27, %v2408_v53  ;;  %v7297_v27 = vpack.c.bf16 %v2509_v19, %v2502_v21  ;;  %v2571_v21 = vsub.f32 %v7263_v30, %v7904_v36  ;;  %v2578_v19 = vsub.f32 %v7265_v63, %v7903_v49 }
 0x3dd   :  { %5443 = vmatpush1.bf16.msra.mxu0 %v7999_v43  ;;  %v2375_v43 = vld [vmem:[#allocation11 + $0x30] sm:$0xff]  ;;  %v8049_v2 = vand.u32 4294901760, %v7247_v15 }
 0x3de   :  { %5445 = vmatprep.subr.bf16.mxu0 %v8000_v58  ;;  %v2376_v58 = vld [vmem:[#allocation11 + $0x38] sm:$0xff] }
 0x3e1   :  { %5447 = vmatpush1.bf16.msra.mxu0 %v8001_v29  ;;  %v2411_v29 = vand.u32 4294901760, %v2375_v43 }
 0x3e2   :  { %5449 = vmatprep.subr.bf16.mxu0 %v8002_v52  ;;  %v2414_v52 = vand.u32 4294901760, %v2376_v58 }
 0x3e3   :  { %v7249_v46 = vsub.f32 %v2375_v43, %v2411_v29 }
 0x3e4   :  { %v7251_v57 = vsub.f32 %v2376_v58, %v2414_v52 }
 0x3e5   :  { %5451 = vmatpush1.bf16.msra.mxu0 %v8005_v5  ;;  %v7225_v5 = vpack.c.bf16 %v2414_v52, %v2411_v29  ;;  %v7910_v29 = vand.u32 4294901760, %v7249_v46 }
 0x3e6   :  { %5596 = vmatprep.subr.bf16.mxu0 %v8047_v16  ;;  %v7909_v52 = vand.u32 4294901760, %v7251_v57  ;;  %v5510_v12 = vpack.c.bf16 %v7251_v57, %v7249_v46  ;;  %v8051_v6 = vand.u32 4294901760, %v7251_v57 }
 0x3e7   :  { %v2529_v41 = vsub.f32 %v7249_v46, %v7910_v29 }
 0x3e8   :  { %2357 = vmatmul.mubr.f32.vlgmr.msra.gmra.mrb[2].mxu0 %v7094_v10  ;;  %v2373_v10 = vld [vmem:[#allocation11 + $0x20] sm:$0xff]  ;;  %v2536_v51 = vsub.f32 %v7251_v57, %v7909_v52  ;;  %v8057_v57 = vand.u32 4294901760, %v7265_v63 }
 0x3e9   :  { %4794 = vmatprep.mubr.msk.f32.mxu0 %vm6010_vm0, %v7920_v14  ;;  %v2405_v33 = vand.u32 4294901760, %v2373_v10  ;;  %v2530_v35 = vand.u32 4294901760, %v2529_v41 }
 0x3ea   :  { %v2537_v26 = vand.u32 4294901760, %v2536_v51 }
 0x3eb   :  { %v7221_v18 = vpack.c.bf16 %v2408_v53, %v2405_v33  ;;  %v7245_v31 = vsub.f32 %v2373_v10, %v2405_v33  ;;  %v7911_v10 = vand.u32 4294901760, %v7247_v15 }
 0x3ec   :  { %v7317_v44 = vpack.c.bf16 %v2537_v26, %v2530_v35 }
 0x3ed   :  { %5460 = vmatpush3.bf16.msra.mxu1 %v7221_v18  ;;  %v7912_v17 = vand.u32 4294901760, %v7245_v31  ;;  %v2522_v53 = vsub.f32 %v7247_v15, %v7911_v10  ;;  %v5507_v3 = vpack.c.bf16 %v7247_v15, %v7245_v31  ;;  %v8048_v22 = vand.u32 4294901760, %v7245_v31 }
 0x3ee   :  { %5461 = vmatprep.subr.bf16.mxu1 %v8047_v16  ;;  %v8055_v15 = vand.u32 4294901760, %v7259_v11  ;;  %v3047_v11 = vld [vmem:[#allocation13 + $0x68] sm:$0xff] }
 0x3ef   :  { %v2515_v33 = vsub.f32 %v7245_v31, %v7912_v17  ;;  %v2523_v58 = vand.u32 4294901760, %v2522_v53  ;;  %v2579_v53 = vand.u32 4294901760, %v2578_v19  ;;  %v5522_v19 = vpack.c.bf16 %v7275_v50, %v7270_v9 }
 0x3f0   :  { %v8054_v31 = vand.u32 4294901760, %v7257_v61 }
 0x3f1   :  { %5463 = vmatpush3.bf16.msra.mxu1 %v7225_v5  ;;  %v2516_v43 = vand.u32 4294901760, %v2515_v33  ;;  %v2572_v33 = vand.u32 4294901760, %v2571_v21  ;;  %v5519_v21 = vpack.c.bf16 %v7265_v63, %v7263_v30  ;;  %v3048_v63 = vld [vmem:[#allocation13 + $0x70] sm:$0xff] }
 0x3f2   :  { %5464 = vmatprep.subr.bf16.mxu1 %v8047_v16 }
 0x3f3   :  { %v7307_v42 = vpack.c.bf16 %v2523_v58, %v2516_v43  ;;  %v7902_v43 = vand.u32 4294901760, %v7270_v9  ;;  %v7901_v58 = vand.u32 4294901760, %v7275_v50  ;;  %v5495_v41 = vpack.c.bf16 %v2579_v53, %v2572_v33 }
 0x3f4   :  { %v1498_v33 = vlaneseq }
 0x3f5   :  { %5466 = vmatpush3.bf16.msra.mxu1 %v7229_v59  ;;  %v2585_v51 = vsub.f32 %v7270_v9, %v7902_v43  ;;  %v2592_v35 = vsub.f32 %v7275_v50, %v7901_v58 }
 0x3f6   :  { %5467 = vmatprep.subr.bf16.mxu1 %v8047_v16  ;;  %v1499_v53 = vshrl.u32 %v1498_v33, 7 }
 0x3f7   :  { %v2586_v26 = vand.u32 4294901760, %v2585_v51  ;;  %v2593_v45 = vand.u32 4294901760, %v2592_v35  ;;  %v1496_v35 = vld [vmem:[%s7783_s7] sm:$0x3] }
 0x3f8   :  { %v1500_v51 = vsub.s32 0, %v1499_v53 }
 0x3f9   :  { %5469 = vmatpush3.bf16.msra.mxu1 %v7233_v13  ;;  %v5498_v54 = vpack.c.bf16 %v2593_v45, %v2586_v26  ;;  %v1504_v26 = vsub.s32 1, %v1499_v53 }
 0x3fa   :  { %5470 = vmatprep.subr.bf16.mxu1 %v8047_v16  ;;  %v1501_v45 = vrot.slane %v1496_v35, %v1500_v51 }
 0x3fb   :  { %v1505_v58 = vrot.slane %v1496_v35, %v1504_v26 }
 0x3fd   :  { %5472 = vmatpush3.bf16.msra.mxu1 %v7261_v38 }
 0x3fe   :  { %5473 = vmatprep.subr.bf16.mxu1 %v8047_v16 }
 0x401   :  { %5475 = vmatpush3.bf16.msra.mxu1 %v7273_v40 }
 0x402   :  { %5476 = vmatprep.subr.bf16.mxu1 %v8047_v16 }
 0x4bb   :  { %v2358_v43 = vpop.f32.mrb[2].mxu0 }
 0x4bc   :  { %v5743_v49 = vadd.f32 %v2358_v43, %v1501_v45  ;;  %v2360_v36 = vpop.f32.mrb[3].mxu0  ;;  %v3043_v45 = vld [vmem:[#allocation13 + $0x48] sm:$0xff] }
 0x4bd   :  { %v5744_v7 = vadd.f32 %v2360_v36, %v1505_v58  ;;  %v3041_v58 = vld [vmem:[#allocation13 + $0x38] sm:$0xff] }
 0x4be   :  { %3699 = vst [vmem:[#allocation14 + $0x8] sm:$0xff] %v5743_v49 }
 0x4bf   :  { %v2364_v39 = vmul.f32 0.5, %v5744_v7  ;;  %3700 = vst [vmem:[#allocation14 + $0x10] sm:$0xff] %v5744_v7 }
 0x4c1   :  { %v2365_v62 = vmul.f32 1.442695, %v2364_v39  ;;  %v3039_v39 = vld [vmem:[#allocation13 + $0x28] sm:$0xff] }
 0x4c3   :  { %5810 = vpow2.f32 %v2365_v62 }
 0x4cd   :  { %v5811_v52 = vpop.eup %5810 }
 0x4ce   :  { %v2367_v33 = vmul.f32 %v5811_v52, %v2363_v0  ;;  %v3037_v0 = vld [vmem:[#allocation13 + $0x18] sm:$0xff] }
 0x4cf   :  { %v3067_v7 = vand.u32 4294901760, %v3037_v0 }
 0x4d0   :  { %v2368_v29 = vadd.f32 %v5743_v49, %v2367_v33  ;;  %v3073_v49 = vand.u32 4294901760, %v3039_v39 }
 0x4d2   :  { %3698 = vst [vmem:[#allocation14] sm:$0xff] %v2368_v29  ;;  %v7370_v10 = vand.u32 4294901760, %v2368_v29  ;;  %v7416_v17 = vsub.f32 %v3039_v39, %v3073_v49 }
 0x4d4   :  { %v7373_v53 = vsub.f32 %v2368_v29, %v7370_v10  ;;  %v3036_v29 = vld [vmem:[#allocation13 + $0x10] sm:$0xff] }
 0x4d5   :  { %v3064_v62 = vand.u32 4294901760, %v3036_v29 }
 0x4d6   :  { %v2475_v51 = vand.u32 4294901760, %v7373_v53 }
 0x4d7   :  { %v7404_v26 = vsub.f32 %v3036_v29, %v3064_v62  ;;  %v7406_v33 = vpack.c.bf16 %v3067_v7, %v3064_v62  ;;  %v3085_v29 = vand.u32 4294901760, %v3043_v45 }
 0x4d8   :  { %v2476_v36 = vsub.f32 %v7373_v53, %v2475_v51 }
 0x4da   :  { %v2477_v43 = vand.u32 4294901760, %v2476_v36  ;;  %v7408_v36 = vsub.f32 %v3037_v0, %v3067_v7 }
 0x4dc   :  { %4585 = vmatmul.mubr.f32.vlgmr.msra.gmra.mrb[4].mxu1 %v2477_v43 }
 0x4dd   :  { %5478 = vmatpush3.bf16.msra.mxu1 %v7293_v32  ;;  %4619 = vmatprep.mubr.msk.f32.mxu1 %vm6010_vm0, %v7920_v14  ;;  %v3034_v32 = vld [vmem:[#allocation13] sm:$0xff] }
 0x4de   :  { %5479 = vmatprep.subr.bf16.mxu1 %v8047_v16  ;;  %v3058_v52 = vand.u32 4294901760, %v3034_v32 }
 0x4e1   :  { %5481 = vmatpush3.bf16.msra.mxu1 %v7297_v27  ;;  %v3035_v27 = vld [vmem:[#allocation13 + $0x8] sm:$0xff] }
 0x4e2   :  { %5482 = vmatprep.subr.bf16.mxu1 %v8047_v16 }
 0x4e5   :  { %5484 = vmatpush3.bf16.msra.mxu1 %v7307_v42  ;;  %v3061_v42 = vand.u32 4294901760, %v3035_v27 }
 0x4e6   :  { %5485 = vmatprep.subr.bf16.mxu1 %v8047_v16 }
 0x4e7   :  { %v7402_v35 = vsub.f32 %v3035_v27, %v3061_v42  ;;  %v3079_v27 = vand.u32 4294901760, %v3041_v58 }
 0x4e9   :  { %5487 = vmatpush3.bf16.msra.mxu1 %v7317_v44  ;;  %v3038_v44 = vld [vmem:[#allocation13 + $0x20] sm:$0xff]  ;;  %v7422_v0 = vsub.f32 %v3041_v58, %v3079_v27 }
 0x4ea   :  { %5488 = vmatprep.subr.bf16.mxu1 %v8047_v16 }
 0x4ed   :  { %5490 = vmatpush3.bf16.msra.mxu1 %v7327_v25  ;;  %v3070_v25 = vand.u32 4294901760, %v3038_v44 }
 0x4ee   :  { %5491 = vmatprep.subr.bf16.mxu1 %v8047_v16 }
 0x4ef   :  { %v7410_v43 = vsub.f32 %v3038_v44, %v3070_v25  ;;  %v7426_v44 = vsub.f32 %v3043_v45, %v3085_v29 }
 0x4f1   :  { %5493 = vmatpush3.bf16.msra.mxu1 %v5492_v56  ;;  %v3040_v56 = vld [vmem:[#allocation13 + $0x30] sm:$0xff] }
 0x4f2   :  { %5494 = vmatprep.subr.bf16.mxu1 %v8047_v16 }
 0x4f5   :  { %5496 = vmatpush3.bf16.msra.mxu1 %v5495_v41  ;;  %v3042_v41 = vld [vmem:[#allocation13 + $0x40] sm:$0xff] }
 0x4f6   :  { %5497 = vmatprep.subr.bf16.mxu1 %v8047_v16 }
 0x4f9   :  { %5499 = vmatpush3.bf16.msra.mxu1 %v5498_v54  ;;  %v7398_v54 = vpack.c.bf16 %v3061_v42, %v3058_v52 }
 0x4fa   :  { %5500 = vmatprep.subr.bf16.mxu1 %v8047_v16 }
 0x4fb   :  { %5598 = vmatpush3.bf16.msra.mxu0 %v7398_v54 }
 0x4fc   :  { %4620 = vmatmul.mubr.f32.vlgmr.msra.gmra.mrb[4].mxu1 %v7370_v10  ;;  %5599 = vmatprep.subr.bf16.mxu0 %v8047_v16 }
 0x4fd   :  { %5502 = vmatpush3.bf16.msra.mxu1 %v5501_v60  ;;  %4654 = vmatprep.mubr.msk.f32.mxu1 %vm6010_vm0, %v7920_v14  ;;  %v7400_v60 = vsub.f32 %v3034_v32, %v3058_v52  ;;  %v3076_v32 = vand.u32 4294901760, %v3040_v56  ;;  %v3082_v52 = vand.u32 4294901760, %v3042_v41 }
 0x4fe   :  { %5503 = vmatprep.subr.bf16.mxu1 %v8047_v16 }
 0x4ff   :  { %v7420_v42 = vsub.f32 %v3040_v56, %v3076_v32  ;;  %v7424_v62 = vsub.f32 %v3042_v41, %v3082_v52  ;;  %5601 = vmatpush3.bf16.msra.mxu0 %v7406_v33  ;;  %v7440_v39 = vpack.c.bf16 %v3079_v27, %v3076_v32 }
 0x500   :  { %5602 = vmatprep.subr.bf16.mxu0 %v8047_v16 }
 0x501   :  { %5505 = vmatpush3.bf16.msra.mxu1 %v5504_v20  ;;  %v7432_v20 = vpack.c.bf16 %v3073_v49, %v3070_v25 }
 0x502   :  { %5506 = vmatprep.subr.bf16.mxu1 %v8047_v16 }
 0x503   :  { %5604 = vmatpush3.bf16.msra.mxu0 %v7432_v20 }
 0x504   :  { %5605 = vmatprep.subr.bf16.mxu0 %v8047_v16 }
 0x505   :  { %5508 = vmatpush3.bf16.msra.mxu1 %v5507_v3  ;;  %v7448_v3 = vpack.c.bf16 %v3085_v29, %v3082_v52 }
 0x506   :  { %5509 = vmatprep.subr.bf16.mxu1 %v8047_v16 }
 0x507   :  { %5607 = vmatpush3.bf16.msra.mxu0 %v7440_v39 }
 0x508   :  { %5608 = vmatprep.subr.bf16.mxu0 %v8047_v16 }
 0x509   :  { %5511 = vmatpush3.bf16.msra.mxu1 %v5510_v12  ;;  %v5549_v12 = vpack.c.bf16 %v2493_v55, %v2486_v23  ;;  %v5555_v23 = vpack.c.bf16 %v8049_v2, %v8048_v22  ;;  %v8050_v55 = vand.u32 4294901760, %v7249_v46  ;;  %v8056_v46 = vand.u32 4294901760, %v7263_v30 }
 0x50a   :  { %5512 = vmatprep.subr.bf16.mxu1 %v8047_v16  ;;  %v3097_v30 = vand.u32 4294901760, %v3047_v11 }
 0x50b   :  { %5610 = vmatpush3.bf16.msra.mxu0 %v7448_v3  ;;  %v5558_v1 = vpack.c.bf16 %v8051_v6, %v8050_v55  ;;  %v3179_v55 = vand.u32 4294901760, %v7410_v43  ;;  %v3186_v6 = vand.u32 4294901760, %v7416_v17 }
 0x50c   :  { %5611 = vmatprep.subr.bf16.mxu0 %v8047_v16  ;;  %v7572_v45 = vsub.f32 %v3047_v11, %v3097_v30 }
 0x50d   :  { %5514 = vmatpush3.bf16.msra.mxu1 %v5513_v4  ;;  %v5552_v4 = vpack.c.bf16 %v2507_v47, %v2500_v24  ;;  %v8052_v24 = vand.u32 4294901760, %v7253_v28  ;;  %v8053_v47 = vand.u32 4294901760, %v7255_v34  ;;  %v8058_v28 = vand.u32 4294901760, %v7270_v9  ;;  %v3049_v9 = vld [vmem:[#allocation13 + $0x78] sm:$0xff] }
 0x50e   :  { %5515 = vmatprep.subr.bf16.mxu1 %v8047_v16  ;;  %v8059_v34 = vand.u32 4294901760, %v7275_v50  ;;  %v3103_v50 = vand.u32 4294901760, %v3049_v9 }
 0x510   :  { %v7577_v27 = vsub.f32 %v3049_v9, %v3103_v50 }
 0x511   :  { %5517 = vmatpush3.bf16.msra.mxu1 %v5516_v48  ;;  %v5561_v48 = vpack.c.bf16 %v8053_v47, %v8052_v24  ;;  %v3180_v47 = vsub.f32 %v7410_v43, %v3179_v55 }
 0x512   :  { %5518 = vmatprep.subr.bf16.mxu1 %v8047_v16 }
 0x515   :  { %5520 = vmatpush3.bf16.msra.mxu1 %v5519_v21  ;;  %v5564_v21 = vpack.c.bf16 %v8055_v15, %v8054_v31  ;;  %v3181_v15 = vand.u32 4294901760, %v3180_v47 }
 0x516   :  { %5521 = vmatprep.subr.bf16.mxu1 %v8047_v16 }
 0x519   :  { %5523 = vmatpush3.bf16.msra.mxu1 %v5522_v19  ;;  %v5567_v19 = vpack.c.bf16 %v8057_v57, %v8056_v46  ;;  %v3193_v46 = vand.u32 4294901760, %v7420_v42  ;;  %v3200_v57 = vand.u32 4294901760, %v7422_v0 }
 0x51a   :  { %5524 = vmatprep.subr.bf16.mxu1 %v8047_v16 }
 0x51c   :  { %4655 = vmatmul.mubr.f32.vlgmr.msra.gmra.mrb[4].mxu1 %v7373_v53  ;;  %v5570_v53 = vpack.c.bf16 %v8059_v34, %v8058_v28  ;;  %v3194_v28 = vsub.f32 %v7420_v42, %v3193_v46  ;;  %v3201_v34 = vsub.f32 %v7422_v0, %v3200_v57 }
 0x51d   :  { %5526 = vmatpush3.bf16.msra.mxu1 %v7213_v37  ;;  %4689 = vmatprep.mubr.msk.f32.mxu1 %vm6010_vm0, %v7920_v14 }
 0x51e   :  { %5527 = vmatprep.subr.bf16.mxu1 %v8047_v16 }
 0x521   :  { %5529 = vmatpush3.bf16.msra.mxu1 %v7217_v8 }
 0x522   :  { %5530 = vmatprep.subr.bf16.mxu1 %v8047_v16 }
 0x525   :  { %5532 = vmatpush3.bf16.msra.mxu1 %v7221_v18 }
 0x526   :  { %5533 = vmatprep.subr.bf16.mxu1 %v8047_v16 }
 0x529   :  { %5535 = vmatpush3.bf16.msra.mxu1 %v7225_v5 }
 0x52a   :  { %5536 = vmatprep.subr.bf16.mxu1 %v8047_v16 }
 0x52d   :  { %5538 = vmatpush3.bf16.msra.mxu1 %v7229_v59 }
 0x52e   :  { %5539 = vmatprep.subr.bf16.mxu1 %v8047_v16 }
 0x531   :  { %5541 = vmatpush3.bf16.msra.mxu1 %v7233_v13 }
 0x532   :  { %5542 = vmatprep.subr.bf16.mxu1 %v8047_v16 }
 0x535   :  { %5544 = vmatpush3.bf16.msra.mxu1 %v7261_v38 }
 0x536   :  { %5545 = vmatprep.subr.bf16.mxu1 %v8047_v16 }
 0x539   :  { %5547 = vmatpush3.bf16.msra.mxu1 %v7273_v40 }
 0x53a   :  { %5548 = vmatprep.subr.bf16.mxu1 %v8047_v16 }
 0x53c   :  { %4690 = vmatmul.mubr.f32.vlgmr.msra.gmra.mrb[4].mxu1 %v2475_v51  ;;  %v3158_v51 = vand.u32 4294901760, %v7402_v35 }
 0x53d   :  { %5550 = vmatpush3.bf16.msra.mxu1 %v5549_v12  ;;  %4724 = vmatprep.mubr.msk.f32.mxu1 %vm6010_vm0, %v7920_v14  ;;  %v3165_v12 = vand.u32 4294901760, %v7404_v26 }
 0x53e   :  { %5551 = vmatprep.subr.bf16.mxu1 %v8047_v16  ;;  %v3159_v49 = vsub.f32 %v7402_v35, %v3158_v51 }
 0x53f   :  { %v3166_v2 = vsub.f32 %v7404_v26, %v3165_v12 }
 0x540   :  { %v3160_v29 = vand.u32 4294901760, %v3159_v49 }
 0x541   :  { %5553 = vmatpush3.bf16.msra.mxu1 %v5552_v4  ;;  %v3172_v4 = vand.u32 4294901760, %v7408_v36 }
 0x542   :  { %5554 = vmatprep.subr.bf16.mxu1 %v8047_v16 }
 0x545   :  { %5556 = vmatpush3.bf16.msra.mxu1 %v5555_v23  ;;  %v3173_v23 = vsub.f32 %v7408_v36, %v3172_v4 }
 0x546   :  { %5557 = vmatprep.subr.bf16.mxu1 %v8047_v16 }
 0x547   :  { %v3174_v24 = vand.u32 4294901760, %v3173_v23 }
 0x549   :  { %5559 = vmatpush3.bf16.msra.mxu1 %v5558_v1  ;;  %v3167_v1 = vand.u32 4294901760, %v3166_v2  ;;  %v7915_v2 = vand.u32 4294901760, %v7572_v45 }
 0x54a   :  { %5560 = vmatprep.subr.bf16.mxu1 %v8047_v16 }
 0x54b   :  { %v5624_v31 = vpack.c.bf16 %v3174_v24, %v3167_v1  ;;  %v3243_v24 = vsub.f32 %v7572_v45, %v7915_v2 }
 0x54d   :  { %5562 = vmatpush3.bf16.msra.mxu1 %v5561_v48  ;;  %v3187_v48 = vsub.f32 %v7416_v17, %v3186_v6 }
 0x54e   :  { %5563 = vmatprep.subr.bf16.mxu1 %v8047_v16 }
 0x551   :  { %5565 = vmatpush3.bf16.msra.mxu1 %v5564_v21  ;;  %v3188_v21 = vand.u32 4294901760, %v3187_v48  ;;  %v3244_v48 = vand.u32 4294901760, %v3243_v24 }
 0x552   :  { %5566 = vmatprep.subr.bf16.mxu1 %v8047_v16 }
 0x555   :  { %5568 = vmatpush3.bf16.msra.mxu1 %v5567_v19  ;;  %v5627_v19 = vpack.c.bf16 %v3188_v21, %v3181_v15  ;;  %v7913_v21 = vand.u32 4294901760, %v7577_v27 }
 0x556   :  { %5569 = vmatprep.subr.bf16.mxu1 %v8047_v16 }
 0x559   :  { %5571 = vmatpush3.bf16.msra.mxu1 %v5570_v53  ;;  %v3195_v53 = vand.u32 4294901760, %v3194_v28 }
 0x55a   :  { %5572 = vmatprep.subr.bf16.mxu1 %v8047_v16 }
 0x55c   :  { %4725 = vmatmul.mubr.f32.vlgmr.msra.gmra.mrb[4].mxu1 %v7370_v10 }
 0x55d   :  { %5574 = vmatpush3.bf16.msra.mxu1 %v7213_v37  ;;  %4759 = vmatprep.mubr.msk.f32.mxu1 %vm6010_vm0, %v7920_v14  ;;  %v3044_v37 = vld [vmem:[#allocation13 + $0x50] sm:$0xff] }
 0x55e   :  { %5575 = vmatprep.subr.bf16.mxu1 %v8047_v16 }
 0x561   :  { %5577 = vmatpush3.bf16.msra.mxu1 %v7217_v8  ;;  %v3045_v8 = vld [vmem:[#allocation13 + $0x58] sm:$0xff] }
 0x562   :  { %5578 = vmatprep.subr.bf16.mxu1 %v8047_v16 }
 0x565   :  { %5580 = vmatpush3.bf16.msra.mxu1 %v7221_v18  ;;  %v3088_v18 = vand.u32 4294901760, %v3044_v37 }
 0x566   :  { %5581 = vmatprep.subr.bf16.mxu1 %v8047_v16 }
 0x567   :  { %v7566_v56 = vsub.f32 %v3044_v37, %v3088_v18  ;;  %v3202_v37 = vand.u32 4294901760, %v3201_v34 }
 0x569   :  { %5583 = vmatpush3.bf16.msra.mxu1 %v7225_v5  ;;  %v3091_v5 = vand.u32 4294901760, %v3045_v8 }
 0x56a   :  { %5584 = vmatprep.subr.bf16.mxu1 %v8047_v16 }
 0x56b   :  { %v7548_v61 = vpack.c.bf16 %v3091_v5, %v3088_v18  ;;  %v7568_v58 = vsub.f32 %v3045_v8, %v3091_v5  ;;  %v3207_v8 = vand.u32 4294901760, %v7424_v62  ;;  %v3214_v18 = vand.u32 4294901760, %v7426_v44 }
 0x56c   :  { %v5630_v5 = vpack.c.bf16 %v3202_v37, %v3195_v53  ;;  %v3257_v53 = vsub.f32 %v7577_v27, %v7913_v21 }
 0x56d   :  { %5586 = vmatpush3.bf16.msra.mxu1 %v7229_v59  ;;  %v3046_v59 = vld [vmem:[#allocation13 + $0x60] sm:$0xff]  ;;  %5613 = vmatpush3.bf16.msra.mxu0 %v7548_v61  ;;  %v3215_v11 = vsub.f32 %v7426_v44, %v3214_v18  ;;  %v3228_v9 = vand.u32 4294901760, %v7568_v58 }
 0x56e   :  { %5587 = vmatprep.subr.bf16.mxu1 %v8047_v16  ;;  %5614 = vmatprep.subr.bf16.mxu0 %v8047_v16 }
 0x571   :  { %5589 = vmatpush3.bf16.msra.mxu1 %v7233_v13  ;;  %v3094_v13 = vand.u32 4294901760, %v3046_v59 }
 0x572   :  { %5590 = vmatprep.subr.bf16.mxu1 %v8047_v16 }
 0x573   :  { %v7570_v41 = vsub.f32 %v3046_v59, %v3094_v13  ;;  %v3208_v59 = vsub.f32 %v7424_v62, %v3207_v8 }
 0x575   :  { %5592 = vmatpush3.bf16.msra.mxu1 %v7261_v38  ;;  %v7552_v38 = vpack.c.bf16 %v3097_v30, %v3094_v13  ;;  %v3209_v13 = vand.u32 4294901760, %v3208_v59  ;;  %v3216_v30 = vand.u32 4294901760, %v3215_v11  ;;  %v3258_v59 = vand.u32 4294901760, %v3257_v53 }
 0x576   :  { %5593 = vmatprep.subr.bf16.mxu1 %v8047_v16 }
 0x577   :  { %5616 = vmatpush3.bf16.msra.mxu0 %v7552_v38 }
 0x578   :  { %5617 = vmatprep.subr.bf16.mxu0 %v8047_v16 }
 0x579   :  { %5595 = vmatpush3.bf16.msra.mxu1 %v7273_v40  ;;  %v3100_v40 = vand.u32 4294901760, %v3048_v63 }
 0x57b   :  { %v7558_v7 = vpack.c.bf16 %v3103_v50, %v3100_v40  ;;  %v7575_v32 = vsub.f32 %v3048_v63, %v3100_v40  ;;  %v3221_v63 = vand.u32 4294901760, %v7566_v56  ;;  %v5633_v40 = vpack.c.bf16 %v3216_v30, %v3209_v13 }
 0x57c   :  { %4760 = vmatmul.mubr.f32.vlgmr.msra.gmra.mrb[4].mxu1 %v7370_v10  ;;  %v3151_v10 = vand.u32 4294901760, %v7400_v60  ;;  %v5645_v13 = vpack.c.bf16 %v7402_v35, %v7400_v60  ;;  %v5648_v30 = vpack.c.bf16 %v7408_v36, %v7404_v26  ;;  %v5702_v35 = vpack.c.bf16 %v3200_v57, %v3193_v46 }
 0x57d   :  { %5619 = vmatpush3.bf16.msra.mxu0 %v7558_v7  ;;  %v3222_v50 = vsub.f32 %v7566_v56, %v3221_v63  ;;  %v7914_v15 = vand.u32 4294901760, %v7575_v32  ;;  %v5666_v24 = vpack.c.bf16 %v7577_v27, %v7575_v32  ;;  %v5705_v26 = vpack.c.bf16 %v3214_v18, %v3207_v8 }
 0x57e   :  { %v3152_v25 = vsub.f32 %v7400_v60, %v3151_v10  ;;  %5620 = vmatprep.subr.bf16.mxu0 %v8047_v16  ;;  %v5699_v60 = vpack.c.bf16 %v3186_v6, %v3179_v55  ;;  %v8060_v36 = vand.u32 4294901760, %v7570_v41 }
 0x57f   :  { %v3223_v49 = vand.u32 4294901760, %v3222_v50  ;;  %v3250_v34 = vsub.f32 %v7575_v32, %v7914_v15  ;;  %v5651_v50 = vpack.c.bf16 %v7416_v17, %v7410_v43  ;;  %v5708_v17 = vpack.c.bf16 %v3228_v9, %v3221_v63 }
 0x580   :  { %v3153_v52 = vand.u32 4294901760, %v3152_v25  ;;  %v3229_v25 = vsub.f32 %v7568_v58, %v3228_v9  ;;  %v8061_v43 = vand.u32 4294901760, %v7572_v45 }
 0x581   :  { %v3251_v37 = vand.u32 4294901760, %v3250_v34 }
 0x582   :  { %v7582_v22 = vpack.c.bf16 %v3160_v29, %v3153_v52  ;;  %v3230_v52 = vand.u32 4294901760, %v3229_v25  ;;  %v7916_v29 = vand.u32 4294901760, %v7570_v41  ;;  %v5654_v25 = vpack.c.bf16 %v7422_v0, %v7420_v42 }
 0x583   :  { %v5642_v11 = vpack.c.bf16 %v3258_v59, %v3251_v37  ;;  %v5711_v42 = vpack.c.bf16 %v8061_v43, %v8060_v36  ;;  %v8062_v0 = vand.u32 4294901760, %v7575_v32 }
 0x584   :  { %v5636_v23 = vpack.c.bf16 %v3230_v52, %v3223_v49  ;;  %v3236_v1 = vsub.f32 %v7570_v41, %v7916_v29  ;;  %v5657_v49 = vpack.c.bf16 %v7426_v44, %v7424_v62  ;;  %v5660_v52 = vpack.c.bf16 %v7568_v58, %v7566_v56 }
 0x585   :  { %v8063_v62 = vand.u32 4294901760, %v7577_v27 }
 0x586   :  { %v3237_v47 = vand.u32 4294901760, %v3236_v1  ;;  %v5663_v1 = vpack.c.bf16 %v7572_v45, %v7570_v41 }
 0x587   :  { %v5714_v44 = vpack.c.bf16 %v8063_v62, %v8062_v0 }
 0x588   :  { %v5639_v28 = vpack.c.bf16 %v3244_v48, %v3237_v47  ;;  %v3722_v47 = vld [vmem:[%s7785_s9] ss:$0 sm:$0xff] }
 0x64f   :  { %v3029_v48 = vpop.f32.mrb[4].mxu1 }
 0x650   :  { %v5745_v34 = vadd.f32 %v3722_v47, %v3029_v48  ;;  %v4761_v53 = vpop.f32.mrb[5].mxu1 }
 0x652   :  { %v3033_v37 = vmax.f32 %v5745_v34, 0.0 }
 0x654   :  { %v7657_v59 = vand.u32 4294901760, %v3033_v37 }
 0x656   :  { %v3139_v21 = vsub.f32 %v3033_v37, %v7657_v59 }
 0x658   :  { %v3140_v15 = vand.u32 4294901760, %v3139_v21 }
 0x65a   :  { %v3141_v2 = vsub.f32 %v3139_v21, %v3140_v15 }
 0x65c   :  { %v3142_v29 = vand.u32 4294901760, %v3141_v2 }
 0x65e   :  { %4795 = vmatmul.mubr.f32.vlgmr.msra.gmra.mrb[4].mxu0 %v3142_v29 }
 0x65f   :  { %5622 = vmatpush3.bf16.msra.mxu0 %v7582_v22  ;;  %4829 = vmatprep.mubr.msk.f32.mxu0 %vm6010_vm0, %v7920_v14  ;;  %v5693_v22 = vpack.c.bf16 %v3158_v51, %v3151_v10 }
 0x660   :  { %5623 = vmatprep.subr.bf16.mxu0 %v8047_v16 }
 0x663   :  { %5625 = vmatpush3.bf16.msra.mxu0 %v5624_v31  ;;  %v5696_v31 = vpack.c.bf16 %v3172_v4, %v3165_v12 }
 0x664   :  { %5626 = vmatprep.subr.bf16.mxu0 %v8047_v16 }
 0x667   :  { %5628 = vmatpush3.bf16.msra.mxu0 %v5627_v19 }
 0x668   :  { %5629 = vmatprep.subr.bf16.mxu0 %v8047_v16 }
 0x66b   :  { %5631 = vmatpush3.bf16.msra.mxu0 %v5630_v5 }
 0x66c   :  { %5632 = vmatprep.subr.bf16.mxu0 %v8047_v16 }
 0x66f   :  { %5634 = vmatpush3.bf16.msra.mxu0 %v5633_v40 }
 0x670   :  { %5635 = vmatprep.subr.bf16.mxu0 %v8047_v16 }
 0x673   :  { %5637 = vmatpush3.bf16.msra.mxu0 %v5636_v23 }
 0x674   :  { %5638 = vmatprep.subr.bf16.mxu0 %v8047_v16 }
 0x677   :  { %5640 = vmatpush3.bf16.msra.mxu0 %v5639_v28 }
 0x678   :  { %5641 = vmatprep.subr.bf16.mxu0 %v8047_v16 }
 0x67b   :  { %5643 = vmatpush3.bf16.msra.mxu0 %v5642_v11 }
 0x67c   :  { %5644 = vmatprep.subr.bf16.mxu0 %v8047_v16 }
 0x67e   :  { %4830 = vmatmul.mubr.f32.vlgmr.msra.gmra.mrb[4].mxu0 %v7657_v59 }
 0x67f   :  { %5646 = vmatpush3.bf16.msra.mxu0 %v5645_v13  ;;  %4864 = vmatprep.mubr.msk.f32.mxu0 %vm6010_vm0, %v7920_v14 }
 0x680   :  { %5647 = vmatprep.subr.bf16.mxu0 %v8047_v16 }
 0x683   :  { %5649 = vmatpush3.bf16.msra.mxu0 %v5648_v30 }
 0x684   :  { %5650 = vmatprep.subr.bf16.mxu0 %v8047_v16 }
 0x687   :  { %5652 = vmatpush3.bf16.msra.mxu0 %v5651_v50 }
 0x688   :  { %5653 = vmatprep.subr.bf16.mxu0 %v8047_v16 }
 0x68b   :  { %5655 = vmatpush3.bf16.msra.mxu0 %v5654_v25 }
 0x68c   :  { %5656 = vmatprep.subr.bf16.mxu0 %v8047_v16 }
 0x68f   :  { %5658 = vmatpush3.bf16.msra.mxu0 %v5657_v49 }
 0x690   :  { %5659 = vmatprep.subr.bf16.mxu0 %v8047_v16 }
 0x693   :  { %5661 = vmatpush3.bf16.msra.mxu0 %v5660_v52 }
 0x694   :  { %5662 = vmatprep.subr.bf16.mxu0 %v8047_v16 }
 0x697   :  { %5664 = vmatpush3.bf16.msra.mxu0 %v5663_v1 }
 0x698   :  { %5665 = vmatprep.subr.bf16.mxu0 %v8047_v16 }
 0x69b   :  { %5667 = vmatpush3.bf16.msra.mxu0 %v5666_v24 }
 0x69c   :  { %5668 = vmatprep.subr.bf16.mxu0 %v8047_v16 }
 0x69e   :  { %4865 = vmatmul.mubr.f32.vlgmr.msra.gmra.mrb[4].mxu0 %v3139_v21 }
 0x69f   :  { %5670 = vmatpush3.bf16.msra.mxu0 %v7398_v54  ;;  %4899 = vmatprep.mubr.msk.f32.mxu0 %vm6010_vm0, %v7920_v14 }
 0x6a0   :  { %5671 = vmatprep.subr.bf16.mxu0 %v8047_v16 }
 0x6a3   :  { %5673 = vmatpush3.bf16.msra.mxu0 %v7406_v33 }
 0x6a4   :  { %5674 = vmatprep.subr.bf16.mxu0 %v8047_v16 }
 0x6a7   :  { %5676 = vmatpush3.bf16.msra.mxu0 %v7432_v20 }
 0x6a8   :  { %5677 = vmatprep.subr.bf16.mxu0 %v8047_v16 }
 0x6ab   :  { %5679 = vmatpush3.bf16.msra.mxu0 %v7440_v39 }
 0x6ac   :  { %5680 = vmatprep.subr.bf16.mxu0 %v8047_v16 }
 0x6af   :  { %5682 = vmatpush3.bf16.msra.mxu0 %v7448_v3 }
 0x6b0   :  { %5683 = vmatprep.subr.bf16.mxu0 %v8047_v16 }
 0x6b3   :  { %5685 = vmatpush3.bf16.msra.mxu0 %v7548_v61 }
 0x6b4   :  { %5686 = vmatprep.subr.bf16.mxu0 %v8047_v16 }
 0x6b7   :  { %5688 = vmatpush3.bf16.msra.mxu0 %v7552_v38 }
 0x6b8   :  { %5689 = vmatprep.subr.bf16.mxu0 %v8047_v16 }
 0x6bb   :  { %5691 = vmatpush3.bf16.msra.mxu0 %v7558_v7 }
 0x6bc   :  { %5692 = vmatprep.subr.bf16.mxu0 %v8047_v16 }
 0x6be   :  { %4900 = vmatmul.mubr.f32.vlgmr.msra.gmra.mrb[4].mxu0 %v3140_v15 }
 0x6bf   :  { %5694 = vmatpush3.bf16.msra.mxu0 %v5693_v22  ;;  %4934 = vmatprep.mubr.msk.f32.mxu0 %vm6010_vm0, %v7920_v14 }
 0x6c0   :  { %5695 = vmatprep.subr.bf16.mxu0 %v8047_v16 }
 0x6c3   :  { %5697 = vmatpush3.bf16.msra.mxu0 %v5696_v31 }
 0x6c4   :  { %5698 = vmatprep.subr.bf16.mxu0 %v8047_v16 }
 0x6c7   :  { %5700 = vmatpush3.bf16.msra.mxu0 %v5699_v60 }
 0x6c8   :  { %5701 = vmatprep.subr.bf16.mxu0 %v8047_v16 }
 0x6cb   :  { %5703 = vmatpush3.bf16.msra.mxu0 %v5702_v35 }
 0x6cc   :  { %5704 = vmatprep.subr.bf16.mxu0 %v8047_v16 }
 0x6cf   :  { %5706 = vmatpush3.bf16.msra.mxu0 %v5705_v26 }
 0x6d0   :  { %5707 = vmatprep.subr.bf16.mxu0 %v8047_v16 }
 0x6d3   :  { %5709 = vmatpush3.bf16.msra.mxu0 %v5708_v17 }
 0x6d4   :  { %5710 = vmatprep.subr.bf16.mxu0 %v8047_v16 }
 0x6d7   :  { %5712 = vmatpush3.bf16.msra.mxu0 %v5711_v42 }
 0x6d8   :  { %5713 = vmatprep.subr.bf16.mxu0 %v8047_v16 }
 0x6db   :  { %5715 = vmatpush3.bf16.msra.mxu0 %v5714_v44 }
 0x6dc   :  { %5716 = vmatprep.subr.bf16.mxu0 %v8047_v16 }
 0x6de   :  { %4935 = vmatmul.mubr.f32.vlgmr.msra.gmra.mrb[4].mxu0 %v7657_v59 }
 0x6df   :  { %5718 = vmatpush3.bf16.msra.mxu0 %v7398_v54  ;;  %4969 = vmatprep.mubr.msk.f32.mxu0 %vm6010_vm0, %v7920_v14  ;;  %v3723_v14 = vld [vmem:[%s7787_s11] ss:$0 sm:$0xff] }
 0x6e0   :  { %5719 = vmatprep.subr.bf16.mxu0 %v8047_v16 }
 0x6e3   :  { %5721 = vmatpush3.bf16.msra.mxu0 %v7406_v33 }
 0x6e4   :  { %5722 = vmatprep.subr.bf16.mxu0 %v8047_v16 }
 0x6e7   :  { %5724 = vmatpush3.bf16.msra.mxu0 %v7432_v20 }
 0x6e8   :  { %5725 = vmatprep.subr.bf16.mxu0 %v8047_v16 }
 0x6eb   :  { %5727 = vmatpush3.bf16.msra.mxu0 %v7440_v39 }
 0x6ec   :  { %5728 = vmatprep.subr.bf16.mxu0 %v8047_v16 }
 0x6ef   :  { %5730 = vmatpush3.bf16.msra.mxu0 %v7448_v3 }
 0x6f0   :  { %5731 = vmatprep.subr.bf16.mxu0 %v8047_v16 }
 0x6f3   :  { %5733 = vmatpush3.bf16.msra.mxu0 %v7548_v61 }
 0x6f4   :  { %5734 = vmatprep.subr.bf16.mxu0 %v8047_v16 }
 0x6f7   :  { %5736 = vmatpush3.bf16.msra.mxu0 %v7552_v38 }
 0x6f8   :  { %5737 = vmatprep.subr.bf16.mxu0 %v8047_v16 }
 0x6fb   :  { %5739 = vmatpush3.bf16.msra.mxu0 %v7558_v7 }
 0x6fe   :  { %4970 = vmatmul.mubr.f32.vlgmr.msra.gmra.mrb[4].mxu0 %v7657_v59 }
 0x7d1   :  { %v3694_v54 = vpop.f32.mrb[4].mxu0 }
 0x7d2   :  { %v5746_v33 = vadd.f32 %v3723_v14, %v3694_v54  ;;  %v4971_v20 = vpop.f32.mrb[5].mxu0 }
 0x7d4   :  { %3701 = vst [vmem:[#allocation14 + $0x18] sm:$0xff] %v5746_v33 }
 0x7d5   :  { %5977 = shalt.err (!%p5974_p4)
}
 0x7d6   :  { %s5978_s20 = scalar_lea.hbm %s7788_s12, 512 }
 0x7d7   :  { %p5979_p5 = scmp.ne.s32.totalorder %s7788_s12, %s5978_s20  ;;  %p5982_p6 = scmp.lt.u32.totalorder %s5978_s20, %s7788_s12 }
 0x7d9   :  { %p5984_p7 = pnand %p5982_p6, %p5979_p5 }
 0x7db   :  { %5987 = shalt.err (!%p5984_p7)
}
 0x7dc   :  { %3711 = dma.vmem_to_hbm [thread:$0]  %s3709_s17, 512, %s7788_s12, [#allocation4]  }
 0x7dd   :  { %5996 = dma.done.wait [#allocation4], 512  }
 0x7de   :  { %5997 = vsyncadd [#allocation4], 4294966784 }
 0x7df   :  { %3715 = vsyncpa [#allocation3], 1 }
 0x7e0   :  { %3716 = vsyncpa [#allocation6], 1 }
 0x7e1   :  { %3717 = vsyncpa [#allocation9], 1 }
 0x7e2   :  { %3718 = vsyncpa [#allocation12], 1 }
 0x7e3   :  { %3719 = vsyncpa [#allocation4], 1 }

</bundles_post_ra>
